<compile_context>
chip_gen: v5e
topology: v5e:2x2
jax: 0.10.0
libtpu: 0.0.40
codegen_flags: <defaults>
</compile_context>

<pallas_src>
import jax
import jax.numpy as jnp
from jax.experimental import pallas as pl
from jax.experimental.pallas import tpu as pltpu

# SELU constants (match torch.nn.functional.selu)
_SELU_ALPHA = 1.6732632423543772
_SELU_SCALE = 1.0507009873554804

IN_FEATURES = 1500
HIDDEN = 500
OUT_FEATURES = 2

HID_PAD = 512   # hidden padded to a lane-dense multiple of 128
OUT_PAD = 128   # output padded to one full lane group (unmasked vst)

TB_MAX = 512    # max batch-tile rows per grid step


def mlp_kernel(x_ref, w1_ref, b1_ref, w2_ref, b2_ref, o_ref):
    # bf16 cast fused into the kernel (no wrapper-side padded copy of x).
    x = x_ref[...].astype(jnp.bfloat16)                                # (TB, 1500)
    # fc1 on the MXU, f32 accumulation.
    h = jnp.dot(x, w1_ref[...], preferred_element_type=jnp.float32)   # (TB, 512)
    h = h + b1_ref[...]
    # SELU in f32; clamp exp argument so the unselected branch never overflows.
    h = _SELU_SCALE * jnp.where(
        h > 0.0, h, _SELU_ALPHA * (jnp.exp(jnp.minimum(h, 0.0)) - 1.0))
    # fc2: (TB, 512)bf16 @ (512, 128)bf16 -> f32.
    out = jnp.dot(h.astype(jnp.bfloat16), w2_ref[...],
                  preferred_element_type=jnp.float32)
    o_ref[...] = out + b2_ref[...]


def prepare_params(w1, b1, w2, b2):
    """Lay params out for the kernel (y = x @ W + b); done once, offline."""
    w1p = (jnp.zeros((IN_FEATURES, HID_PAD), jnp.bfloat16)
           .at[:, :HIDDEN].set(w1.astype(jnp.bfloat16)))
    b1p = (jnp.zeros((1, HID_PAD), jnp.float32)
           .at[:, :HIDDEN].set(b1.reshape(1, HIDDEN)))
    w2p = (jnp.zeros((HID_PAD, OUT_PAD), jnp.bfloat16)
           .at[:HIDDEN, :OUT_FEATURES].set(w2.astype(jnp.bfloat16)))
    b2p = (jnp.zeros((1, OUT_PAD), jnp.float32)
           .at[:, :OUT_FEATURES].set(b2.reshape(1, OUT_FEATURES)))
    return w1p, b1p, w2p, b2p


def _round_up(n, m):
    return ((n + m - 1) // m) * m


def _choose_batch_tile(B):
    if B <= 256:
        return _round_up(B, 16)               # single step, minimal padding
    if B <= 2 * TB_MAX:
        return _round_up(pl.cdiv(B, 2), 16)   # exactly 2 steps -> both v7x TCs busy
    return TB_MAX


def net_forward(x, w1p, b1p, w2p, b2p):
    B = x.shape[0]
    TB = _choose_batch_tile(B)
    n_steps = pl.cdiv(B, TB)
    Bp = n_steps * TB
    if Bp != B:
        # Batch-only pad (zero rows -> finite math; rows sliced off below).
        x = jnp.pad(x, ((0, Bp - B), (0, 0)))

    vmem_bytes = (
        2 * TB * IN_FEATURES * 4                              # x tiles, f32, double-buffered
        + 2 * TB * OUT_PAD * 4                                # out tiles, f32, double-buffered
        + (IN_FEATURES * HID_PAD + HID_PAD * OUT_PAD) * 2     # bf16 weights, single-buffered
        + (HID_PAD + OUT_PAD) * 4                             # biases
        + TB * IN_FEATURES * 2                                # in-kernel bf16 copy of x
        + TB * HID_PAD * (4 + 2)                              # f32 hidden + bf16 cast of it
    )
    vmem_limit = min(int(vmem_bytes) + (8 << 20), 32 * 1024 * 1024)

    cost = pl.CostEstimate(
        flops=2 * Bp * IN_FEATURES * HID_PAD + 2 * Bp * HID_PAD * OUT_PAD,
        transcendentals=Bp * HID_PAD,
        bytes_accessed=(Bp * IN_FEATURES * 4
                        + (IN_FEATURES * HID_PAD + HID_PAD * OUT_PAD) * 2
                        + (HID_PAD + OUT_PAD) * 4
                        + Bp * OUT_PAD * 4),
    )

    resident = pl.Buffered(1)  # grid-invariant blocks: no dead 2nd pipeline buffer
    out_padded = pl.pallas_call(
        mlp_kernel,
        out_shape=jax.ShapeDtypeStruct((Bp, OUT_PAD), jnp.float32),
        grid=(n_steps,),
        in_specs=[
            pl.BlockSpec((TB, IN_FEATURES), lambda i: (i, 0)),              # x: follows grid
            pl.BlockSpec((IN_FEATURES, HID_PAD), lambda i: (0, 0),
                         pipeline_mode=resident),                           # w1: VMEM-resident
            pl.BlockSpec((1, HID_PAD), lambda i: (0, 0),
                         pipeline_mode=resident),                           # b1
            pl.BlockSpec((HID_PAD, OUT_PAD), lambda i: (0, 0),
                         pipeline_mode=resident),                           # w2
            pl.BlockSpec((1, OUT_PAD), lambda i: (0, 0),
                         pipeline_mode=resident),                           # b2
        ],
        out_specs=pl.BlockSpec((TB, OUT_PAD), lambda i: (i, 0)),
        compiler_params=pltpu.CompilerParams(
            dimension_semantics=("parallel",),
            vmem_limit_bytes=vmem_limit,
        ),
        cost_estimate=cost,
    )(x, w1p, b1p, w2p, b2p)

    return out_padded[:B, :OUT_FEATURES]


def init_params(key):
    # Deterministic init mimicking nn.Linear default (uniform(-1/sqrt(fan_in), ...)),
    # stored transposed vs PyTorch so the kernel computes y = x @ W + b.
    k1, k2, k3, k4 = jax.random.split(key, 4)
    bound1 = 1.0 / jnp.sqrt(IN_FEATURES)
    bound2 = 1.0 / jnp.sqrt(HIDDEN)
    w1 = jax.random.uniform(k1, (IN_FEATURES, HIDDEN), jnp.float32, -bound1, bound1)
    b1 = jax.random.uniform(k2, (1, HIDDEN), jnp.float32, -bound1, bound1)
    w2 = jax.random.uniform(k3, (HIDDEN, OUT_FEATURES), jnp.float32, -bound2, bound2)
    b2 = jax.random.uniform(k4, (1, OUT_FEATURES), jnp.float32, -bound2, bound2)
    return w1, b1, w2, b2


if __name__ == "__main__":
    key = jax.random.PRNGKey(0)
    kx, kp = jax.random.split(key)
    batch = 4
    x = jax.random.normal(kx, (batch, IN_FEATURES), jnp.float32)
    w1, b1, w2, b2 = init_params(kp)
    params = prepare_params(w1, b1, w2, b2)

    out = net_forward(x, *params)
    jax.block_until_ready(out)

    # Reference in plain JAX using the same bf16 casts / f32 accumulation
    # (padding columns/rows are exact zeros, so unpadded math is equivalent).
    xb = x.astype(jnp.bfloat16)
    h_ref = jnp.dot(xb, w1.astype(jnp.bfloat16),
                    preferred_element_type=jnp.float32) + b1
    h_ref = _SELU_SCALE * jnp.where(
        h_ref > 0.0, h_ref,
        _SELU_ALPHA * (jnp.exp(jnp.minimum(h_ref, 0.0)) - 1.0))
    ref = jnp.dot(h_ref.astype(jnp.bfloat16), w2.astype(jnp.bfloat16),
                  preferred_element_type=jnp.float32) + b2

    assert out.shape == (batch, OUT_FEATURES)
    assert jnp.allclose(out, ref, atol=5e-3, rtol=5e-3), (
        f"max abs err {jnp.max(jnp.abs(out - ref))}")

    print("KERNEL_OK")
</pallas_src>

<mosaic_0001>
module attributes {stable_mosaic.version = 11 : i64} {
  func.func @mlp_kernel(%arg0: i32, %arg1: memref<16x1500xf32, #tpu.memory_space<vmem>>, %arg2: memref<1500x512xbf16, #tpu.memory_space<vmem>>, %arg3: memref<1x512xf32, #tpu.memory_space<vmem>>, %arg4: memref<512x128xbf16, #tpu.memory_space<vmem>>, %arg5: memref<1x128xf32, #tpu.memory_space<vmem>>, %arg6: memref<16x128xf32, #tpu.memory_space<vmem>>) attributes {dimension_semantics = [#tpu.dimension_semantics<parallel>], iteration_bounds = array<i64: 1>, scalar_prefetch = 0 : i64, scratch_operands = 0 : i64, tpu.core_type = #tpu.core_type<tc>, window_params = [{transform_indices = @transform_0, window_bounds = array<i64: 16, 1500>}, {pipeline_mode = #tpu.pipeline_mode<synchronous>, transform_indices = @transform_1, window_bounds = array<i64: 1500, 512>}, {pipeline_mode = #tpu.pipeline_mode<synchronous>, transform_indices = @transform_2, window_bounds = array<i64: 1, 512>}, {pipeline_mode = #tpu.pipeline_mode<synchronous>, transform_indices = @transform_3, window_bounds = array<i64: 512, 128>}, {pipeline_mode = #tpu.pipeline_mode<synchronous>, transform_indices = @transform_4, window_bounds = array<i64: 1, 128>}, {transform_indices = @transform_5, window_bounds = array<i64: 16, 128>}]} {
    %c0 = arith.constant 0 : index
    %c0_0 = arith.constant 0 : index
    %0 = vector.load %arg1[%c0, %c0_0] : memref<16x1500xf32, #tpu.memory_space<vmem>>, vector<16x1500xf32>
    %1 = arith.truncf %0 : vector<16x1500xf32> to vector<16x1500xbf16>
    %c0_1 = arith.constant 0 : index
    %c0_2 = arith.constant 0 : index
    %2 = vector.load %arg2[%c0_1, %c0_2] : memref<1500x512xbf16, #tpu.memory_space<vmem>>, vector<1500x512xbf16>
    %cst = arith.constant dense<0.000000e+00> : vector<16x512xf32>
    %3 = tpu.matmul %1, %2, %cst {dimension_numbers = #tpu.dot_dimension_numbers<[1], [0], [0], [1], [0, 0, 1, 1], [], []>} : vector<16x1500xbf16>, vector<1500x512xbf16>, vector<16x512xf32> -> vector<16x512xf32>
    %c0_3 = arith.constant 0 : index
    %c0_4 = arith.constant 0 : index
    %4 = vector.load %arg3[%c0_3, %c0_4] : memref<1x512xf32, #tpu.memory_space<vmem>>, vector<1x512xf32>
    %5 = vector.broadcast %4 : vector<1x512xf32> to vector<16x512xf32>
    %6 = arith.addf %3, %5 : vector<16x512xf32>
    %cst_5 = arith.constant 0.000000e+00 : f32
    %7 = vector.broadcast %cst_5 : f32 to vector<16x512xf32>
    %8 = arith.cmpf ogt, %6, %7 : vector<16x512xf32>
    %cst_6 = arith.constant 0.000000e+00 : f32
    %9 = vector.broadcast %cst_6 : f32 to vector<16x512xf32>
    %10 = arith.minimumf %6, %9 : vector<16x512xf32>
    %11 = math.exp %10 : vector<16x512xf32>
    %cst_7 = arith.constant 1.000000e+00 : f32
    %12 = vector.broadcast %cst_7 : f32 to vector<16x512xf32>
    %13 = arith.subf %11, %12 : vector<16x512xf32>
    %cst_8 = arith.constant 1.67326319 : f32
    %14 = vector.broadcast %cst_8 : f32 to vector<16x512xf32>
    %15 = arith.mulf %14, %13 : vector<16x512xf32>
    %16 = arith.select %8, %6, %15 : vector<16x512xi1>, vector<16x512xf32>
    %cst_9 = arith.constant 1.05070102 : f32
    %17 = vector.broadcast %cst_9 : f32 to vector<16x512xf32>
    %18 = arith.mulf %17, %16 : vector<16x512xf32>
    %19 = arith.truncf %18 : vector<16x512xf32> to vector<16x512xbf16>
    %c0_10 = arith.constant 0 : index
    %c0_11 = arith.constant 0 : index
    %20 = vector.load %arg4[%c0_10, %c0_11] : memref<512x128xbf16, #tpu.memory_space<vmem>>, vector<512x128xbf16>
    %cst_12 = arith.constant dense<0.000000e+00> : vector<16x128xf32>
    %21 = tpu.matmul %19, %20, %cst_12 {dimension_numbers = #tpu.dot_dimension_numbers<[1], [0], [0], [1], [0, 0, 1, 1], [], []>} : vector<16x512xbf16>, vector<512x128xbf16>, vector<16x128xf32> -> vector<16x128xf32>
    %c0_13 = arith.constant 0 : index
    %c0_14 = arith.constant 0 : index
    %22 = vector.load %arg5[%c0_13, %c0_14] : memref<1x128xf32, #tpu.memory_space<vmem>>, vector<1x128xf32>
    %23 = vector.broadcast %22 : vector<1x128xf32> to vector<16x128xf32>
    %24 = arith.addf %21, %23 : vector<16x128xf32>
    %c0_15 = arith.constant 0 : index
    %c0_16 = arith.constant 0 : index
    %25 = vector.load %arg6[%c0_15, %c0_16] : memref<16x128xf32, #tpu.memory_space<vmem>>, vector<16x128xf32>
    tpu.vector_store %arg6[%c0_15, %c0_16], %24 {strides = array<i32>} : memref<16x128xf32, #tpu.memory_space<vmem>>, vector<16x128xf32>,
    return
  }
  func.func @transform_0(%arg0: i32) -> (i32, i32) {
    %c0_i32 = arith.constant 0 : i32
    %c0_i32_0 = arith.constant 0 : i32
    return %arg0, %c0_i32 : i32, i32
  }
  func.func @transform_1(%arg0: i32) -> (i32, i32) {
    %c0_i32 = arith.constant 0 : i32
    %c0_i32_0 = arith.constant 0 : i32
    %c0_i32_1 = arith.constant 0 : i32
    return %c0_i32, %c0_i32_0 : i32, i32
  }
  func.func @transform_2(%arg0: i32) -> (i32, i32) {
    %c0_i32 = arith.constant 0 : i32
    %c0_i32_0 = arith.constant 0 : i32
    %c0_i32_1 = arith.constant 0 : i32
    return %c0_i32, %c0_i32_0 : i32, i32
  }
  func.func @transform_3(%arg0: i32) -> (i32, i32) {
    %c0_i32 = arith.constant 0 : i32
    %c0_i32_0 = arith.constant 0 : i32
    %c0_i32_1 = arith.constant 0 : i32
    return %c0_i32, %c0_i32_0 : i32, i32
  }
  func.func @transform_4(%arg0: i32) -> (i32, i32) {
    %c0_i32 = arith.constant 0 : i32
    %c0_i32_0 = arith.constant 0 : i32
    %c0_i32_1 = arith.constant 0 : i32
    return %c0_i32, %c0_i32_0 : i32, i32
  }
  func.func @transform_5(%arg0: i32) -> (i32, i32) {
    %c0_i32 = arith.constant 0 : i32
    %c0_i32_0 = arith.constant 0 : i32
    return %arg0, %c0_i32 : i32, i32
  }
}

</mosaic_0001>

<bundles_post_ra>
// kernel: tpu_custom_call.1
= control target key start
LH: loop header
LB: loop body
LE: loop exit
PB: predicated region body
PF: predicated region fallthrough
CT: control target
= control target key end

     0   :  { %10 = vsyncpa [#allocation3], 0  ;;  %s6002_s0 = inlined_call_operand.hbm [shape: f32[16,1500], index: 0, kind: input, shape index: {}]   ;;  %s6003_s1 = inlined_call_operand.hbm [shape: bf16[1500,512], index: 1, kind: input, shape index: {}]   ;;  %s6004_s2 = inlined_call_operand.hbm [shape: f32[1,512], index: 2, kind: input, shape index: {}]   ;;  %s6005_s3 = inlined_call_operand.hbm [shape: bf16[512,128], index: 3, kind: input, shape index: {}]   ;;  %s6006_s4 = inlined_call_operand.hbm [shape: f32[1,128], index: 4, kind: input, shape index: {}]   ;;  %s6007_s5 = inlined_call_operand.hbm [shape: f32[16,128], index: 5, kind: output, shape index: {}]  }
   0x1   :  { %11 = vsyncpa [#allocation6], 0 }
   0x2   :  { %12 = vsyncpa [#allocation9], 0  ;;  %s31_s20 = sshll.u32 %s6003_s1, 4  ;;  %s32_s20 = int_to_ptr.hbm [resolvable:$true] %s31_s20 }
   0x3   :  { %13 = vsyncpa [#allocation4], 0  ;;  %s5726_s21 = smov [#allocation5]   ;;  %s55_s25 = sshll.u32 %s6005_s3, 4  ;;  %s56_s25 = int_to_ptr.hbm [resolvable:$true] %s55_s25 }
   0x4   :  { %s33_s22 = sshll.u32 %s5726_s21, 4  ;;  %s5727_s26 = smov 256   ;;  %s34_s22 = int_to_ptr.vmem [resolvable:$true] %s33_s22 }
   0x5   :  { %s5728_s27 = smov 16   ;;  %s5729_s28 = smov [#allocation8]  }
   0x6   :  { %39 = dma.hbm_to_vmem [thread:$0]  %s32_s20, 48128, %s34_s22, [#allocation6], %s5727_s26, %s5727_s26, %s5728_s27  }
   0x7   :  { %s57_s29 = sshll.u32 %s5729_s28, 4  ;;  %s5730_s30 = smov 64   ;;  %s58_s29 = int_to_ptr.vmem [resolvable:$true] %s57_s29 }
   0x8   :  { %s5731_s6 = smov 4   ;;  %s18_s8 = sshll.u32 %s6002_s0, 4  ;;  %s19_s8 = int_to_ptr.hbm [resolvable:$true] %s18_s8 }
   0x9   :  { %63 = dma.hbm_to_vmem [thread:$0]  %s56_s25, 4096, %s58_s29, [#allocation9], %s5730_s30, %s5730_s30, %s5731_s6  }
   0xa   :  { %s5732_s9 = smov [#allocation2]   ;;  %s45_s12 = sshll.u32 %s6004_s2, 4  ;;  %s46_s12 = int_to_ptr.hbm [resolvable:$true] %s45_s12 }
   0xb   :  { %s20_s10 = sshll.u32 %s5732_s9, 4  ;;  %s5733_s13 = smov 1536   ;;  %s21_s10 = int_to_ptr.vmem [resolvable:$true] %s20_s10 }
   0xc   :  { %s5734_s14 = smov 96   ;;  %s5735_s15 = smov [#allocation7]  }
   0xd   :  { %26 = dma.hbm_to_vmem [thread:$0]  %s19_s8, 3072, %s21_s10, [#allocation3], %s5733_s13, %s5733_s13, %s5734_s14  }
   0xe   :  { %s47_s16 = sshll.u32 %s5735_s15, 4  ;;  %s69_s19 = sshll.u32 %s6006_s4, 4  ;;  %s48_s16 = int_to_ptr.vmem [resolvable:$true] %s47_s16  ;;  %s70_s19 = int_to_ptr.hbm [resolvable:$true] %s69_s19 }
   0xf   :  { %50 = dma.hbm_to_vmem [thread:$0]  %s46_s12, 64, %s48_s16, [#allocation6]  }
  0x10   :  { %s5736_s0 = smov [#allocation10]  }
  0x11   :  { %s71_s20 = sshll.u32 %s5736_s0, 4  ;;  %s72_s20 = int_to_ptr.vmem [resolvable:$true] %s71_s20 }
  0x12   :  { %74 = dma.hbm_to_vmem [thread:$0]  %s70_s19, 16, %s72_s20, [#allocation9]  }
  0x13   :  { %5718 = dma.done.wait [#allocation3], 3072  }
  0x14   :  { %5719 = vsyncadd [#allocation3], 4294964224 }
  0x15   :  { %5720 = dma.done.wait [#allocation6], 48192  }
  0x16   :  { %5721 = vsyncadd [#allocation6], 4294919104 }
  0x17   :  { %5722 = dma.done.wait [#allocation9], 4112  }
  0x18   :  { %5723 = vsyncadd [#allocation9], 4294963184  ;;  %v3604_v0 = vld [vmem:[#allocation5 + $0xe0] sm:$0xf]  ;;  %v5164_v1 = vld [vmem:[#allocation5 + $0xec] sm:$0xf0] }
  0x19   :  { %v3732_v2 = vld [vmem:[#allocation5 + $0x1e0] sm:$0xf]  ;;  %v3605_v3 = vor.u32 %v5164_v1, %v3604_v0  ;;  %v5196_v4 = vld [vmem:[#allocation5 + $0x1ec] sm:$0xf0]  ;;  %vm2398_vm0 = vcmask 1045504   ;;  %vm2394_vm1 = vcmask 752640  }
  0x1a   :  { %v3860_v5 = vld [vmem:[#allocation5 + $0x2e0] sm:$0xf]  ;;  %v5228_v6 = vld [vmem:[#allocation5 + $0x2ec] sm:$0xf0]  ;;  %v3733_v7 = vor.u32 %v5196_v4, %v3732_v2  ;;  %s5737_s2 = smov [#allocation11]   ;;  %s3475_s23 = sshll.u32 %s6007_s5, 4  ;;  %s3476_s23 = int_to_ptr.hbm [resolvable:$true] %s3475_s23 }
  0x1b   :  { %v3861_v8 = vor.u32 %v5228_v6, %v3860_v5  ;;  %v3988_v9 = vld [vmem:[#allocation5 + $0x3e0] sm:$0xf]  ;;  %v5260_v10 = vld [vmem:[#allocation5 + $0x3ec] sm:$0xf0]  ;;  %2411 = vmatpush.bf16.msra.mxu0 %v3605_v3  ;;  %s3473_s4 = sshll.u32 %s5737_s2, 4  ;;  %s5738_s24 = smov 128   ;;  %s3474_s4 = int_to_ptr.vmem [resolvable:$true] %s3473_s4 }
  0x1c   :  { %v3588_v11 = vld [vmem:[#allocation5 + $0xc0] sm:$0xf]  ;;  %v3989_v12 = vor.u32 %v5260_v10, %v3988_v9  ;;  %v5160_v13 = vld [vmem:[#allocation5 + $0xcc] sm:$0xf0]  ;;  %2425 = vmatpush.bf16.msra.mxu1 %v3733_v7  ;;  %s5739_s25 = smov 8  }
  0x1d   :  { %v3716_v14 = vld [vmem:[#allocation5 + $0x1c0] sm:$0xf]  ;;  %v5192_v15 = vld [vmem:[#allocation5 + $0x1cc] sm:$0xf0]  ;;  %2439 = vmatpush.bf16.msra.mxu2 %v3861_v8  ;;  %v3589_v16 = vor.u32 %v5160_v13, %v3588_v11 }
  0x1e   :  { %v3717_v17 = vor.u32 %v5192_v15, %v3716_v14  ;;  %v3844_v18 = vld [vmem:[#allocation5 + $0x2c0] sm:$0xf]  ;;  %v5224_v19 = vld [vmem:[#allocation5 + $0x2cc] sm:$0xf0]  ;;  %2453 = vmatpush.bf16.msra.mxu3 %v3989_v12 }
  0x1f   :  { %v3972_v20 = vld [vmem:[#allocation5 + $0x3c0] sm:$0xf]  ;;  %v3845_v21 = vor.u32 %v5224_v19, %v3844_v18  ;;  %v5256_v22 = vld [vmem:[#allocation5 + $0x3cc] sm:$0xf0]  ;;  %2412 = vmatpush.bf16.msra.mxu0 %v3589_v16 }
  0x20   :  { %v3572_v23 = vld [vmem:[#allocation5 + $0xa0] sm:$0xf]  ;;  %v5156_v24 = vld [vmem:[#allocation5 + $0xac] sm:$0xf0]  ;;  %v3973_v25 = vor.u32 %v5256_v22, %v3972_v20  ;;  %2426 = vmatpush.bf16.msra.mxu1 %v3717_v17 }
  0x21   :  { %v3700_v26 = vld [vmem:[#allocation5 + $0x1a0] sm:$0xf]  ;;  %v5188_v27 = vld [vmem:[#allocation5 + $0x1ac] sm:$0xf0]  ;;  %v3573_v29 = vor.u32 %v5156_v24, %v3572_v23  ;;  %2440 = vmatpush.bf16.msra.mxu2 %v3845_v21 }
  0x22   :  { %v3828_v28 = vld [vmem:[#allocation5 + $0x2a0] sm:$0xf]  ;;  %v5220_v30 = vld [vmem:[#allocation5 + $0x2ac] sm:$0xf0]  ;;  %v3701_v33 = vor.u32 %v5188_v27, %v3700_v26  ;;  %2454 = vmatpush.bf16.msra.mxu3 %v3973_v25 }
  0x23   :  { %v3956_v31 = vld [vmem:[#allocation5 + $0x3a0] sm:$0xf]  ;;  %v5252_v32 = vld [vmem:[#allocation5 + $0x3ac] sm:$0xf0]  ;;  %v3829_v34 = vor.u32 %v5220_v30, %v3828_v28  ;;  %2413 = vmatpush.bf16.msra.mxu0 %v3573_v29 }
  0x24   :  { %v3556_v35 = vld [vmem:[#allocation5 + $0x80] sm:$0xf]  ;;  %v5152_v36 = vld [vmem:[#allocation5 + $0x8c] sm:$0xf0]  ;;  %v3957_v38 = vor.u32 %v5252_v32, %v3956_v31  ;;  %2427 = vmatpush.bf16.msra.mxu1 %v3701_v33 }
  0x25   :  { %v3684_v37 = vld [vmem:[#allocation5 + $0x180] sm:$0xf]  ;;  %v5184_v39 = vld [vmem:[#allocation5 + $0x18c] sm:$0xf0]  ;;  %v3557_v44 = vor.u32 %v5152_v36, %v3556_v35  ;;  %2441 = vmatpush.bf16.msra.mxu2 %v3829_v34 }
  0x26   :  { %v3812_v40 = vld [vmem:[#allocation5 + $0x280] sm:$0xf]  ;;  %v5216_v41 = vld [vmem:[#allocation5 + $0x28c] sm:$0xf0]  ;;  %v3685_v45 = vor.u32 %v5184_v39, %v3684_v37  ;;  %2455 = vmatpush.bf16.msra.mxu3 %v3957_v38 }
  0x27   :  { %v3940_v42 = vld [vmem:[#allocation5 + $0x380] sm:$0xf]  ;;  %v5248_v43 = vld [vmem:[#allocation5 + $0x38c] sm:$0xf0]  ;;  %v3813_v46 = vor.u32 %v5216_v41, %v3812_v40  ;;  %2414 = vmatpush.bf16.msra.mxu0 %v3557_v44 }
  0x28   :  { %v3540_v47 = vld [vmem:[#allocation5 + $0x60] sm:$0xf]  ;;  %v5148_v48 = vld [vmem:[#allocation5 + $0x6c] sm:$0xf0]  ;;  %v3941_v50 = vor.u32 %v5248_v43, %v3940_v42  ;;  %2428 = vmatpush.bf16.msra.mxu1 %v3685_v45 }
  0x29   :  { %v3668_v49 = vld [vmem:[#allocation5 + $0x160] sm:$0xf]  ;;  %v5180_v51 = vld [vmem:[#allocation5 + $0x16c] sm:$0xf0]  ;;  %v3541_v56 = vor.u32 %v5148_v48, %v3540_v47  ;;  %2442 = vmatpush.bf16.msra.mxu2 %v3813_v46 }
  0x2a   :  { %v3796_v52 = vld [vmem:[#allocation5 + $0x260] sm:$0xf]  ;;  %v5212_v53 = vld [vmem:[#allocation5 + $0x26c] sm:$0xf0]  ;;  %v3669_v57 = vor.u32 %v5180_v51, %v3668_v49  ;;  %2456 = vmatpush.bf16.msra.mxu3 %v3941_v50 }
  0x2b   :  { %v3924_v54 = vld [vmem:[#allocation5 + $0x360] sm:$0xf]  ;;  %v5244_v55 = vld [vmem:[#allocation5 + $0x36c] sm:$0xf0]  ;;  %v3797_v58 = vor.u32 %v5212_v53, %v3796_v52  ;;  %2415 = vmatpush.bf16.msra.mxu0 %v3541_v56 }
  0x2c   :  { %v3524_v59 = vld [vmem:[#allocation5 + $0x40] sm:$0xf]  ;;  %v5144_v60 = vld [vmem:[#allocation5 + $0x4c] sm:$0xf0]  ;;  %v3925_v62 = vor.u32 %v5244_v55, %v3924_v54  ;;  %2429 = vmatpush.bf16.msra.mxu1 %v3669_v57 }
  0x2d   :  { %v3652_v61 = vld [vmem:[#allocation5 + $0x140] sm:$0xf]  ;;  %v5176_v63 = vld [vmem:[#allocation5 + $0x14c] sm:$0xf0]  ;;  %v3525_v4 = vor.u32 %v5144_v60, %v3524_v59  ;;  %2443 = vmatpush.bf16.msra.mxu2 %v3797_v58 }
  0x2e   :  { %v3780_v0 = vld [vmem:[#allocation5 + $0x240] sm:$0xf]  ;;  %v5208_v1 = vld [vmem:[#allocation5 + $0x24c] sm:$0xf0]  ;;  %v3653_v5 = vor.u32 %v5176_v63, %v3652_v61  ;;  %2457 = vmatpush.bf16.msra.mxu3 %v3925_v62 }
  0x2f   :  { %v3908_v2 = vld [vmem:[#allocation5 + $0x340] sm:$0xf]  ;;  %v5240_v3 = vld [vmem:[#allocation5 + $0x34c] sm:$0xf0]  ;;  %v3781_v6 = vor.u32 %v5208_v1, %v3780_v0  ;;  %2416 = vmatpush.bf16.msra.mxu0 %v3525_v4 }
  0x30   :  { %v3508_v7 = vld [vmem:[#allocation5 + $0x20] sm:$0xf]  ;;  %v5140_v8 = vld [vmem:[#allocation5 + $0x2c] sm:$0xf0]  ;;  %v3909_v10 = vor.u32 %v5240_v3, %v3908_v2  ;;  %2430 = vmatpush.bf16.msra.mxu1 %v3653_v5 }
  0x31   :  { %v3636_v9 = vld [vmem:[#allocation5 + $0x120] sm:$0xf]  ;;  %v5172_v11 = vld [vmem:[#allocation5 + $0x12c] sm:$0xf0]  ;;  %v3509_v16 = vor.u32 %v5140_v8, %v3508_v7  ;;  %2444 = vmatpush.bf16.msra.mxu2 %v3781_v6  ;;  %v97_v6 = vld [vmem:[#allocation2 + $0x8] sm:$0xff] }
  0x32   :  { %v3764_v12 = vld [vmem:[#allocation5 + $0x220] sm:$0xf]  ;;  %v5204_v13 = vld [vmem:[#allocation5 + $0x22c] sm:$0xf0]  ;;  %v3637_v19 = vor.u32 %v5172_v11, %v3636_v9  ;;  %2458 = vmatpush.bf16.msra.mxu3 %v3909_v10  ;;  %v109_v7 = vld [vmem:[#allocation2 + $0x68] sm:$0xff] }
  0x33   :  { %v3892_v14 = vld [vmem:[#allocation5 + $0x320] sm:$0xf]  ;;  %v5236_v15 = vld [vmem:[#allocation5 + $0x32c] sm:$0xf0]  ;;  %v3765_v20 = vor.u32 %v5204_v13, %v3764_v12  ;;  %2417 = vmatpush.bf16.msra.mxu0 %v3509_v16  ;;  %v99_v8 = vld [vmem:[#allocation2 + $0x18] sm:$0xff]  ;;  %v5791_v10 = vpack.c.bf16 %v109_v7, %v97_v6 }
  0x34   :  { %v3492_v17 = vld [vmem:[#allocation5] sm:$0xf]  ;;  %v5136_v18 = vld [vmem:[#allocation5 + $0xc] sm:$0xf0]  ;;  %v3893_v24 = vor.u32 %v5236_v15, %v3892_v14  ;;  %2431 = vmatpush.bf16.msra.mxu1 %v3637_v19  ;;  %v111_v11 = vld [vmem:[#allocation2 + $0x78] sm:$0xff] }
  0x35   :  { %v3620_v21 = vld [vmem:[#allocation5 + $0x100] sm:$0xf]  ;;  %v5168_v22 = vld [vmem:[#allocation5 + $0x10c] sm:$0xf0]  ;;  %v3493_v31 = vor.u32 %v5136_v18, %v3492_v17  ;;  %2445 = vmatpush.bf16.msra.mxu2 %v3765_v20  ;;  %v5793_v17 = vpack.c.bf16 %v111_v11, %v99_v8 }
  0x36   :  { %v3748_v23 = vld [vmem:[#allocation5 + $0x200] sm:$0xf]  ;;  %v5200_v25 = vld [vmem:[#allocation5 + $0x20c] sm:$0xf0]  ;;  %v3621_v35 = vor.u32 %v5168_v22, %v3620_v21  ;;  %2459 = vmatpush.bf16.msra.mxu3 %v3893_v24 }
  0x37   :  { %v3876_v26 = vld [vmem:[#allocation5 + $0x300] sm:$0xf]  ;;  %v5232_v27 = vld [vmem:[#allocation5 + $0x30c] sm:$0xf0]  ;;  %v3749_v36 = vor.u32 %v5200_v25, %v3748_v23  ;;  %2418 = vmatpush.bf16.msra.mxu0 %v3493_v31 }
  0x38   :  { %v4116_v28 = vld [vmem:[#allocation5 + $0x4e0] sm:$0xf]  ;;  %v5292_v29 = vld [vmem:[#allocation5 + $0x4ec] sm:$0xf0]  ;;  %v3877_v39 = vor.u32 %v5232_v27, %v3876_v26  ;;  %2432 = vmatpush.bf16.msra.mxu1 %v3621_v35 }
  0x39   :  { %v4244_v30 = vld [vmem:[#allocation5 + $0x5e0] sm:$0xf]  ;;  %v5324_v32 = vld [vmem:[#allocation5 + $0x5ec] sm:$0xf0]  ;;  %v4117_v40 = vor.u32 %v5292_v29, %v4116_v28  ;;  %2446 = vmatpush.bf16.msra.mxu2 %v3749_v36 }
  0x3a   :  { %v4372_v33 = vld [vmem:[#allocation5 + $0x6e0] sm:$0xf]  ;;  %v5356_v34 = vld [vmem:[#allocation5 + $0x6ec] sm:$0xf0]  ;;  %v4245_v43 = vor.u32 %v5324_v32, %v4244_v30  ;;  %2460 = vmatpush.bf16.msra.mxu3 %v3877_v39 }
  0x3b   :  { %v4500_v37 = vld [vmem:[#allocation5 + $0x7e0] sm:$0xf]  ;;  %v5388_v38 = vld [vmem:[#allocation5 + $0x7ec] sm:$0xf0]  ;;  %v4373_v44 = vor.u32 %v5356_v34, %v4372_v33  ;;  %2467 = vmatpush.bf16.msrb.mxu0 %v4117_v40  ;;  %2433 = vmatmul.bf16.vlgmr.msra.gmra.mxu1 %v5791_v10 }
  0x3c   :  { %v4100_v41 = vld [vmem:[#allocation5 + $0x4c0] sm:$0xf]  ;;  %v5288_v42 = vld [vmem:[#allocation5 + $0x4cc] sm:$0xf0]  ;;  %v4501_v48 = vor.u32 %v5388_v38, %v4500_v37  ;;  %2481 = vmatpush.bf16.msrb.mxu1 %v4245_v43 }
  0x3d   :  { %v4228_v45 = vld [vmem:[#allocation5 + $0x5c0] sm:$0xf]  ;;  %v5320_v46 = vld [vmem:[#allocation5 + $0x5cc] sm:$0xf0]  ;;  %v4101_v55 = vor.u32 %v5288_v42, %v4100_v41  ;;  %2495 = vmatpush.bf16.msrb.mxu2 %v4373_v44  ;;  %2461 = vmatmul.bf16.vlgmr.msra.gmra.mxu3 %v5793_v17 }
  0x3e   :  { %v4356_v47 = vld [vmem:[#allocation5 + $0x6c0] sm:$0xf]  ;;  %v5352_v49 = vld [vmem:[#allocation5 + $0x6cc] sm:$0xf0]  ;;  %v4229_v60 = vor.u32 %v5320_v46, %v4228_v45  ;;  %2509 = vmatpush.bf16.msrb.mxu3 %v4501_v48 }
  0x3f   :  { %v4484_v50 = vld [vmem:[#allocation5 + $0x7c0] sm:$0xf]  ;;  %v5384_v51 = vld [vmem:[#allocation5 + $0x7cc] sm:$0xf0]  ;;  %v4357_v61 = vor.u32 %v5352_v49, %v4356_v47  ;;  %2468 = vmatpush.bf16.msrb.mxu0 %v4101_v55 }
  0x40   :  { %v96_v52 = vld [vmem:[#allocation2] sm:$0xff]  ;;  %v98_v54 = vld [vmem:[#allocation2 + $0x10] sm:$0xff]  ;;  %v4485_v2 = vor.u32 %v5384_v51, %v4484_v50  ;;  %2482 = vmatpush.bf16.msrb.mxu1 %v4229_v60 }
  0x41   :  { %v108_v53 = vld [vmem:[#allocation2 + $0x60] sm:$0xff]  ;;  %v5284_v57 = vld [vmem:[#allocation5 + $0x4ac] sm:$0xf0]  ;;  %2496 = vmatpush.bf16.msrb.mxu2 %v4357_v61 }
  0x42   :  { %v4084_v56 = vld [vmem:[#allocation5 + $0x4a0] sm:$0xf]  ;;  %v5785_v58 = vpack.c.bf16 %v108_v53, %v96_v52  ;;  %v110_v59 = vld [vmem:[#allocation2 + $0x70] sm:$0xff]  ;;  %2510 = vmatpush.bf16.msrb.mxu3 %v4485_v2 }
  0x43   :  { %v4212_v62 = vld [vmem:[#allocation5 + $0x5a0] sm:$0xf]  ;;  %v5316_v63 = vld [vmem:[#allocation5 + $0x5ac] sm:$0xf0]  ;;  %v5787_v1 = vpack.c.bf16 %v110_v59, %v98_v54  ;;  %v4085_v9 = vor.u32 %v5284_v57, %v4084_v56 }
  0x44   :  { %v4340_v0 = vld [vmem:[#allocation5 + $0x6a0] sm:$0xf]  ;;  %v5348_v3 = vld [vmem:[#allocation5 + $0x6ac] sm:$0xf0]  ;;  %2419 = vmatmul.bf16.vlgmr.msra.gmra.mxu0 %v5785_v58  ;;  %v4213_v12 = vor.u32 %v5316_v63, %v4212_v62 }
  0x45   :  { %v4468_v4 = vld [vmem:[#allocation5 + $0x7a0] sm:$0xf]  ;;  %v5380_v5 = vld [vmem:[#allocation5 + $0x7ac] sm:$0xf0]  ;;  %2447 = vmatmul.bf16.vlgmr.msra.gmra.mxu2 %v5787_v1  ;;  %v4341_v13 = vor.u32 %v5348_v3, %v4340_v0  ;;  %2469 = vmatpush.bf16.msrb.mxu0 %v4085_v9 }
  0x46   :  { %v4068_v14 = vld [vmem:[#allocation5 + $0x480] sm:$0xf]  ;;  %v5280_v15 = vld [vmem:[#allocation5 + $0x48c] sm:$0xf0]  ;;  %v4469_v18 = vor.u32 %v5380_v5, %v4468_v4  ;;  %2483 = vmatpush.bf16.msrb.mxu1 %v4213_v12 }
  0x47   :  { %v4196_v16 = vld [vmem:[#allocation5 + $0x580] sm:$0xf]  ;;  %v5312_v19 = vld [vmem:[#allocation5 + $0x58c] sm:$0xf0]  ;;  %v4069_v24 = vor.u32 %v5280_v15, %v4068_v14  ;;  %2497 = vmatpush.bf16.msrb.mxu2 %v4341_v13 }
  0x48   :  { %v4324_v20 = vld [vmem:[#allocation5 + $0x680] sm:$0xf]  ;;  %v5344_v21 = vld [vmem:[#allocation5 + $0x68c] sm:$0xf0]  ;;  %v4197_v25 = vor.u32 %v5312_v19, %v4196_v16  ;;  %2511 = vmatpush.bf16.msrb.mxu3 %v4469_v18 }
  0x49   :  { %v4452_v22 = vld [vmem:[#allocation5 + $0x780] sm:$0xf]  ;;  %v5376_v23 = vld [vmem:[#allocation5 + $0x78c] sm:$0xf0]  ;;  %v4325_v26 = vor.u32 %v5344_v21, %v4324_v20  ;;  %2470 = vmatpush.bf16.msrb.mxu0 %v4069_v24 }
  0x4a   :  { %v4052_v27 = vld [vmem:[#allocation5 + $0x460] sm:$0xf]  ;;  %v5276_v28 = vld [vmem:[#allocation5 + $0x46c] sm:$0xf0]  ;;  %v4453_v30 = vor.u32 %v5376_v23, %v4452_v22  ;;  %2484 = vmatpush.bf16.msrb.mxu1 %v4197_v25 }
  0x4b   :  { %v4180_v29 = vld [vmem:[#allocation5 + $0x560] sm:$0xf]  ;;  %v5308_v31 = vld [vmem:[#allocation5 + $0x56c] sm:$0xf0]  ;;  %v4053_v36 = vor.u32 %v5276_v28, %v4052_v27  ;;  %2498 = vmatpush.bf16.msrb.mxu2 %v4325_v26  ;;  %v101_v28 = vld [vmem:[#allocation2 + $0x28] sm:$0xff] }
  0x4c   :  { %v4308_v32 = vld [vmem:[#allocation5 + $0x660] sm:$0xf]  ;;  %v5340_v33 = vld [vmem:[#allocation5 + $0x66c] sm:$0xf0]  ;;  %v4181_v37 = vor.u32 %v5308_v31, %v4180_v29  ;;  %2512 = vmatpush.bf16.msrb.mxu3 %v4453_v30  ;;  %v113_v31 = vld [vmem:[#allocation2 + $0x88] sm:$0xff] }
  0x4d   :  { %v4436_v34 = vld [vmem:[#allocation5 + $0x760] sm:$0xf]  ;;  %v5372_v35 = vld [vmem:[#allocation5 + $0x76c] sm:$0xf0]  ;;  %v4309_v38 = vor.u32 %v5340_v33, %v4308_v32  ;;  %2471 = vmatpush.bf16.msrb.mxu0 %v4053_v36  ;;  %v103_v32 = vld [vmem:[#allocation2 + $0x38] sm:$0xff] }
  0x4e   :  { %v4036_v39 = vld [vmem:[#allocation5 + $0x440] sm:$0xf]  ;;  %v5272_v40 = vld [vmem:[#allocation5 + $0x44c] sm:$0xf0]  ;;  %v4437_v42 = vor.u32 %v5372_v35, %v4436_v34  ;;  %2485 = vmatpush.bf16.msrb.mxu1 %v4181_v37  ;;  %v115_v33 = vld [vmem:[#allocation2 + $0x98] sm:$0xff] }
  0x4f   :  { %v4164_v41 = vld [vmem:[#allocation5 + $0x540] sm:$0xf]  ;;  %v5304_v43 = vld [vmem:[#allocation5 + $0x54c] sm:$0xf0]  ;;  %v4037_v48 = vor.u32 %v5272_v40, %v4036_v39  ;;  %2499 = vmatpush.bf16.msrb.mxu2 %v4309_v38 }
  0x50   :  { %v4292_v44 = vld [vmem:[#allocation5 + $0x640] sm:$0xf]  ;;  %v5336_v45 = vld [vmem:[#allocation5 + $0x64c] sm:$0xf0]  ;;  %v4165_v50 = vor.u32 %v5304_v43, %v4164_v41  ;;  %2513 = vmatpush.bf16.msrb.mxu3 %v4437_v42 }
  0x51   :  { %v4420_v46 = vld [vmem:[#allocation5 + $0x740] sm:$0xf]  ;;  %v5368_v47 = vld [vmem:[#allocation5 + $0x74c] sm:$0xf0]  ;;  %v4293_v51 = vor.u32 %v5336_v45, %v4292_v44  ;;  %2472 = vmatpush.bf16.msrb.mxu0 %v4037_v48  ;;  %v5802_v45 = vpack.c.bf16 %v113_v31, %v101_v28  ;;  %v5804_v48 = vpack.c.bf16 %v115_v33, %v103_v32 }
  0x52   :  { %v4020_v49 = vld [vmem:[#allocation5 + $0x420] sm:$0xf]  ;;  %v5268_v52 = vld [vmem:[#allocation5 + $0x42c] sm:$0xf0]  ;;  %v4421_v55 = vor.u32 %v5368_v47, %v4420_v46  ;;  %2486 = vmatpush.bf16.msrb.mxu1 %v4165_v50 }
  0x53   :  { %v4148_v53 = vld [vmem:[#allocation5 + $0x520] sm:$0xf]  ;;  %v5300_v54 = vld [vmem:[#allocation5 + $0x52c] sm:$0xf0]  ;;  %v4021_v63 = vor.u32 %v5268_v52, %v4020_v49  ;;  %2500 = vmatpush.bf16.msrb.mxu2 %v4293_v51 }
  0x54   :  { %v4276_v56 = vld [vmem:[#allocation5 + $0x620] sm:$0xf]  ;;  %v5332_v57 = vld [vmem:[#allocation5 + $0x62c] sm:$0xf0]  ;;  %v4149_v5 = vor.u32 %v5300_v54, %v4148_v53  ;;  %2514 = vmatpush.bf16.msrb.mxu3 %v4421_v55 }
  0x55   :  { %v4404_v59 = vld [vmem:[#allocation5 + $0x720] sm:$0xf]  ;;  %v5364_v60 = vld [vmem:[#allocation5 + $0x72c] sm:$0xf0]  ;;  %v4277_v6 = vor.u32 %v5332_v57, %v4276_v56  ;;  %2473 = vmatpush.bf16.msrb.mxu0 %v4021_v63 }
  0x56   :  { %v4004_v61 = vld [vmem:[#allocation5 + $0x400] sm:$0xf]  ;;  %v5264_v62 = vld [vmem:[#allocation5 + $0x40c] sm:$0xf0]  ;;  %v4405_v11 = vor.u32 %v5364_v60, %v4404_v59  ;;  %2487 = vmatpush.bf16.msrb.mxu1 %v4149_v5 }
  0x57   :  { %v4132_v0 = vld [vmem:[#allocation5 + $0x500] sm:$0xf]  ;;  %v5296_v2 = vld [vmem:[#allocation5 + $0x50c] sm:$0xf0]  ;;  %v4005_v19 = vor.u32 %v5264_v62, %v4004_v61  ;;  %2501 = vmatpush.bf16.msrb.mxu2 %v4277_v6 }
  0x58   :  { %v4260_v3 = vld [vmem:[#allocation5 + $0x600] sm:$0xf]  ;;  %v5328_v4 = vld [vmem:[#allocation5 + $0x60c] sm:$0xf0]  ;;  %v4133_v23 = vor.u32 %v5296_v2, %v4132_v0  ;;  %2515 = vmatpush.bf16.msrb.mxu3 %v4405_v11 }
  0x59   :  { %v4388_v7 = vld [vmem:[#allocation5 + $0x700] sm:$0xf]  ;;  %v5360_v8 = vld [vmem:[#allocation5 + $0x70c] sm:$0xf0]  ;;  %v4261_v24 = vor.u32 %v5328_v4, %v4260_v3  ;;  %2474 = vmatpush.bf16.msrb.mxu0 %v4005_v19 }
  0x5a   :  { %v4628_v9 = vld [vmem:[#allocation5 + $0x8e0] sm:$0xf]  ;;  %v5420_v12 = vld [vmem:[#allocation5 + $0x8ec] sm:$0xf0]  ;;  %v4389_v29 = vor.u32 %v5360_v8, %v4388_v7  ;;  %2488 = vmatpush.bf16.msrb.mxu1 %v4133_v23 }
  0x5b   :  { %v4980_v13 = vld [vmem:[#allocation5 + $0xba0] sm:$0xf]  ;;  %v5508_v14 = vld [vmem:[#allocation5 + $0xbac] sm:$0x30]  ;;  %v4629_v30 = vor.u32 %v5420_v12, %v4628_v9  ;;  %2502 = vmatpush.bf16.msrb.mxu2 %v4261_v24 }
  0x5c   :  { %v4756_v15 = vld [vmem:[#allocation5 + $0x9e0] sm:$0xf]  ;;  %v5452_v16 = vld [vmem:[#allocation5 + $0x9ec] sm:$0xf0]  ;;  %v4981_v25 = vor.u32 %v5508_v14, %v4980_v13  ;;  %2516 = vmatpush.bf16.msrb.mxu3 %v4389_v29 }
  0x5d   :  { %v4884_v18 = vld [vmem:[#allocation5 + $0xae0] sm:$0xf]  ;;  %v5484_v20 = vld [vmem:[#allocation5 + $0xaec] sm:$0xf0]  ;;  %v4757_v34 = vor.u32 %v5452_v16, %v4756_v15  ;;  %2523 = vmatpush.bf16.msra.mxu0 %v4629_v30  ;;  %2489 = vmatmul.bf16.vlgmr.msrb.gmra.mxu1 %v5802_v45 }
  0x5e   :  { %v100_v21 = vld [vmem:[#allocation2 + $0x20] sm:$0xff]  ;;  %v102_v26 = vld [vmem:[#allocation2 + $0x30] sm:$0xff]  ;;  %v4885_v35 = vor.u32 %v5484_v20, %v4884_v18  ;;  %v2400_v43 = vsel %vm2398_vm0, %v4981_v25, 0 }
  0x5f   :  { %v112_v22 = vld [vmem:[#allocation2 + $0x80] sm:$0xff]  ;;  %v114_v27 = vld [vmem:[#allocation2 + $0x90] sm:$0xff]  ;;  %2537 = vmatpush.bf16.msra.mxu1 %v4757_v34  ;;  %2517 = vmatmul.bf16.vlgmr.msrb.gmra.mxu3 %v5804_v48 }
  0x60   :  { %v4612_v36 = vld [vmem:[#allocation5 + $0x8c0] sm:$0xf]  ;;  %v5416_v37 = vld [vmem:[#allocation5 + $0x8cc] sm:$0xf0]  ;;  %v5797_v39 = vpack.c.bf16 %v112_v22, %v100_v21  ;;  %v5800_v44 = vpack.c.bf16 %v114_v27, %v102_v26  ;;  %2551 = vmatpush.bf16.msra.mxu2 %v4885_v35  ;;  %2567 = vmatpush.bf16.msra.mxu3 %v2400_v43 }
  0x61   :  { %v4740_v38 = vld [vmem:[#allocation5 + $0x9c0] sm:$0xf]  ;;  %v5448_v40 = vld [vmem:[#allocation5 + $0x9cc] sm:$0xf0]  ;;  %v4613_v49 = vor.u32 %v5416_v37, %v4612_v36 }
  0x62   :  { %v4868_v41 = vld [vmem:[#allocation5 + $0xac0] sm:$0xf]  ;;  %v5480_v42 = vld [vmem:[#allocation5 + $0xacc] sm:$0xf0]  ;;  %v4741_v50 = vor.u32 %v5448_v40, %v4740_v38  ;;  %2475 = vmatmul.bf16.vlgmr.msrb.gmra.mxu0 %v5797_v39  ;;  %2503 = vmatmul.bf16.vlgmr.msrb.gmra.mxu2 %v5800_v44  ;;  %v5162_v38 = vld [vmem:[#allocation5 + $0xe4] sm:$0xf] }
  0x63   :  { %v4964_v46 = vld [vmem:[#allocation5 + $0xb80] sm:$0xf]  ;;  %v5504_v47 = vld [vmem:[#allocation5 + $0xb8c] sm:$0xf0]  ;;  %v4869_v51 = vor.u32 %v5480_v42, %v4868_v41  ;;  %2524 = vmatpush.bf16.msra.mxu0 %v4613_v49  ;;  %v3606_v40 = vld [vmem:[#allocation5 + $0xf0] sm:$0xf0] }
  0x64   :  { %v4596_v52 = vld [vmem:[#allocation5 + $0x8a0] sm:$0xf]  ;;  %v5412_v53 = vld [vmem:[#allocation5 + $0x8ac] sm:$0xf0]  ;;  %v4965_v55 = vor.u32 %v5504_v47, %v4964_v46  ;;  %2538 = vmatpush.bf16.msra.mxu1 %v4741_v50 }
  0x65   :  { %v4724_v54 = vld [vmem:[#allocation5 + $0x9a0] sm:$0xf]  ;;  %v5444_v56 = vld [vmem:[#allocation5 + $0x9ac] sm:$0xf0]  ;;  %v4597_v62 = vor.u32 %v5412_v53, %v4596_v52  ;;  %2552 = vmatpush.bf16.msra.mxu2 %v4869_v51  ;;  %v5158_v53 = vld [vmem:[#allocation5 + $0xc4] sm:$0xf] }
  0x66   :  { %v4852_v57 = vld [vmem:[#allocation5 + $0xaa0] sm:$0xf]  ;;  %v5476_v59 = vld [vmem:[#allocation5 + $0xaac] sm:$0xf0]  ;;  %v4725_v63 = vor.u32 %v5444_v56, %v4724_v54  ;;  %2568 = vmatpush.bf16.msra.mxu3 %v4965_v55  ;;  %v3609_v54 = vor.u32 %v5162_v38, %v3606_v40  ;;  %v3590_v55 = vld [vmem:[#allocation5 + $0xd0] sm:$0xf0] }
  0x67   :  { %v4948_v60 = vld [vmem:[#allocation5 + $0xb60] sm:$0xf]  ;;  %v5500_v61 = vld [vmem:[#allocation5 + $0xb6c] sm:$0xf0]  ;;  %v4853_v0 = vor.u32 %v5476_v59, %v4852_v57  ;;  %2525 = vmatpush.bf16.msra.mxu0 %v4597_v62  ;;  %v107_v56 = vld [vmem:[#allocation2 + $0x58] sm:$0xff] }
  0x68   :  { %v4580_v2 = vld [vmem:[#allocation5 + $0x880] sm:$0xf]  ;;  %v5408_v3 = vld [vmem:[#allocation5 + $0x88c] sm:$0xf0]  ;;  %v4949_v5 = vor.u32 %v5500_v61, %v4948_v60  ;;  %2539 = vmatpush.bf16.msra.mxu1 %v4725_v63  ;;  %v119_v57 = vld [vmem:[#allocation2 + $0xb8] sm:$0xff] }
  0x69   :  { %v4708_v4 = vld [vmem:[#allocation5 + $0x980] sm:$0xf]  ;;  %v5440_v6 = vld [vmem:[#allocation5 + $0x98c] sm:$0xf0]  ;;  %v4581_v12 = vor.u32 %v5408_v3, %v4580_v2  ;;  %2553 = vmatpush.bf16.msra.mxu2 %v4853_v0  ;;  %v5254_v38 = vld [vmem:[#allocation5 + $0x3c4] sm:$0xf] }
  0x6a   :  { %v4836_v7 = vld [vmem:[#allocation5 + $0xa80] sm:$0xf]  ;;  %v5472_v8 = vld [vmem:[#allocation5 + $0xa8c] sm:$0xf0]  ;;  %v4709_v13 = vor.u32 %v5440_v6, %v4708_v4  ;;  %2569 = vmatpush.bf16.msra.mxu3 %v4949_v5  ;;  %v5154_v5 = vld [vmem:[#allocation5 + $0xa4] sm:$0xf] }
  0x6b   :  { %v4932_v9 = vld [vmem:[#allocation5 + $0xb40] sm:$0xf]  ;;  %v5496_v11 = vld [vmem:[#allocation5 + $0xb4c] sm:$0xf0]  ;;  %v4837_v14 = vor.u32 %v5472_v8, %v4836_v7  ;;  %2526 = vmatpush.bf16.msra.mxu0 %v4581_v12  ;;  %v3574_v6 = vld [vmem:[#allocation5 + $0xb0] sm:$0xf0]  ;;  %v3593_v12 = vor.u32 %v5158_v53, %v3590_v55 }
  0x6c   :  { %v4564_v15 = vld [vmem:[#allocation5 + $0x860] sm:$0xf]  ;;  %v5404_v16 = vld [vmem:[#allocation5 + $0x86c] sm:$0xf0]  ;;  %v4933_v19 = vor.u32 %v5496_v11, %v4932_v9  ;;  %2540 = vmatpush.bf16.msra.mxu1 %v4709_v13  ;;  %v5194_v7 = vld [vmem:[#allocation5 + $0x1e4] sm:$0xf]  ;;  %v5810_v11 = vpack.c.bf16 %v119_v57, %v107_v56 }
  0x6d   :  { %v4692_v18 = vld [vmem:[#allocation5 + $0x960] sm:$0xf]  ;;  %v5436_v20 = vld [vmem:[#allocation5 + $0x96c] sm:$0xf0]  ;;  %v4565_v25 = vor.u32 %v5404_v16, %v4564_v15  ;;  %2554 = vmatpush.bf16.msra.mxu2 %v4837_v14  ;;  %v3734_v8 = vld [vmem:[#allocation5 + $0x1f0] sm:$0xf0] }
  0x6e   :  { %v4820_v21 = vld [vmem:[#allocation5 + $0xa60] sm:$0xf]  ;;  %v5468_v22 = vld [vmem:[#allocation5 + $0xa6c] sm:$0xf0]  ;;  %v4693_v26 = vor.u32 %v5436_v20, %v4692_v18  ;;  %2570 = vmatpush.bf16.msra.mxu3 %v4933_v19  ;;  %v5226_v9 = vld [vmem:[#allocation5 + $0x2e4] sm:$0xf] }
  0x6f   :  { %v4916_v23 = vld [vmem:[#allocation5 + $0xb20] sm:$0xf]  ;;  %v5492_v24 = vld [vmem:[#allocation5 + $0xb2c] sm:$0xf0]  ;;  %v4821_v27 = vor.u32 %v5468_v22, %v4820_v21  ;;  %2527 = vmatpush.bf16.msra.mxu0 %v4565_v25  ;;  %v3862_v13 = vld [vmem:[#allocation5 + $0x2f0] sm:$0xf0]  ;;  %v3737_v25 = vor.u32 %v5194_v7, %v3734_v8 }
  0x70   :  { %v4548_v28 = vld [vmem:[#allocation5 + $0x840] sm:$0xf]  ;;  %v5400_v29 = vld [vmem:[#allocation5 + $0x84c] sm:$0xf0]  ;;  %v4917_v31 = vor.u32 %v5492_v24, %v4916_v23  ;;  %2541 = vmatpush.bf16.msra.mxu1 %v4693_v26  ;;  %v5258_v14 = vld [vmem:[#allocation5 + $0x3e4] sm:$0xf]  ;;  %v3865_v26 = vor.u32 %v5226_v9, %v3862_v13 }
  0x71   :  { %v4676_v30 = vld [vmem:[#allocation5 + $0x940] sm:$0xf]  ;;  %v5432_v32 = vld [vmem:[#allocation5 + $0x94c] sm:$0xf0]  ;;  %v4549_v37 = vor.u32 %v5400_v29, %v4548_v28  ;;  %2555 = vmatpush.bf16.msra.mxu2 %v4821_v27  ;;  %v3990_v16 = vld [vmem:[#allocation5 + $0x3f0] sm:$0xf0] }
  0x72   :  { %v4804_v33 = vld [vmem:[#allocation5 + $0xa40] sm:$0xf]  ;;  %v5464_v34 = vld [vmem:[#allocation5 + $0xa4c] sm:$0xf0]  ;;  %v4677_v42 = vor.u32 %v5432_v32, %v4676_v30  ;;  %2571 = vmatpush.bf16.msra.mxu3 %v4917_v31  ;;  %v105_v24 = vld [vmem:[#allocation2 + $0x48] sm:$0xff]  ;;  %v3577_v30 = vor.u32 %v5154_v5, %v3574_v6  ;;  %v3993_v31 = vor.u32 %v5258_v14, %v3990_v16 }
  0x73   :  { %v4900_v35 = vld [vmem:[#allocation5 + $0xb00] sm:$0xf]  ;;  %v5488_v36 = vld [vmem:[#allocation5 + $0xb0c] sm:$0xf0]  ;;  %v4805_v43 = vor.u32 %v5464_v34, %v4804_v33  ;;  %2528 = vmatpush.bf16.msra.mxu0 %v4549_v37  ;;  %v117_v27 = vld [vmem:[#allocation2 + $0xa8] sm:$0xff] }
  0x74   :  { %v4532_v41 = vld [vmem:[#allocation5 + $0x820] sm:$0xf]  ;;  %v5396_v46 = vld [vmem:[#allocation5 + $0x82c] sm:$0xf0]  ;;  %v4901_v50 = vor.u32 %v5488_v36, %v4900_v35  ;;  %2542 = vmatpush.bf16.msra.mxu1 %v4677_v42  ;;  %v5150_v28 = vld [vmem:[#allocation5 + $0x84] sm:$0xf] }
  0x75   :  { %v4660_v47 = vld [vmem:[#allocation5 + $0x920] sm:$0xf]  ;;  %v5428_v49 = vld [vmem:[#allocation5 + $0x92c] sm:$0xf0]  ;;  %v4533_v59 = vor.u32 %v5396_v46, %v4532_v41  ;;  %2556 = vmatpush.bf16.msra.mxu2 %v4805_v43  ;;  %v5190_v29 = vld [vmem:[#allocation5 + $0x1c4] sm:$0xf]  ;;  %v5818_v41 = vpack.c.bf16 %v117_v27, %v105_v24 }
  0x76   :  { %v4788_v51 = vld [vmem:[#allocation5 + $0xa20] sm:$0xf]  ;;  %v5460_v52 = vld [vmem:[#allocation5 + $0xa2c] sm:$0xf0]  ;;  %v4661_v63 = vor.u32 %v5428_v49, %v4660_v47  ;;  %2572 = vmatpush.bf16.msra.mxu3 %v4901_v50  ;;  %v3718_v32 = vld [vmem:[#allocation5 + $0x1d0] sm:$0xf0] }
  0x77   :  { %v4516_v60 = vld [vmem:[#allocation5 + $0x800] sm:$0xf]  ;;  %v5392_v61 = vld [vmem:[#allocation5 + $0x80c] sm:$0xf0]  ;;  %v4789_v0 = vor.u32 %v5460_v52, %v4788_v51  ;;  %2529 = vmatpush.bf16.msra.mxu0 %v4533_v59  ;;  %v5222_v33 = vld [vmem:[#allocation5 + $0x2c4] sm:$0xf]  ;;  %v3721_v42 = vor.u32 %v5190_v29, %v3718_v32 }
  0x78   :  { %v4644_v62 = vld [vmem:[#allocation5 + $0x900] sm:$0xf]  ;;  %v5424_v2 = vld [vmem:[#allocation5 + $0x90c] sm:$0xf0]  ;;  %v4517_v15 = vor.u32 %v5392_v61, %v4516_v60  ;;  %2543 = vmatpush.bf16.msra.mxu1 %v4661_v63  ;;  %v3846_v34 = vld [vmem:[#allocation5 + $0x2d0] sm:$0xf0] }
  0x79   :  { %v4772_v3 = vld [vmem:[#allocation5 + $0xa00] sm:$0xf]  ;;  %v5456_v4 = vld [vmem:[#allocation5 + $0xa0c] sm:$0xf0]  ;;  %2557 = vmatpush.bf16.msra.mxu2 %v4789_v0  ;;  %v4645_v20 = vor.u32 %v5424_v2, %v4644_v62  ;;  %4994 = vmatmul.msk.bf16.vlgmr.msra.gmra.mxu3 %vm2394_vm1, %v5810_v11  ;;  %v3558_v37 = vld [vmem:[#allocation5 + $0x90] sm:$0xf0]  ;;  %v3849_v43 = vor.u32 %v5222_v33, %v3846_v34 }
  0x7a   :  { %2579 = vmatpush.bf16.msrb.mxu3 %v3609_v54  ;;  %v104_v18 = vld [vmem:[#allocation2 + $0x40] sm:$0xff]  ;;  %v4773_v21 = vor.u32 %v5456_v4, %v4772_v3  ;;  %v106_v22 = vld [vmem:[#allocation2 + $0x50] sm:$0xff]  ;;  %v3561_v49 = vor.u32 %v5150_v28, %v3558_v37 }
  0x7b   :  { %v116_v19 = vld [vmem:[#allocation2 + $0xa0] sm:$0xff]  ;;  %v118_v23 = vld [vmem:[#allocation2 + $0xb0] sm:$0xff]  ;;  %2530 = vmatpush.bf16.msra.mxu0 %v4517_v15 }
  0x7c   :  { %v5814_v35 = vpack.c.bf16 %v116_v19, %v104_v18  ;;  %v5816_v36 = vpack.c.bf16 %v118_v23, %v106_v22  ;;  %v3974_v40 = vld [vmem:[#allocation5 + $0x3d0] sm:$0xf0]  ;;  %2544 = vmatpush.bf16.msra.mxu1 %v4645_v20  ;;  %v5146_v46 = vld [vmem:[#allocation5 + $0x64] sm:$0xf] }
  0x7d   :  { %2558 = vmatpush.bf16.msra.mxu2 %v4773_v21  ;;  %v5186_v47 = vld [vmem:[#allocation5 + $0x1a4] sm:$0xf]  ;;  %v3977_v50 = vor.u32 %v5254_v38, %v3974_v40  ;;  %v3702_v51 = vld [vmem:[#allocation5 + $0x1b0] sm:$0xf0] }
  0x7e   :  { %2580 = vmatpush.bf16.msrb.mxu3 %v3593_v12  ;;  %v5218_v52 = vld [vmem:[#allocation5 + $0x2a4] sm:$0xf]  ;;  %v3830_v53 = vld [vmem:[#allocation5 + $0x2b0] sm:$0xf0]  ;;  %2531 = vmatmul.bf16.vlgmr.msra.gmra.mxu0 %v5814_v35  ;;  %v3705_v57 = vor.u32 %v5186_v47, %v3702_v51 }
  0x7f   :  { %2593 = vmatpush.bf16.msrb.mxu0 %v3737_v25  ;;  %v3542_v54 = vld [vmem:[#allocation5 + $0x70] sm:$0xf0]  ;;  %v5250_v55 = vld [vmem:[#allocation5 + $0x3a4] sm:$0xf]  ;;  %2545 = vmatmul.bf16.vlgmr.msra.gmra.mxu1 %v5818_v41  ;;  %v3833_v59 = vor.u32 %v5218_v52, %v3830_v53 }
  0x80   :  { %2607 = vmatpush.bf16.msrb.mxu1 %v3865_v26  ;;  %2559 = vmatmul.bf16.vlgmr.msra.gmra.mxu2 %v5816_v36  ;;  %v3958_v56 = vld [vmem:[#allocation5 + $0x3b0] sm:$0xf0]  ;;  %v5142_v60 = vld [vmem:[#allocation5 + $0x44] sm:$0xf]  ;;  %v3545_v62 = vor.u32 %v5146_v46, %v3542_v54 }
  0x81   :  { %2621 = vmatpush.bf16.msrb.mxu2 %v3993_v31  ;;  %v5182_v61 = vld [vmem:[#allocation5 + $0x184] sm:$0xf]  ;;  %v3961_v63 = vor.u32 %v5250_v55, %v3958_v56  ;;  %v3686_v0 = vld [vmem:[#allocation5 + $0x190] sm:$0xf0] }
  0x82   :  { %2581 = vmatpush.bf16.msrb.mxu3 %v3577_v30  ;;  %v5214_v2 = vld [vmem:[#allocation5 + $0x284] sm:$0xf]  ;;  %v3814_v3 = vld [vmem:[#allocation5 + $0x290] sm:$0xf0]  ;;  %v3689_v7 = vor.u32 %v5182_v61, %v3686_v0 }
  0x83   :  { %2594 = vmatpush.bf16.msrb.mxu0 %v3721_v42  ;;  %v3526_v4 = vld [vmem:[#allocation5 + $0x50] sm:$0xf0]  ;;  %v5246_v5 = vld [vmem:[#allocation5 + $0x384] sm:$0xf]  ;;  %v3817_v8 = vor.u32 %v5214_v2, %v3814_v3 }
  0x84   :  { %2608 = vmatpush.bf16.msrb.mxu1 %v3849_v43  ;;  %v3942_v6 = vld [vmem:[#allocation5 + $0x390] sm:$0xf0]  ;;  %v5138_v9 = vld [vmem:[#allocation5 + $0x24] sm:$0xf]  ;;  %v3529_v13 = vor.u32 %v5142_v60, %v3526_v4 }
  0x85   :  { %2622 = vmatpush.bf16.msrb.mxu2 %v3977_v50  ;;  %v5178_v12 = vld [vmem:[#allocation5 + $0x164] sm:$0xf]  ;;  %v3945_v14 = vor.u32 %v5246_v5, %v3942_v6  ;;  %v3670_v15 = vld [vmem:[#allocation5 + $0x170] sm:$0xf0] }
  0x86   :  { %2582 = vmatpush.bf16.msrb.mxu3 %v3561_v49  ;;  %v5210_v16 = vld [vmem:[#allocation5 + $0x264] sm:$0xf]  ;;  %v3798_v18 = vld [vmem:[#allocation5 + $0x270] sm:$0xf0]  ;;  %v3673_v22 = vor.u32 %v5178_v12, %v3670_v15 }
  0x87   :  { %2595 = vmatpush.bf16.msrb.mxu0 %v3705_v57  ;;  %v3510_v19 = vld [vmem:[#allocation5 + $0x30] sm:$0xf0]  ;;  %v5242_v20 = vld [vmem:[#allocation5 + $0x364] sm:$0xf]  ;;  %v3801_v23 = vor.u32 %v5210_v16, %v3798_v18 }
  0x88   :  { %2609 = vmatpush.bf16.msrb.mxu1 %v3833_v59  ;;  %v3926_v21 = vld [vmem:[#allocation5 + $0x370] sm:$0xf0]  ;;  %v5134_v24 = vld [vmem:[#allocation5 + $0x4] sm:$0xf]  ;;  %v3513_v26 = vor.u32 %v5138_v9, %v3510_v19 }
  0x89   :  { %2623 = vmatpush.bf16.msrb.mxu2 %v3961_v63  ;;  %v5174_v25 = vld [vmem:[#allocation5 + $0x144] sm:$0xf]  ;;  %v3929_v27 = vor.u32 %v5242_v20, %v3926_v21  ;;  %v3654_v28 = vld [vmem:[#allocation5 + $0x150] sm:$0xf0] }
  0x8a   :  { %2583 = vmatpush.bf16.msrb.mxu3 %v3545_v62  ;;  %v5206_v29 = vld [vmem:[#allocation5 + $0x244] sm:$0xf]  ;;  %v3782_v30 = vld [vmem:[#allocation5 + $0x250] sm:$0xf0]  ;;  %v3657_v38 = vor.u32 %v5174_v25, %v3654_v28 }
  0x8b   :  { %2596 = vmatpush.bf16.msrb.mxu0 %v3689_v7  ;;  %v3494_v31 = vld [vmem:[#allocation5 + $0x10] sm:$0xf0]  ;;  %v5238_v32 = vld [vmem:[#allocation5 + $0x344] sm:$0xf]  ;;  %v3785_v40 = vor.u32 %v5206_v29, %v3782_v30 }
  0x8c   :  { %2610 = vmatpush.bf16.msrb.mxu1 %v3817_v8  ;;  %v3910_v33 = vld [vmem:[#allocation5 + $0x350] sm:$0xf0]  ;;  %v5290_v34 = vld [vmem:[#allocation5 + $0x4e4] sm:$0xf]  ;;  %v3497_v43 = vor.u32 %v5134_v24, %v3494_v31 }
  0x8d   :  { %2624 = vmatpush.bf16.msrb.mxu2 %v3945_v14  ;;  %v4118_v37 = vld [vmem:[#allocation5 + $0x4f0] sm:$0xf0]  ;;  %v5170_v42 = vld [vmem:[#allocation5 + $0x124] sm:$0xf]  ;;  %v3913_v46 = vor.u32 %v5238_v32, %v3910_v33 }
  0x8e   :  { %2584 = vmatpush.bf16.msrb.mxu3 %v3529_v13  ;;  %v3638_v47 = vld [vmem:[#allocation5 + $0x130] sm:$0xf0]  ;;  %v5202_v49 = vld [vmem:[#allocation5 + $0x224] sm:$0xf]  ;;  %v4121_v51 = vor.u32 %v5290_v34, %v4118_v37 }
  0x8f   :  { %2597 = vmatpush.bf16.msrb.mxu0 %v3673_v22  ;;  %v3766_v50 = vld [vmem:[#allocation5 + $0x230] sm:$0xf0]  ;;  %v5234_v52 = vld [vmem:[#allocation5 + $0x324] sm:$0xf]  ;;  %v3641_v56 = vor.u32 %v5170_v42, %v3638_v47 }
  0x90   :  { %2611 = vmatpush.bf16.msrb.mxu1 %v3801_v23  ;;  %v3894_v53 = vld [vmem:[#allocation5 + $0x330] sm:$0xf0]  ;;  %v5286_v54 = vld [vmem:[#allocation5 + $0x4c4] sm:$0xf]  ;;  %v3769_v57 = vor.u32 %v5202_v49, %v3766_v50 }
  0x91   :  { %2625 = vmatpush.bf16.msrb.mxu2 %v3929_v27  ;;  %v4102_v55 = vld [vmem:[#allocation5 + $0x4d0] sm:$0xf0]  ;;  %v5166_v59 = vld [vmem:[#allocation5 + $0x104] sm:$0xf]  ;;  %v3897_v62 = vor.u32 %v5234_v52, %v3894_v53 }
  0x92   :  { %2585 = vmatpush.bf16.msrb.mxu3 %v3513_v26  ;;  %v3622_v60 = vld [vmem:[#allocation5 + $0x110] sm:$0xf0]  ;;  %v5198_v61 = vld [vmem:[#allocation5 + $0x204] sm:$0xf]  ;;  %v4105_v3 = vor.u32 %v5286_v54, %v4102_v55 }
  0x93   :  { %2598 = vmatpush.bf16.msrb.mxu0 %v3657_v38  ;;  %v3750_v63 = vld [vmem:[#allocation5 + $0x210] sm:$0xf0]  ;;  %v5230_v0 = vld [vmem:[#allocation5 + $0x304] sm:$0xf]  ;;  %v3625_v12 = vor.u32 %v5166_v59, %v3622_v60 }
  0x94   :  { %2612 = vmatpush.bf16.msrb.mxu1 %v3785_v40  ;;  %v3878_v2 = vld [vmem:[#allocation5 + $0x310] sm:$0xf0]  ;;  %v5282_v4 = vld [vmem:[#allocation5 + $0x4a4] sm:$0xf]  ;;  %v3753_v13 = vor.u32 %v5198_v61, %v3750_v63 }
  0x95   :  { %2626 = vmatpush.bf16.msrb.mxu2 %v3913_v46  ;;  %v5322_v5 = vld [vmem:[#allocation5 + $0x5e4] sm:$0xf]  ;;  %v4246_v6 = vld [vmem:[#allocation5 + $0x5f0] sm:$0xf0]  ;;  %v3881_v16 = vor.u32 %v5230_v0, %v3878_v2 }
  0x96   :  { %2586 = vmatpush.bf16.msrb.mxu3 %v3497_v43  ;;  %v4086_v7 = vld [vmem:[#allocation5 + $0x4b0] sm:$0xf0]  ;;  %v5354_v8 = vld [vmem:[#allocation5 + $0x6e4] sm:$0xf]  ;;  %v4249_v18 = vor.u32 %v5322_v5, %v4246_v6 }
  0x97   :  { %v4374_v9 = vld [vmem:[#allocation5 + $0x6f0] sm:$0xf0]  ;;  %2599 = vmatpush.bf16.msrb.mxu0 %v3641_v56  ;;  %v5386_v14 = vld [vmem:[#allocation5 + $0x7e4] sm:$0xf]  ;;  %v4089_v19 = vor.u32 %v5282_v4, %v4086_v7 }
  0x98   :  { %2613 = vmatpush.bf16.msrb.mxu1 %v3769_v57  ;;  %v4502_v15 = vld [vmem:[#allocation5 + $0x7f0] sm:$0xf0]  ;;  %v4377_v20 = vor.u32 %v5354_v8, %v4374_v9  ;;  %v5278_v21 = vld [vmem:[#allocation5 + $0x484] sm:$0xf] }
  0x99   :  { %2627 = vmatpush.bf16.msrb.mxu2 %v3897_v62  ;;  %2587 = vmatmul.bf16.vlgmr.msrb.gmra.mxu3 %v5785_v58  ;;  %v5318_v22 = vld [vmem:[#allocation5 + $0x5c4] sm:$0xf]  ;;  %v4230_v23 = vld [vmem:[#allocation5 + $0x5d0] sm:$0xf0]  ;;  %v4505_v24 = vor.u32 %v5386_v14, %v4502_v15 }
  0x9a   :  { %2635 = vmatpush.bf16.msra.mxu3 %v4121_v51  ;;  %v4070_v25 = vld [vmem:[#allocation5 + $0x490] sm:$0xf0]  ;;  %v5350_v26 = vld [vmem:[#allocation5 + $0x6c4] sm:$0xf]  ;;  %v4233_v30 = vor.u32 %v5318_v22, %v4230_v23 }
  0x9b   :  { %v4358_v27 = vld [vmem:[#allocation5 + $0x6d0] sm:$0xf0]  ;;  %2600 = vmatpush.bf16.msrb.mxu0 %v3625_v12  ;;  %v5382_v28 = vld [vmem:[#allocation5 + $0x7c4] sm:$0xf]  ;;  %v4073_v31 = vor.u32 %v5278_v21, %v4070_v25 }
  0x9c   :  { %2614 = vmatpush.bf16.msrb.mxu1 %v3753_v13  ;;  %v4486_v29 = vld [vmem:[#allocation5 + $0x7d0] sm:$0xf0]  ;;  %v4361_v32 = vor.u32 %v5350_v26, %v4358_v27  ;;  %v5274_v33 = vld [vmem:[#allocation5 + $0x464] sm:$0xf] }
  0x9d   :  { %2628 = vmatpush.bf16.msrb.mxu2 %v3881_v16  ;;  %v5314_v34 = vld [vmem:[#allocation5 + $0x5a4] sm:$0xf]  ;;  %v4214_v37 = vld [vmem:[#allocation5 + $0x5b0] sm:$0xf0]  ;;  %v4489_v38 = vor.u32 %v5382_v28, %v4486_v29 }
  0x9e   :  { %2636 = vmatpush.bf16.msra.mxu3 %v4105_v3  ;;  %v4054_v40 = vld [vmem:[#allocation5 + $0x470] sm:$0xf0]  ;;  %v5346_v42 = vld [vmem:[#allocation5 + $0x6a4] sm:$0xf]  ;;  %2601 = vmatmul.bf16.vlgmr.msrb.gmra.mxu0 %v5791_v10  ;;  %v4217_v49 = vor.u32 %v5314_v34, %v4214_v37 }
  0x9f   :  { %2649 = vmatpush.bf16.msra.mxu0 %v4249_v18  ;;  %v4342_v43 = vld [vmem:[#allocation5 + $0x6b0] sm:$0xf0]  ;;  %v5378_v46 = vld [vmem:[#allocation5 + $0x7a4] sm:$0xf]  ;;  %2615 = vmatmul.bf16.vlgmr.msrb.gmra.mxu1 %v5787_v1  ;;  %v4057_v50 = vor.u32 %v5274_v33, %v4054_v40 }
  0xa0   :  { %2663 = vmatpush.bf16.msra.mxu1 %v4377_v20  ;;  %v4470_v47 = vld [vmem:[#allocation5 + $0x7b0] sm:$0xf0]  ;;  %2629 = vmatmul.bf16.vlgmr.msrb.gmra.mxu2 %v5793_v17  ;;  %v4345_v51 = vor.u32 %v5346_v42, %v4342_v43  ;;  %v5270_v52 = vld [vmem:[#allocation5 + $0x444] sm:$0xf] }
  0xa1   :  { %2677 = vmatpush.bf16.msra.mxu2 %v4505_v24  ;;  %v5310_v53 = vld [vmem:[#allocation5 + $0x584] sm:$0xf]  ;;  %v4198_v54 = vld [vmem:[#allocation5 + $0x590] sm:$0xf0]  ;;  %v4473_v55 = vor.u32 %v5378_v46, %v4470_v47 }
  0xa2   :  { %2637 = vmatpush.bf16.msra.mxu3 %v4089_v19  ;;  %v4038_v56 = vld [vmem:[#allocation5 + $0x450] sm:$0xf0]  ;;  %v5342_v57 = vld [vmem:[#allocation5 + $0x684] sm:$0xf]  ;;  %v4201_v62 = vor.u32 %v5310_v53, %v4198_v54 }
  0xa3   :  { %2650 = vmatpush.bf16.msra.mxu0 %v4233_v30  ;;  %v4326_v59 = vld [vmem:[#allocation5 + $0x690] sm:$0xf0]  ;;  %v5374_v60 = vld [vmem:[#allocation5 + $0x784] sm:$0xf]  ;;  %v4041_v63 = vor.u32 %v5270_v52, %v4038_v56 }
  0xa4   :  { %2664 = vmatpush.bf16.msra.mxu1 %v4361_v32  ;;  %v4454_v61 = vld [vmem:[#allocation5 + $0x790] sm:$0xf0]  ;;  %v4329_v0 = vor.u32 %v5342_v57, %v4326_v59  ;;  %v5266_v2 = vld [vmem:[#allocation5 + $0x424] sm:$0xf] }
  0xa5   :  { %2678 = vmatpush.bf16.msra.mxu2 %v4489_v38  ;;  %v5306_v3 = vld [vmem:[#allocation5 + $0x564] sm:$0xf]  ;;  %v4182_v4 = vld [vmem:[#allocation5 + $0x570] sm:$0xf0]  ;;  %v4457_v5 = vor.u32 %v5374_v60, %v4454_v61 }
  0xa6   :  { %2638 = vmatpush.bf16.msra.mxu3 %v4073_v31  ;;  %v4022_v6 = vld [vmem:[#allocation5 + $0x430] sm:$0xf0]  ;;  %v5338_v7 = vld [vmem:[#allocation5 + $0x664] sm:$0xf]  ;;  %v4185_v13 = vor.u32 %v5306_v3, %v4182_v4 }
  0xa7   :  { %2651 = vmatpush.bf16.msra.mxu0 %v4217_v49  ;;  %v4310_v8 = vld [vmem:[#allocation5 + $0x670] sm:$0xf0]  ;;  %v5370_v9 = vld [vmem:[#allocation5 + $0x764] sm:$0xf]  ;;  %v4025_v15 = vor.u32 %v5266_v2, %v4022_v6 }
  0xa8   :  { %2665 = vmatpush.bf16.msra.mxu1 %v4345_v51  ;;  %v4438_v12 = vld [vmem:[#allocation5 + $0x770] sm:$0xf0]  ;;  %v5262_v14 = vld [vmem:[#allocation5 + $0x404] sm:$0xf]  ;;  %v4313_v16 = vor.u32 %v5338_v7, %v4310_v8 }
  0xa9   :  { %2679 = vmatpush.bf16.msra.mxu2 %v4473_v55  ;;  %v4006_v18 = vld [vmem:[#allocation5 + $0x410] sm:$0xf0]  ;;  %v5302_v19 = vld [vmem:[#allocation5 + $0x544] sm:$0xf]  ;;  %v4441_v21 = vor.u32 %v5370_v9, %v4438_v12 }
  0xaa   :  { %2639 = vmatpush.bf16.msra.mxu3 %v4057_v50  ;;  %v4166_v20 = vld [vmem:[#allocation5 + $0x550] sm:$0xf0]  ;;  %v5334_v22 = vld [vmem:[#allocation5 + $0x644] sm:$0xf]  ;;  %v4009_v29 = vor.u32 %v5262_v14, %v4006_v18 }
  0xab   :  { %2652 = vmatpush.bf16.msra.mxu0 %v4201_v62  ;;  %v4294_v23 = vld [vmem:[#allocation5 + $0x650] sm:$0xf0]  ;;  %v5366_v24 = vld [vmem:[#allocation5 + $0x744] sm:$0xf]  ;;  %v4169_v28 = vor.u32 %v5302_v19, %v4166_v20 }
  0xac   :  { %2666 = vmatpush.bf16.msra.mxu1 %v4329_v0  ;;  %v4422_v25 = vld [vmem:[#allocation5 + $0x750] sm:$0xf0]  ;;  %v5418_v26 = vld [vmem:[#allocation5 + $0x8e4] sm:$0xf]  ;;  %v4297_v30 = vor.u32 %v5334_v22, %v4294_v23 }
  0xad   :  { %2680 = vmatpush.bf16.msra.mxu2 %v4457_v5  ;;  %v4630_v27 = vld [vmem:[#allocation5 + $0x8f0] sm:$0xf0]  ;;  %v5298_v31 = vld [vmem:[#allocation5 + $0x524] sm:$0xf]  ;;  %v4425_v33 = vor.u32 %v5366_v24, %v4422_v25 }
  0xae   :  { %2640 = vmatpush.bf16.msra.mxu3 %v4041_v63  ;;  %v4150_v32 = vld [vmem:[#allocation5 + $0x530] sm:$0xf0]  ;;  %v4633_v34 = vor.u32 %v5418_v26, %v4630_v27  ;;  %v5330_v37 = vld [vmem:[#allocation5 + $0x624] sm:$0xf] }
  0xaf   :  { %2653 = vmatpush.bf16.msra.mxu0 %v4185_v13  ;;  %v4278_v38 = vld [vmem:[#allocation5 + $0x630] sm:$0xf0]  ;;  %v5362_v40 = vld [vmem:[#allocation5 + $0x724] sm:$0xf]  ;;  %v4153_v47 = vor.u32 %v5298_v31, %v4150_v32 }
  0xb0   :  { %2667 = vmatpush.bf16.msra.mxu1 %v4313_v16  ;;  %v4406_v42 = vld [vmem:[#allocation5 + $0x730] sm:$0xf0]  ;;  %v5414_v43 = vld [vmem:[#allocation5 + $0x8c4] sm:$0xf]  ;;  %v4281_v52 = vor.u32 %v5330_v37, %v4278_v38  ;;  %v5831_v37 = vld [vmem:[#allocation7] sm:$0xf] }
  0xb1   :  { %2681 = vmatpush.bf16.msra.mxu2 %v4441_v21  ;;  %v4614_v46 = vld [vmem:[#allocation5 + $0x8d0] sm:$0xf0]  ;;  %v5294_v49 = vld [vmem:[#allocation5 + $0x504] sm:$0xf]  ;;  %v4409_v56 = vor.u32 %v5362_v40, %v4406_v42 }
  0xb2   :  { %2641 = vmatpush.bf16.msra.mxu3 %v4025_v15  ;;  %v5506_v50 = vld [vmem:[#allocation5 + $0xba4] sm:$0xf]  ;;  %v4982_v51 = vld [vmem:[#allocation5 + $0xbb0] sm:$0x30]  ;;  %v4617_v57 = vor.u32 %v5414_v43, %v4614_v46 }
  0xb3   :  { %2654 = vmatpush.bf16.msra.mxu0 %v4169_v28  ;;  %v4134_v53 = vld [vmem:[#allocation5 + $0x510] sm:$0xf0]  ;;  %v5326_v54 = vld [vmem:[#allocation5 + $0x604] sm:$0xf]  ;;  %v4985_v2 = vor.u32 %v5506_v50, %v4982_v51 }
  0xb4   :  { %2668 = vmatpush.bf16.msra.mxu1 %v4297_v30  ;;  %v4262_v55 = vld [vmem:[#allocation5 + $0x610] sm:$0xf0]  ;;  %v5358_v59 = vld [vmem:[#allocation5 + $0x704] sm:$0xf]  ;;  %v4137_v3 = vor.u32 %v5294_v49, %v4134_v53 }
  0xb5   :  { %2682 = vmatpush.bf16.msra.mxu2 %v4425_v33  ;;  %v5450_v60 = vld [vmem:[#allocation5 + $0x9e4] sm:$0xf]  ;;  %v4758_v61 = vld [vmem:[#allocation5 + $0x9f0] sm:$0xf0]  ;;  %v4265_v6 = vor.u32 %v5326_v54, %v4262_v55  ;;  %v2403_v16 = vsel %vm2398_vm0, %v4985_v2, 0 }
  0xb6   :  { %2642 = vmatpush.bf16.msra.mxu3 %v4009_v29  ;;  %v4390_v62 = vld [vmem:[#allocation5 + $0x710] sm:$0xf0]  ;;  %v5410_v63 = vld [vmem:[#allocation5 + $0x8a4] sm:$0xf]  ;;  %v4761_v7 = vor.u32 %v5450_v60, %v4758_v61 }
  0xb7   :  { %v4598_v0 = vld [vmem:[#allocation5 + $0x8b0] sm:$0xf0]  ;;  %2655 = vmatpush.bf16.msra.mxu0 %v4153_v47  ;;  %v5482_v4 = vld [vmem:[#allocation5 + $0xae4] sm:$0xf]  ;;  %v4393_v8 = vor.u32 %v5358_v59, %v4390_v62 }
  0xb8   :  { %v4886_v5 = vld [vmem:[#allocation5 + $0xaf0] sm:$0xf0]  ;;  %2669 = vmatpush.bf16.msra.mxu1 %v4281_v52  ;;  %v4601_v9 = vor.u32 %v5410_v63, %v4598_v0  ;;  %v5406_v12 = vld [vmem:[#allocation5 + $0x884] sm:$0xf]  ;;  %v510_v52 = vperm.slane %v5831_v37, 0 }
  0xb9   :  { %2643 = vmatmul.bf16.vlgmr.msra.gmra.mxu3 %v5797_v39  ;;  %2683 = vmatpush.bf16.msra.mxu2 %v4409_v56  ;;  %v5446_v13 = vld [vmem:[#allocation5 + $0x9c4] sm:$0xf]  ;;  %v4742_v14 = vld [vmem:[#allocation5 + $0x9d0] sm:$0xf0]  ;;  %v4889_v15 = vor.u32 %v5482_v4, %v4886_v5 }
  0xba   :  { %2691 = vmatpush.bf16.msrb.mxu3 %v4633_v34  ;;  %v4582_v18 = vld [vmem:[#allocation5 + $0x890] sm:$0xf0]  ;;  %v5478_v19 = vld [vmem:[#allocation5 + $0xac4] sm:$0xf]  ;;  %v4745_v23 = vor.u32 %v5446_v13, %v4742_v14 }
  0xbb   :  { %2656 = vmatpush.bf16.msra.mxu0 %v4137_v3  ;;  %v4870_v20 = vld [vmem:[#allocation5 + $0xad0] sm:$0xf0]  ;;  %v5502_v21 = vld [vmem:[#allocation5 + $0xb84] sm:$0xf]  ;;  %v4585_v24 = vor.u32 %v5406_v12, %v4582_v18 }
  0xbc   :  { %v4966_v22 = vld [vmem:[#allocation5 + $0xb90] sm:$0xf0]  ;;  %2670 = vmatpush.bf16.msra.mxu1 %v4265_v6  ;;  %v5402_v25 = vld [vmem:[#allocation5 + $0x864] sm:$0xf]  ;;  %v4873_v28 = vor.u32 %v5478_v19, %v4870_v20 }
  0xbd   :  { %2684 = vmatpush.bf16.msra.mxu2 %v4393_v8  ;;  %v5442_v26 = vld [vmem:[#allocation5 + $0x9a4] sm:$0xf]  ;;  %v4726_v27 = vld [vmem:[#allocation5 + $0x9b0] sm:$0xf0]  ;;  %v4969_v29 = vor.u32 %v5502_v21, %v4966_v22 }
  0xbe   :  { %2692 = vmatpush.bf16.msrb.mxu3 %v4617_v57  ;;  %v4566_v30 = vld [vmem:[#allocation5 + $0x870] sm:$0xf0]  ;;  %v5474_v31 = vld [vmem:[#allocation5 + $0xaa4] sm:$0xf]  ;;  %2657 = vmatmul.bf16.vlgmr.msra.gmra.mxu0 %v5802_v45  ;;  %v4729_v38 = vor.u32 %v5442_v26, %v4726_v27  ;;  %v5165_v27 = vld [vmem:[#allocation5 + $0xf4] sm:$0xf0] }
  0xbf   :  { %2705 = vmatpush.bf16.msrb.mxu0 %v4761_v7  ;;  %v4854_v32 = vld [vmem:[#allocation5 + $0xab0] sm:$0xf0]  ;;  %2671 = vmatmul.bf16.vlgmr.msra.gmra.mxu1 %v5800_v44  ;;  %v5498_v33 = vld [vmem:[#allocation5 + $0xb64] sm:$0xf]  ;;  %v4569_v40 = vor.u32 %v5402_v25, %v4566_v30  ;;  %v3612_v25 = vld [vmem:[#allocation5 + $0xe8] sm:$0xf] }
  0xc0   :  { %2719 = vmatpush.bf16.msrb.mxu1 %v4889_v15  ;;  %v4950_v34 = vld [vmem:[#allocation5 + $0xb70] sm:$0xf0]  ;;  %2685 = vmatmul.bf16.vlgmr.msra.gmra.mxu2 %v5804_v48  ;;  %v5398_v42 = vld [vmem:[#allocation5 + $0x844] sm:$0xf]  ;;  %v4857_v47 = vor.u32 %v5474_v31, %v4854_v32  ;;  %v2434_v15 = vpop.f32.mrf.mxu1 }
  0xc1   :  { %2735 = vmatpush.bf16.msrb.mxu2 %v2403_v16  ;;  %v5438_v43 = vld [vmem:[#allocation5 + $0x984] sm:$0xf]  ;;  %v4710_v46 = vld [vmem:[#allocation5 + $0x990] sm:$0xf0]  ;;  %v4953_v49 = vor.u32 %v5498_v33, %v4950_v34  ;;  %v2420_v61 = vpop.f32.mrf.mxu0 }
  0xc2   :  { %2693 = vmatpush.bf16.msrb.mxu3 %v4601_v9  ;;  %v4550_v50 = vld [vmem:[#allocation5 + $0x850] sm:$0xf0]  ;;  %v5470_v51 = vld [vmem:[#allocation5 + $0xa84] sm:$0xf]  ;;  %v4713_v56 = vor.u32 %v5438_v43, %v4710_v46  ;;  %v2421_v4 = vadd.f32 %v2420_v61, %v510_v52  ;;  %v3868_v61 = vld [vmem:[#allocation5 + $0x2e8] sm:$0xf] }
  0xc3   :  { %2706 = vmatpush.bf16.msrb.mxu0 %v4745_v23  ;;  %v4838_v53 = vld [vmem:[#allocation5 + $0xa90] sm:$0xf0]  ;;  %v5494_v54 = vld [vmem:[#allocation5 + $0xb44] sm:$0xf]  ;;  %v4553_v57 = vor.u32 %v5398_v42, %v4550_v50  ;;  %v3613_v42 = vor.u32 %v5165_v27, %v3612_v25  ;;  %v3980_v27 = vld [vmem:[#allocation5 + $0x3c8] sm:$0xf] }
  0xc4   :  { %2720 = vmatpush.bf16.msrb.mxu1 %v4873_v28  ;;  %v4934_v55 = vld [vmem:[#allocation5 + $0xb50] sm:$0xf0]  ;;  %v5434_v59 = vld [vmem:[#allocation5 + $0x964] sm:$0xf]  ;;  %v4841_v62 = vor.u32 %v5470_v51, %v4838_v53  ;;  %v2435_v22 = vadd.f32 %v2434_v15, %v2421_v4  ;;  %v3740_v28 = vld [vmem:[#allocation5 + $0x1e8] sm:$0xf] }
  0xc5   :  { %2736 = vmatpush.bf16.msrb.mxu2 %v4969_v29  ;;  %v4694_v60 = vld [vmem:[#allocation5 + $0x970] sm:$0xf0]  ;;  %v4937_v63 = vor.u32 %v5494_v54, %v4934_v55  ;;  %v5394_v0 = vld [vmem:[#allocation5 + $0x824] sm:$0xf]  ;;  %v5197_v29 = vld [vmem:[#allocation5 + $0x1f4] sm:$0xf0]  ;;  %v2462_v55 = vpop.f32.mrf.mxu3 }
  0xc6   :  { %2694 = vmatpush.bf16.msrb.mxu3 %v4585_v24  ;;  %v4534_v2 = vld [vmem:[#allocation5 + $0x830] sm:$0xf0]  ;;  %v5466_v3 = vld [vmem:[#allocation5 + $0xa64] sm:$0xf]  ;;  %v4697_v8 = vor.u32 %v5434_v59, %v4694_v60  ;;  %v3741_v43 = vor.u32 %v5197_v29, %v3740_v28  ;;  %v5161_v51 = vld [vmem:[#allocation5 + $0xd4] sm:$0xf0] }
  0xc7   :  { %2707 = vmatpush.bf16.msrb.mxu0 %v4729_v38  ;;  %v4822_v5 = vld [vmem:[#allocation5 + $0xa70] sm:$0xf0]  ;;  %v5490_v6 = vld [vmem:[#allocation5 + $0xb24] sm:$0xf]  ;;  %v4537_v9 = vor.u32 %v5394_v0, %v4534_v2  ;;  %v3724_v53 = vld [vmem:[#allocation5 + $0x1c8] sm:$0xf] }
  0xc8   :  { %2721 = vmatpush.bf16.msrb.mxu1 %v4857_v47  ;;  %v4918_v7 = vld [vmem:[#allocation5 + $0xb30] sm:$0xf0]  ;;  %v5390_v12 = vld [vmem:[#allocation5 + $0x804] sm:$0xf]  ;;  %v4825_v16 = vor.u32 %v5466_v3, %v4822_v5  ;;  %v2448_v30 = vpop.f32.mrf.mxu2  ;;  %v5193_v54 = vld [vmem:[#allocation5 + $0x1d4] sm:$0xf0] }
  0xc9   :  { %2737 = vmatpush.bf16.msrb.mxu2 %v4953_v49  ;;  %v5430_v13 = vld [vmem:[#allocation5 + $0x944] sm:$0xf]  ;;  %v4678_v14 = vld [vmem:[#allocation5 + $0x950] sm:$0xf0]  ;;  %v4921_v18 = vor.u32 %v5490_v6, %v4918_v7  ;;  %v2449_v34 = vadd.f32 %v2448_v30, %v2435_v22  ;;  %v3596_v49 = vld [vmem:[#allocation5 + $0xc8] sm:$0xf]  ;;  %v3725_v0 = vor.u32 %v5193_v54, %v3724_v53  ;;  %v5842_v25 = vpop.f32.mrf.mxu0 }
  0xca   :  { %2695 = vmatpush.bf16.msrb.mxu3 %v4569_v40  ;;  %v4518_v19 = vld [vmem:[#allocation5 + $0x810] sm:$0xf0]  ;;  %v5462_v20 = vld [vmem:[#allocation5 + $0xa44] sm:$0xf]  ;;  %v4681_v26 = vor.u32 %v5430_v13, %v4678_v14  ;;  %v3580_v4 = vld [vmem:[#allocation5 + $0xa8] sm:$0xf] }
  0xcb   :  { %2708 = vmatpush.bf16.msrb.mxu0 %v4713_v56  ;;  %v4806_v21 = vld [vmem:[#allocation5 + $0xa50] sm:$0xf0]  ;;  %v5486_v23 = vld [vmem:[#allocation5 + $0xb04] sm:$0xf]  ;;  %v4521_v31 = vor.u32 %v5390_v12, %v4518_v19  ;;  %v5837_v59 = vadd.f32 %v2462_v55, %v2449_v34  ;;  %v5157_v6 = vld [vmem:[#allocation5 + $0xb4] sm:$0xf0] }
  0xcc   :  { %2722 = vmatpush.bf16.msrb.mxu1 %v4841_v62  ;;  %v4902_v24 = vld [vmem:[#allocation5 + $0xb10] sm:$0xf0]  ;;  %v5426_v32 = vld [vmem:[#allocation5 + $0x924] sm:$0xf]  ;;  %v4809_v38 = vor.u32 %v5462_v20, %v4806_v21  ;;  %v5229_v62 = vld [vmem:[#allocation5 + $0x2f4] sm:$0xf0] }
  0xcd   :  { %2738 = vmatpush.bf16.msrb.mxu2 %v4937_v63  ;;  %v4662_v33 = vld [vmem:[#allocation5 + $0x930] sm:$0xf0]  ;;  %v4905_v40 = vor.u32 %v5486_v23, %v4902_v24  ;;  %v5458_v46 = vld [vmem:[#allocation5 + $0xa24] sm:$0xf]  ;;  %v3597_v63 = vor.u32 %v5161_v51, %v3596_v49  ;;  %v3708_v7 = vld [vmem:[#allocation5 + $0x1a8] sm:$0xf] }
  0xce   :  { %2696 = vmatpush.bf16.msrb.mxu3 %v4553_v57  ;;  %v4790_v47 = vld [vmem:[#allocation5 + $0xa30] sm:$0xf0]  ;;  %v4665_v50 = vor.u32 %v5426_v32, %v4662_v33  ;;  %v5422_v56 = vld [vmem:[#allocation5 + $0x904] sm:$0xf]  ;;  %v3996_v12 = vld [vmem:[#allocation5 + $0x3e8] sm:$0xf] }
  0xcf   :  { %2709 = vmatpush.bf16.msrb.mxu0 %v4697_v8  ;;  %v4646_v57 = vld [vmem:[#allocation5 + $0x910] sm:$0xf0]  ;;  %v4793_v60 = vor.u32 %v5458_v46, %v4790_v47  ;;  %v5454_v2 = vld [vmem:[#allocation5 + $0xa04] sm:$0xf]  ;;  %v5189_v8 = vld [vmem:[#allocation5 + $0x1b4] sm:$0xf0] }
  0xd0   :  { %2723 = vmatpush.bf16.msrb.mxu1 %v4825_v16  ;;  %v4774_v3 = vld [vmem:[#allocation5 + $0xa10] sm:$0xf0]  ;;  %v4649_v5 = vor.u32 %v5422_v56, %v4646_v57  ;;  %v5261_v13 = vld [vmem:[#allocation5 + $0x3f4] sm:$0xf0]  ;;  %v3852_v15 = vld [vmem:[#allocation5 + $0x2c8] sm:$0xf]  ;;  %v3709_v19 = vor.u32 %v5189_v8, %v3708_v7  ;;  %v5848_v57 = vpop.f32.mrf.mxu2 }
  0xd1   :  { %2739 = vmatpush.bf16.msrb.mxu2 %v4921_v18  ;;  %v4777_v14 = vor.u32 %v5454_v2, %v4774_v3  ;;  %v5225_v16 = vld [vmem:[#allocation5 + $0x2d4] sm:$0xf0]  ;;  %v3581_v18 = vor.u32 %v5157_v6, %v3580_v4  ;;  %v3564_v20 = vld [vmem:[#allocation5 + $0x88] sm:$0xf]  ;;  %v3997_v21 = vor.u32 %v5261_v13, %v3996_v12  ;;  %v5850_v3 = vpop.f32.mrf.mxu3 }
  0xd2   :  { %2697 = vmatpush.bf16.msrb.mxu3 %v4537_v9  ;;  %v3869_v9 = vor.u32 %v5229_v62, %v3868_v61  ;;  %v5153_v22 = vld [vmem:[#allocation5 + $0x94] sm:$0xf0]  ;;  %v3692_v23 = vld [vmem:[#allocation5 + $0x188] sm:$0xf] }
  0xd3   :  { %2710 = vmatpush.bf16.msrb.mxu0 %v4681_v26  ;;  %v5185_v24 = vld [vmem:[#allocation5 + $0x194] sm:$0xf0]  ;;  %v3853_v26 = vor.u32 %v5225_v16, %v3852_v15  ;;  %v3836_v29 = vld [vmem:[#allocation5 + $0x2a8] sm:$0xf] }
  0xd4   :  { %2724 = vmatpush.bf16.msrb.mxu1 %v4809_v38  ;;  %v5257_v28 = vld [vmem:[#allocation5 + $0x3d4] sm:$0xf0]  ;;  %v3693_v32 = vor.u32 %v5185_v24, %v3692_v23  ;;  %v3548_v33 = vld [vmem:[#allocation5 + $0x68] sm:$0xf]  ;;  %v5845_v38 = vpop.f32.mrf.mxu1 }
  0xd5   :  { %2740 = vmatpush.bf16.msrb.mxu2 %v4905_v40  ;;  %v5221_v30 = vld [vmem:[#allocation5 + $0x2b4] sm:$0xf0]  ;;  %v3981_v34 = vor.u32 %v5257_v28, %v3980_v27  ;;  %v3964_v47 = vld [vmem:[#allocation5 + $0x3a8] sm:$0xf] }
  0xd6   :  { %2698 = vmatpush.bf16.msrb.mxu3 %v4521_v31  ;;  %v3565_v31 = vor.u32 %v5153_v22, %v3564_v20  ;;  %v5149_v40 = vld [vmem:[#allocation5 + $0x74] sm:$0xf0]  ;;  %v3837_v46 = vor.u32 %v5221_v30, %v3836_v29  ;;  %v3532_v55 = vld [vmem:[#allocation5 + $0x48] sm:$0xf] }
  0xd7   :  { %2711 = vmatpush.bf16.msrb.mxu0 %v4665_v50  ;;  %v5253_v49 = vld [vmem:[#allocation5 + $0x3b4] sm:$0xf0]  ;;  %v3820_v50 = vld [vmem:[#allocation5 + $0x288] sm:$0xf]  ;;  %v3549_v53 = vor.u32 %v5149_v40, %v3548_v33 }
  0xd8   :  { %4995 = vmatmul.msk.bf16.vlgmr.msrb.gmra.mxu2 %vm2394_vm1, %v5810_v11  ;;  %2725 = vmatpush.bf16.msrb.mxu1 %v4793_v60  ;;  %v5217_v51 = vld [vmem:[#allocation5 + $0x294] sm:$0xf0]  ;;  %v3965_v56 = vor.u32 %v5253_v49, %v3964_v47  ;;  %v3660_v61 = vld [vmem:[#allocation5 + $0x148] sm:$0xf] }
  0xd9   :  { %2747 = vmatpush.bf16.msra.mxu2 %v3613_v42  ;;  %2699 = vmatmul.bf16.vlgmr.msrb.gmra.mxu3 %v5814_v35  ;;  %v3676_v42 = vld [vmem:[#allocation5 + $0x168] sm:$0xf]  ;;  %v5145_v60 = vld [vmem:[#allocation5 + $0x54] sm:$0xf0] }
  0xda   :  { %2761 = vmatpush.bf16.msra.mxu3 %v3741_v43  ;;  %v5181_v43 = vld [vmem:[#allocation5 + $0x174] sm:$0xf0]  ;;  %v3804_v4 = vld [vmem:[#allocation5 + $0x268] sm:$0xf]  ;;  %v3533_v7 = vor.u32 %v5145_v60, %v3532_v55 }
  0xdb   :  { %2712 = vmatpush.bf16.msrb.mxu0 %v4649_v5  ;;  %v3677_v54 = vor.u32 %v5181_v43, %v3676_v42  ;;  %v5177_v62 = vld [vmem:[#allocation5 + $0x154] sm:$0xf0]  ;;  %v3644_v15 = vld [vmem:[#allocation5 + $0x128] sm:$0xf] }
  0xdc   :  { %2726 = vmatpush.bf16.msrb.mxu1 %v4777_v14  ;;  %v5249_v2 = vld [vmem:[#allocation5 + $0x394] sm:$0xf0]  ;;  %v3661_v8 = vor.u32 %v5177_v62, %v3660_v61  ;;  %v3788_v22 = vld [vmem:[#allocation5 + $0x248] sm:$0xf] }
  0xdd   :  { %2748 = vmatpush.bf16.msra.mxu2 %v3597_v63  ;;  %v3821_v63 = vor.u32 %v5217_v51, %v3820_v50  ;;  %v5213_v5 = vld [vmem:[#allocation5 + $0x274] sm:$0xf0]  ;;  %v3500_v28 = vld [vmem:[#allocation5 + $0x8] sm:$0xf] }
  0xde   :  { %2762 = vmatpush.bf16.msra.mxu3 %v3725_v0  ;;  %2713 = vmatmul.bf16.vlgmr.msrb.gmra.mxu0 %v5818_v41  ;;  %v3948_v0 = vld [vmem:[#allocation5 + $0x388] sm:$0xf]  ;;  %v5141_v14 = vld [vmem:[#allocation5 + $0x34] sm:$0xf0] }
  0xdf   :  { %2775 = vmatpush.bf16.msra.mxu0 %v3869_v9  ;;  %2727 = vmatmul.bf16.vlgmr.msrb.gmra.mxu1 %v5816_v36  ;;  %v2476_v6 = vpop.f32.mrf.mxu0  ;;  %v3516_v9 = vld [vmem:[#allocation5 + $0x28] sm:$0xf]  ;;  %v3949_v13 = vor.u32 %v5249_v2, %v3948_v0  ;;  %v5173_v16 = vld [vmem:[#allocation5 + $0x134] sm:$0xf0] }
  0xe0   :  { %2789 = vmatpush.bf16.msra.mxu1 %v3997_v21  ;;  %v2477_v12 = vadd.f32 %v2476_v6, %v5837_v59  ;;  %v5245_v20 = vld [vmem:[#allocation5 + $0x374] sm:$0xf0]  ;;  %v2490_v21 = vpop.f32.mrf.mxu1  ;;  %v3645_v27 = vor.u32 %v5173_v16, %v3644_v15  ;;  %v3628_v30 = vld [vmem:[#allocation5 + $0x108] sm:$0xf] }
  0xe1   :  { %2749 = vmatpush.bf16.msra.mxu2 %v3581_v18  ;;  %v3805_v18 = vor.u32 %v5213_v5, %v3804_v4  ;;  %v5209_v23 = vld [vmem:[#allocation5 + $0x254] sm:$0xf0]  ;;  %v4124_v40 = vld [vmem:[#allocation5 + $0x4e8] sm:$0xf] }
  0xe2   :  { %2763 = vmatpush.bf16.msra.mxu3 %v3709_v19  ;;  %v3932_v19 = vld [vmem:[#allocation5 + $0x368] sm:$0xf]  ;;  %v2491_v24 = vadd.f32 %v2490_v21, %v2477_v12  ;;  %v5137_v29 = vld [vmem:[#allocation5 + $0x14] sm:$0xf0]  ;;  %v2518_v55 = vpop.f32.mrf.mxu3 }
  0xe3   :  { %2776 = vmatpush.bf16.msra.mxu0 %v3853_v26  ;;  %v3517_v26 = vor.u32 %v5141_v14, %v3516_v9  ;;  %v3933_v59 = vor.u32 %v5245_v20, %v3932_v19  ;;  %v5241_v33 = vld [vmem:[#allocation5 + $0x354] sm:$0xf0]  ;;  %v4252_v43 = vld [vmem:[#allocation5 + $0x5e8] sm:$0xf] }
  0xe4   :  { %2790 = vmatpush.bf16.msra.mxu1 %v3981_v34  ;;  %v3789_v34 = vor.u32 %v5209_v23, %v3788_v22  ;;  %v5293_v42 = vld [vmem:[#allocation5 + $0x4f4] sm:$0xf0]  ;;  %v3772_v49 = vld [vmem:[#allocation5 + $0x228] sm:$0xf] }
  0xe5   :  { %2750 = vmatpush.bf16.msra.mxu2 %v3565_v31  ;;  %v5169_v31 = vld [vmem:[#allocation5 + $0x114] sm:$0xf0]  ;;  %v4125_v60 = vor.u32 %v5293_v42, %v4124_v40  ;;  %v3900_v61 = vld [vmem:[#allocation5 + $0x328] sm:$0xf] }
  0xe6   :  { %2764 = vmatpush.bf16.msra.mxu3 %v3693_v32  ;;  %v3916_v32 = vld [vmem:[#allocation5 + $0x348] sm:$0xf]  ;;  %v5325_v47 = vld [vmem:[#allocation5 + $0x5f4] sm:$0xf0] }
  0xe7   :  { %2777 = vmatpush.bf16.msra.mxu0 %v3837_v46  ;;  %v2504_v46 = vpop.f32.mrf.mxu2  ;;  %v5205_v50 = vld [vmem:[#allocation5 + $0x234] sm:$0xf0]  ;;  %v4253_v0 = vor.u32 %v5325_v47, %v4252_v43  ;;  %v4108_v4 = vld [vmem:[#allocation5 + $0x4c8] sm:$0xf] }
  0xe8   :  { %2791 = vmatpush.bf16.msra.mxu1 %v3965_v56  ;;  %v2505_v51 = vadd.f32 %v2504_v46, %v2491_v24  ;;  %v3917_v56 = vor.u32 %v5241_v33, %v3916_v32  ;;  %v5237_v62 = vld [vmem:[#allocation5 + $0x334] sm:$0xf0]  ;;  %v3773_v2 = vor.u32 %v5205_v50, %v3772_v49  ;;  %v4236_v6 = vld [vmem:[#allocation5 + $0x5c8] sm:$0xf] }
  0xe9   :  { %2751 = vmatpush.bf16.msra.mxu2 %v3549_v53  ;;  %v3501_v53 = vor.u32 %v5137_v29, %v3500_v28  ;;  %v5289_v5 = vld [vmem:[#allocation5 + $0x4d4] sm:$0xf0]  ;;  %v4380_v12 = vld [vmem:[#allocation5 + $0x6e8] sm:$0xf]  ;;  %v3901_v14 = vor.u32 %v5237_v62, %v3900_v61 }
  0xea   :  { %2765 = vmatpush.bf16.msra.mxu3 %v3677_v54  ;;  %v3629_v54 = vor.u32 %v5169_v31, %v3628_v30  ;;  %v5201_v9 = vld [vmem:[#allocation5 + $0x214] sm:$0xf0]  ;;  %v4109_v15 = vor.u32 %v5289_v5, %v4108_v4  ;;  %v3884_v16 = vld [vmem:[#allocation5 + $0x308] sm:$0xf] }
  0xeb   :  { %2778 = vmatpush.bf16.msra.mxu0 %v3821_v63  ;;  %v5853_v63 = vadd.f32 %v2518_v55, %v2505_v51  ;;  %v4092_v21 = vld [vmem:[#allocation5 + $0x4a8] sm:$0xf]  ;;  %v5285_v22 = vld [vmem:[#allocation5 + $0x4b4] sm:$0xf0] }
  0xec   :  { %2792 = vmatpush.bf16.msra.mxu1 %v3949_v13  ;;  %v5357_v13 = vld [vmem:[#allocation5 + $0x6f4] sm:$0xf0]  ;;  %v4220_v23 = vld [vmem:[#allocation5 + $0x5a8] sm:$0xf]  ;;  %v4093_v31 = vor.u32 %v5285_v22, %v4092_v21 }
  0xed   :  { %2752 = vmatpush.bf16.msra.mxu2 %v3533_v7  ;;  %v5321_v7 = vld [vmem:[#allocation5 + $0x5d4] sm:$0xf0]  ;;  %v4364_v29 = vld [vmem:[#allocation5 + $0x6c8] sm:$0xf] }
  0xee   :  { %2766 = vmatpush.bf16.msra.mxu3 %v3661_v8  ;;  %v3756_v8 = vld [vmem:[#allocation5 + $0x208] sm:$0xf]  ;;  %v4237_v19 = vor.u32 %v5321_v7, %v4236_v6  ;;  %v5317_v24 = vld [vmem:[#allocation5 + $0x5b4] sm:$0xf0] }
  0xef   :  { %2779 = vmatpush.bf16.msra.mxu0 %v3805_v18  ;;  %v5233_v18 = vld [vmem:[#allocation5 + $0x314] sm:$0xf0]  ;;  %v3757_v20 = vor.u32 %v5201_v9, %v3756_v8  ;;  %v4221_v32 = vor.u32 %v5317_v24, %v4220_v23  ;;  %v4204_v42 = vld [vmem:[#allocation5 + $0x588] sm:$0xf] }
  0xf0   :  { %2793 = vmatpush.bf16.msra.mxu1 %v3933_v59  ;;  %v5389_v28 = vld [vmem:[#allocation5 + $0x7f4] sm:$0xf0]  ;;  %v3885_v59 = vor.u32 %v5233_v18, %v3884_v16  ;;  %v4492_v47 = vld [vmem:[#allocation5 + $0x7c8] sm:$0xf] }
  0xf1   :  { %2753 = vmatpush.bf16.msra.mxu2 %v3517_v26  ;;  %v4381_v26 = vor.u32 %v5357_v13, %v4380_v12  ;;  %v5353_v30 = vld [vmem:[#allocation5 + $0x6d4] sm:$0xf0]  ;;  %v4348_v50 = vld [vmem:[#allocation5 + $0x6a8] sm:$0xf] }
  0xf2   :  { %2767 = vmatpush.bf16.msra.mxu3 %v3645_v27  ;;  %v4508_v27 = vld [vmem:[#allocation5 + $0x7e8] sm:$0xf]  ;;  %v5281_v40 = vld [vmem:[#allocation5 + $0x494] sm:$0xf0]  ;;  %v4365_v46 = vor.u32 %v5353_v30, %v4364_v29 }
  0xf3   :  { %2780 = vmatpush.bf16.msra.mxu0 %v3789_v34  ;;  %v4509_v33 = vor.u32 %v5389_v28, %v4508_v27  ;;  %v4076_v34 = vld [vmem:[#allocation5 + $0x488] sm:$0xf]  ;;  %v5313_v43 = vld [vmem:[#allocation5 + $0x594] sm:$0xf0] }
  0xf4   :  { %2794 = vmatpush.bf16.msra.mxu1 %v3917_v56  ;;  %v5385_v49 = vld [vmem:[#allocation5 + $0x7d4] sm:$0xf0]  ;;  %v4060_v56 = vld [vmem:[#allocation5 + $0x468] sm:$0xf] }
  0xf5   :  { %2754 = vmatpush.bf16.msra.mxu2 %v3501_v53  ;;  %v5349_v51 = vld [vmem:[#allocation5 + $0x6b4] sm:$0xf0]  ;;  %v4077_v53 = vor.u32 %v5281_v40, %v4076_v34  ;;  %v4493_v55 = vor.u32 %v5385_v49, %v4492_v47  ;;  %v4188_v61 = vld [vmem:[#allocation5 + $0x568] sm:$0xf] }
  0xf6   :  { %2768 = vmatpush.bf16.msra.mxu3 %v3629_v54  ;;  %v4205_v54 = vor.u32 %v5313_v43, %v4204_v42  ;;  %v5309_v62 = vld [vmem:[#allocation5 + $0x574] sm:$0xf0]  ;;  %v4332_v5 = vld [vmem:[#allocation5 + $0x688] sm:$0xf] }
  0xf7   :  { %2781 = vmatpush.bf16.msra.mxu0 %v3773_v2  ;;  %v4476_v2 = vld [vmem:[#allocation5 + $0x7a8] sm:$0xf]  ;;  %v5381_v4 = vld [vmem:[#allocation5 + $0x7b4] sm:$0xf0]  ;;  %v4189_v8 = vor.u32 %v5309_v62, %v4188_v61 }
  0xf8   :  { %2755 = vmatmul.bf16.vlgmr.msra.gmra.mxu2 %v5785_v58  ;;  %2795 = vmatpush.bf16.msra.mxu1 %v3901_v14  ;;  %v5345_v6 = vld [vmem:[#allocation5 + $0x694] sm:$0xf0]  ;;  %v4477_v9 = vor.u32 %v5381_v4, %v4476_v2  ;;  %v4044_v12 = vld [vmem:[#allocation5 + $0x448] sm:$0xf] }
  0xf9   :  { %2803 = vmatpush.bf16.msrb.mxu2 %v4125_v60  ;;  %2769 = vmatmul.bf16.vlgmr.msra.gmra.mxu3 %v5791_v10  ;;  %v5277_v60 = vld [vmem:[#allocation5 + $0x474] sm:$0xf0]  ;;  %v4172_v14 = vld [vmem:[#allocation5 + $0x548] sm:$0xf]  ;;  %v4333_v16 = vor.u32 %v5345_v6, %v4332_v5 }
  0xfa   :  { %2817 = vmatpush.bf16.msrb.mxu3 %v4253_v0  ;;  %v4349_v0 = vor.u32 %v5349_v51, %v4348_v50  ;;  %v4061_v7 = vor.u32 %v5277_v60, %v4060_v56  ;;  %v5273_v13 = vld [vmem:[#allocation5 + $0x454] sm:$0xf0]  ;;  %v4460_v18 = vld [vmem:[#allocation5 + $0x788] sm:$0xf] }
  0xfb   :  { %2782 = vmatpush.bf16.msra.mxu0 %v3757_v20  ;;  %v4316_v20 = vld [vmem:[#allocation5 + $0x668] sm:$0xf]  ;;  %v5341_v21 = vld [vmem:[#allocation5 + $0x674] sm:$0xf0]  ;;  %v4045_v22 = vor.u32 %v5273_v13, %v4044_v12 }
  0xfc   :  { %2796 = vmatpush.bf16.msra.mxu1 %v3885_v59  ;;  %v5269_v27 = vld [vmem:[#allocation5 + $0x434] sm:$0xf0]  ;;  %v4156_v28 = vld [vmem:[#allocation5 + $0x528] sm:$0xf]  ;;  %v4317_v30 = vor.u32 %v5341_v21, %v4316_v20 }
  0xfd   :  { %2804 = vmatpush.bf16.msrb.mxu2 %v4109_v15  ;;  %v5305_v15 = vld [vmem:[#allocation5 + $0x554] sm:$0xf0]  ;;  %v4444_v59 = vld [vmem:[#allocation5 + $0x768] sm:$0xf] }
  0xfe   :  { %2818 = vmatpush.bf16.msrb.mxu3 %v4237_v19  ;;  %2783 = vmatmul.bf16.vlgmr.msra.gmra.mxu0 %v5787_v1  ;;  %v5377_v19 = vld [vmem:[#allocation5 + $0x794] sm:$0xf0]  ;;  %v4173_v23 = vor.u32 %v5305_v15, %v4172_v14  ;;  %v4012_v40 = vld [vmem:[#allocation5 + $0x408] sm:$0xf] }
  0xff   :  { %2831 = vmatpush.bf16.msrb.mxu0 %v4381_v26  ;;  %2797 = vmatmul.bf16.vlgmr.msra.gmra.mxu1 %v5793_v17  ;;  %v4461_v24 = vor.u32 %v5377_v19, %v4460_v18  ;;  %v4028_v26 = vld [vmem:[#allocation5 + $0x428] sm:$0xf]  ;;  %v5301_v29 = vld [vmem:[#allocation5 + $0x534] sm:$0xf0] }
 0x100   :  { %2845 = vmatpush.bf16.msrb.mxu1 %v4509_v33  ;;  %v5337_v33 = vld [vmem:[#allocation5 + $0x654] sm:$0xf0]  ;;  %v4029_v34 = vor.u32 %v5269_v27, %v4028_v26  ;;  %v4157_v42 = vor.u32 %v5301_v29, %v4156_v28  ;;  %v4140_v47 = vld [vmem:[#allocation5 + $0x508] sm:$0xf] }
 0x101   :  { %2805 = vmatpush.bf16.msrb.mxu2 %v4093_v31  ;;  %v5373_v31 = vld [vmem:[#allocation5 + $0x774] sm:$0xf0]  ;;  %v4428_v51 = vld [vmem:[#allocation5 + $0x748] sm:$0xf] }
 0x102   :  { %2819 = vmatpush.bf16.msrb.mxu3 %v4221_v32  ;;  %v4300_v32 = vld [vmem:[#allocation5 + $0x648] sm:$0xf]  ;;  %v4445_v43 = vor.u32 %v5373_v31, %v4444_v59  ;;  %v5297_v49 = vld [vmem:[#allocation5 + $0x514] sm:$0xf0] }
 0x103   :  { %2832 = vmatpush.bf16.msrb.mxu0 %v4365_v46  ;;  %v5265_v46 = vld [vmem:[#allocation5 + $0x414] sm:$0xf0]  ;;  %v4301_v50 = vor.u32 %v5337_v33, %v4300_v32  ;;  %v4764_v56 = vld [vmem:[#allocation5 + $0x9e8] sm:$0xf]  ;;  %v4141_v2 = vor.u32 %v5297_v49, %v4140_v47 }
 0x104   :  { %2846 = vmatpush.bf16.msrb.mxu1 %v4493_v55  ;;  %v5421_v55 = vld [vmem:[#allocation5 + $0x8f4] sm:$0xf0]  ;;  %v4013_v61 = vor.u32 %v5265_v46, %v4012_v40  ;;  %v4284_v62 = vld [vmem:[#allocation5 + $0x628] sm:$0xf] }
 0x105   :  { %2806 = vmatpush.bf16.msrb.mxu2 %v4077_v53  ;;  %v5369_v53 = vld [vmem:[#allocation5 + $0x754] sm:$0xf0]  ;;  %v4748_v14 = vld [vmem:[#allocation5 + $0x9c8] sm:$0xf] }
 0x106   :  { %2820 = vmatpush.bf16.msrb.mxu3 %v4205_v54  ;;  %v4636_v54 = vld [vmem:[#allocation5 + $0x8e8] sm:$0xf]  ;;  %v5453_v60 = vld [vmem:[#allocation5 + $0x9f4] sm:$0xf0]  ;;  %v4429_v4 = vor.u32 %v5369_v53, %v4428_v51 }
 0x107   :  { %2833 = vmatpush.bf16.msrb.mxu0 %v4349_v0  ;;  %v5333_v0 = vld [vmem:[#allocation5 + $0x634] sm:$0xf0]  ;;  %v4637_v5 = vor.u32 %v5421_v55, %v4636_v54  ;;  %v4765_v6 = vor.u32 %v5453_v60, %v4764_v56  ;;  %v4892_v19 = vld [vmem:[#allocation5 + $0xae8] sm:$0xf] }
 0x108   :  { %2847 = vmatpush.bf16.msrb.mxu1 %v4477_v9  ;;  %v4620_v9 = vld [vmem:[#allocation5 + $0x8c8] sm:$0xf]  ;;  %v4285_v12 = vor.u32 %v5333_v0, %v4284_v62  ;;  %v5417_v13 = vld [vmem:[#allocation5 + $0x8d4] sm:$0xf0] }
 0x109   :  { %2807 = vmatpush.bf16.msrb.mxu2 %v4061_v7  ;;  %v4412_v7 = vld [vmem:[#allocation5 + $0x728] sm:$0xf]  ;;  %v5449_v15 = vld [vmem:[#allocation5 + $0x9d4] sm:$0xf0] }
 0x10a   :  { %2821 = vmatpush.bf16.msrb.mxu3 %v4189_v8  ;;  %v5365_v8 = vld [vmem:[#allocation5 + $0x734] sm:$0xf0]  ;;  %v4749_v26 = vor.u32 %v5449_v15, %v4748_v14  ;;  %v4396_v27 = vld [vmem:[#allocation5 + $0x708] sm:$0xf] }
 0x10b   :  { %2834 = vmatpush.bf16.msrb.mxu0 %v4333_v16  ;;  %v4268_v16 = vld [vmem:[#allocation5 + $0x608] sm:$0xf]  ;;  %v5329_v18 = vld [vmem:[#allocation5 + $0x614] sm:$0xf0]  ;;  %v4413_v20 = vor.u32 %v5365_v8, %v4412_v7 }
 0x10c   :  { %2848 = vmatpush.bf16.msrb.mxu1 %v4461_v24  ;;  %v5485_v21 = vld [vmem:[#allocation5 + $0xaf4] sm:$0xf0]  ;;  %v4621_v24 = vor.u32 %v5417_v13, %v4620_v9  ;;  %v4604_v29 = vld [vmem:[#allocation5 + $0x8a8] sm:$0xf] }
 0x10d   :  { %2808 = vmatpush.bf16.msrb.mxu2 %v4045_v22  ;;  %v4988_v22 = vld [vmem:[#allocation5 + $0xba8] sm:$0xf]  ;;  %v5361_v28 = vld [vmem:[#allocation5 + $0x714] sm:$0xf0]  ;;  %v4893_v33 = vor.u32 %v5485_v21, %v4892_v19 }
 0x10e   :  { %2822 = vmatpush.bf16.msrb.mxu3 %v4173_v23  ;;  %v5509_v23 = vld [vmem:[#allocation5 + $0xbb4] sm:$0x30]  ;;  %v4732_v31 = vld [vmem:[#allocation5 + $0x9a8] sm:$0xf]  ;;  %v4397_v40 = vor.u32 %v5361_v28, %v4396_v27 }
 0x10f   :  { %2835 = vmatpush.bf16.msrb.mxu0 %v4317_v30  ;;  %v4269_v30 = vor.u32 %v5329_v18, %v4268_v16  ;;  %v5413_v59 = vld [vmem:[#allocation5 + $0x8b4] sm:$0xf0]  ;;  %v4588_v49 = vld [vmem:[#allocation5 + $0x888] sm:$0xf] }
 0x110   :  { %2849 = vmatpush.bf16.msrb.mxu1 %v4445_v43  ;;  %v5445_v32 = vld [vmem:[#allocation5 + $0x9b4] sm:$0xf0]  ;;  %v4605_v46 = vor.u32 %v5413_v59, %v4604_v29  ;;  %v4716_v51 = vld [vmem:[#allocation5 + $0x988] sm:$0xf] }
 0x111   :  { %2809 = vmatpush.bf16.msrb.mxu2 %v4029_v34  ;;  %v4989_v34 = vor.u32 %v5509_v23, %v4988_v22  ;;  %v5481_v43 = vld [vmem:[#allocation5 + $0xad4] sm:$0xf0]  ;;  %v4733_v47 = vor.u32 %v5445_v32, %v4732_v31  ;;  %v4972_v56 = vld [vmem:[#allocation5 + $0xb88] sm:$0xf] }
 0x112   :  { %2823 = vmatpush.bf16.msrb.mxu3 %v4157_v42  ;;  %v4876_v42 = vld [vmem:[#allocation5 + $0xac8] sm:$0xf]  ;;  %v5441_v53 = vld [vmem:[#allocation5 + $0x994] sm:$0xf0] }
 0x113   :  { %2836 = vmatpush.bf16.msrb.mxu0 %v4301_v50  ;;  %v5409_v50 = vld [vmem:[#allocation5 + $0x894] sm:$0xf0]  ;;  %v2406_v54 = vsel %vm2398_vm0, %v4989_v34, 0  ;;  %v4877_v55 = vor.u32 %v5481_v43, %v4876_v42  ;;  %v4700_v7 = vld [vmem:[#allocation5 + $0x968] sm:$0xf] }
 0x114   :  { %2850 = vmatpush.bf16.msrb.mxu1 %v4429_v4  ;;  %v5505_v60 = vld [vmem:[#allocation5 + $0xb94] sm:$0xf0]  ;;  %v4589_v0 = vor.u32 %v5409_v50, %v4588_v49  ;;  %v4572_v4 = vld [vmem:[#allocation5 + $0x868] sm:$0xf] }
 0x115   :  { %2810 = vmatpush.bf16.msrb.mxu2 %v4013_v61  ;;  %v4860_v61 = vld [vmem:[#allocation5 + $0xaa8] sm:$0xf]  ;;  %v5477_v62 = vld [vmem:[#allocation5 + $0xab4] sm:$0xf0] }
 0x116   :  { %2824 = vmatpush.bf16.msrb.mxu3 %v4141_v2  ;;  %v4717_v2 = vor.u32 %v5441_v53, %v4716_v51  ;;  %v5437_v8 = vld [vmem:[#allocation5 + $0x974] sm:$0xf0]  ;;  %v4861_v9 = vor.u32 %v5477_v62, %v4860_v61  ;;  %v4844_v14 = vld [vmem:[#allocation5 + $0xa88] sm:$0xf] }
 0x117   :  { %2837 = vmatpush.bf16.msrb.mxu0 %v4285_v12  ;;  %v4956_v12 = vld [vmem:[#allocation5 + $0xb68] sm:$0xf]  ;;  %v5501_v13 = vld [vmem:[#allocation5 + $0xb74] sm:$0xf0]  ;;  %v4701_v18 = vor.u32 %v5437_v8, %v4700_v7  ;;  %v3614_v7 = vld [vmem:[#allocation5 + $0xf8] sm:$0xf0] }
 0x118   :  { %2811 = vmatmul.bf16.vlgmr.msrb.gmra.mxu2 %v5797_v39  ;;  %2851 = vmatpush.bf16.msrb.mxu1 %v4413_v20  ;;  %v5473_v15 = vld [vmem:[#allocation5 + $0xa94] sm:$0xf0]  ;;  %v4556_v19 = vld [vmem:[#allocation5 + $0x848] sm:$0xf]  ;;  %v4957_v20 = vor.u32 %v5501_v13, %v4956_v12  ;;  %v5227_v8 = vld [vmem:[#allocation5 + $0x2ec] sm:$0xf] }
 0x119   :  { %2859 = vmatpush.bf16.msra.mxu2 %v4637_v5  ;;  %2825 = vmatmul.bf16.vlgmr.msrb.gmra.mxu3 %v5802_v45  ;;  %v4973_v5 = vor.u32 %v5505_v60, %v4972_v56  ;;  %v5401_v21 = vld [vmem:[#allocation5 + $0x854] sm:$0xf0]  ;;  %v4684_v22 = vld [vmem:[#allocation5 + $0x948] sm:$0xf] }
 0x11a   :  { %2873 = vmatpush.bf16.msra.mxu3 %v4765_v6  ;;  %v5405_v6 = vld [vmem:[#allocation5 + $0x874] sm:$0xf0]  ;;  %v4828_v28 = vld [vmem:[#allocation5 + $0xa68] sm:$0xf] }
 0x11b   :  { %2838 = vmatpush.bf16.msrb.mxu0 %v4269_v30  ;;  %v4573_v16 = vor.u32 %v5405_v6, %v4572_v4  ;;  %v5433_v23 = vld [vmem:[#allocation5 + $0x954] sm:$0xf0]  ;;  %v4557_v30 = vor.u32 %v5401_v21, %v4556_v19  ;;  %v4540_v31 = vld [vmem:[#allocation5 + $0x828] sm:$0xf]  ;;  %v5163_v4 = vld [vmem:[#allocation5 + $0xec] sm:$0xf]  ;;  %v5866_v19 = vpop.f32.mrf.mxu0 }
 0x11c   :  { %2852 = vmatpush.bf16.msrb.mxu1 %v4397_v40  ;;  %v5497_v27 = vld [vmem:[#allocation5 + $0xb54] sm:$0xf0]  ;;  %v4685_v59 = vor.u32 %v5433_v23, %v4684_v22  ;;  %v4668_v34 = vld [vmem:[#allocation5 + $0x928] sm:$0xf]  ;;  %v3742_v6 = vld [vmem:[#allocation5 + $0x1f8] sm:$0xf0] }
 0x11d   :  { %2860 = vmatpush.bf16.msra.mxu2 %v4621_v24  ;;  %v4845_v24 = vor.u32 %v5473_v15, %v4844_v14  ;;  %v5469_v29 = vld [vmem:[#allocation5 + $0xa74] sm:$0xf0]  ;;  %v4924_v43 = vld [vmem:[#allocation5 + $0xb28] sm:$0xf]  ;;  %v5159_v22 = vld [vmem:[#allocation5 + $0xcc] sm:$0xf] }
 0x11e   :  { %2874 = vmatpush.bf16.msra.mxu3 %v4749_v26  ;;  %2839 = vmatmul.bf16.vlgmr.msrb.gmra.mxu0 %v5800_v44  ;;  %v4940_v26 = vld [vmem:[#allocation5 + $0xb48] sm:$0xf]  ;;  %v5429_v40 = vld [vmem:[#allocation5 + $0x934] sm:$0xf0]  ;;  %v4829_v42 = vor.u32 %v5469_v29, %v4828_v28  ;;  %v5191_v23 = vld [vmem:[#allocation5 + $0x1cc] sm:$0xf] }
 0x11f   :  { %2887 = vmatpush.bf16.msra.mxu0 %v4893_v33  ;;  %2853 = vmatmul.bf16.vlgmr.msrb.gmra.mxu1 %v5804_v48  ;;  %v4941_v32 = vor.u32 %v5497_v27, %v4940_v26  ;;  %v5397_v33 = vld [vmem:[#allocation5 + $0x834] sm:$0xf0]  ;;  %v4669_v51 = vor.u32 %v5429_v40, %v4668_v34  ;;  %v4524_v53 = vld [vmem:[#allocation5 + $0x808] sm:$0xf]  ;;  %v3598_v27 = vld [vmem:[#allocation5 + $0xd8] sm:$0xf0]  ;;  %v5868_v34 = vpop.f32.mrf.mxu1 }
 0x120   :  { %2903 = vmatpush.bf16.msra.mxu1 %v2406_v54  ;;  %v5465_v49 = vld [vmem:[#allocation5 + $0xa54] sm:$0xf0]  ;;  %v4541_v50 = vor.u32 %v5397_v33, %v4540_v31  ;;  %v4908_v61 = vld [vmem:[#allocation5 + $0xb08] sm:$0xf]  ;;  %v5223_v28 = vld [vmem:[#allocation5 + $0x2cc] sm:$0xf] }
 0x121   :  { %2861 = vmatpush.bf16.msra.mxu2 %v4605_v46  ;;  %v5493_v46 = vld [vmem:[#allocation5 + $0xb34] sm:$0xf0]  ;;  %v4796_v14 = vld [vmem:[#allocation5 + $0xa28] sm:$0xf]  ;;  %v3854_v29 = vld [vmem:[#allocation5 + $0x2d8] sm:$0xf0] }
 0x122   :  { %2875 = vmatpush.bf16.msra.mxu3 %v4733_v47  ;;  %v4812_v47 = vld [vmem:[#allocation5 + $0xa48] sm:$0xf]  ;;  %v5393_v54 = vld [vmem:[#allocation5 + $0x814] sm:$0xf0]  ;;  %v4925_v56 = vor.u32 %v5493_v46, %v4924_v43  ;;  %v3998_v33 = vld [vmem:[#allocation5 + $0x3f8] sm:$0xf0]  ;;  %v3857_v43 = vor.u32 %v5223_v28, %v3854_v29 }
 0x123   :  { %2888 = vmatpush.bf16.msra.mxu0 %v4877_v55  ;;  %v4652_v55 = vld [vmem:[#allocation5 + $0x908] sm:$0xf]  ;;  %v5425_v60 = vld [vmem:[#allocation5 + $0x914] sm:$0xf0]  ;;  %v4525_v12 = vor.u32 %v5393_v54, %v4524_v53  ;;  %v5155_v46 = vld [vmem:[#allocation5 + $0xac] sm:$0xf] }
 0x124   :  { %2904 = vmatpush.bf16.msra.mxu1 %v4973_v5  ;;  %v5489_v62 = vld [vmem:[#allocation5 + $0xb14] sm:$0xf0]  ;;  %v5195_v5 = vld [vmem:[#allocation5 + $0x1ec] sm:$0xf]  ;;  %v4653_v13 = vor.u32 %v5425_v60, %v4652_v55  ;;  %v3838_v54 = vld [vmem:[#allocation5 + $0x2b8] sm:$0xf0] }
 0x125   :  { %2862 = vmatpush.bf16.msra.mxu2 %v4589_v0  ;;  %v5864_v0 = vpop.f32.mrf.mxu3  ;;  %v5461_v15 = vld [vmem:[#allocation5 + $0xa34] sm:$0xf0]  ;;  %v5219_v53 = vld [vmem:[#allocation5 + $0x2ac] sm:$0xf]  ;;  %v3806_v29 = vld [vmem:[#allocation5 + $0x278] sm:$0xf0] }
 0x126   :  { %2876 = vmatpush.bf16.msra.mxu3 %v4717_v2  ;;  %v4813_v2 = vor.u32 %v5465_v49, %v4812_v47  ;;  %v4797_v26 = vor.u32 %v5461_v15, %v4796_v14  ;;  %v5187_v47 = vld [vmem:[#allocation5 + $0x1ac] sm:$0xf]  ;;  %v3710_v49 = vld [vmem:[#allocation5 + $0x1b8] sm:$0xf0] }
 0x127   :  { %2889 = vmatpush.bf16.msra.mxu0 %v4861_v9  ;;  %v3870_v9 = vld [vmem:[#allocation5 + $0x2f8] sm:$0xf0]  ;;  %v5255_v60 = vld [vmem:[#allocation5 + $0x3cc] sm:$0xf] }
 0x128   :  { %2905 = vmatpush.bf16.msra.mxu1 %v4957_v20  ;;  %v3617_v20 = vor.u32 %v5163_v4, %v3614_v7  ;;  %v3873_v21 = vor.u32 %v5227_v8, %v3870_v9  ;;  %v5183_v7 = vld [vmem:[#allocation5 + $0x18c] sm:$0xf]  ;;  %v3694_v8 = vld [vmem:[#allocation5 + $0x198] sm:$0xf0] }
 0x129   :  { %2863 = vmatpush.bf16.msra.mxu2 %v4573_v16  ;;  %v4909_v16 = vor.u32 %v5489_v62, %v4908_v61  ;;  %v3982_v61 = vld [vmem:[#allocation5 + $0x3d8] sm:$0xf0]  ;;  %v5876_v62 = vpop.f32.mrf.mxu2  ;;  %v3697_v15 = vor.u32 %v5183_v7, %v3694_v8  ;;  %v5211_v28 = vld [vmem:[#allocation5 + $0x26c] sm:$0xf] }
 0x12a   :  { %2877 = vmatpush.bf16.msra.mxu3 %v4701_v18  ;;  %v3745_v18 = vor.u32 %v5195_v5, %v3742_v6  ;;  %v3841_v5 = vor.u32 %v5219_v53, %v3838_v54  ;;  %v5151_v6 = vld [vmem:[#allocation5 + $0x8c] sm:$0xf]  ;;  %v3566_v9 = vld [vmem:[#allocation5 + $0x98] sm:$0xf0]  ;;  %v3985_v14 = vor.u32 %v5255_v60, %v3982_v61 }
 0x12b   :  { %2890 = vmatpush.bf16.msra.mxu0 %v4845_v24  ;;  %v3726_v24 = vld [vmem:[#allocation5 + $0x1d8] sm:$0xf0]  ;;  %v5207_v53 = vld [vmem:[#allocation5 + $0x24c] sm:$0xf] }
 0x12c   :  { %2906 = vmatpush.bf16.msra.mxu1 %v4941_v32  ;;  %v3729_v31 = vor.u32 %v5191_v23, %v3726_v24  ;;  %v5259_v32 = vld [vmem:[#allocation5 + $0x3ec] sm:$0xf]  ;;  %v3790_v54 = vld [vmem:[#allocation5 + $0x258] sm:$0xf0] }
 0x12d   :  { %2864 = vmatpush.bf16.msra.mxu2 %v4557_v30  ;;  %v4780_v30 = vld [vmem:[#allocation5 + $0xa08] sm:$0xf]  ;;  %v5870_v40 = vpop.f32.mrf.mxu3  ;;  %v4001_v55 = vor.u32 %v5259_v32, %v3998_v33  ;;  %v5147_v23 = vld [vmem:[#allocation5 + $0x6c] sm:$0xf]  ;;  %v3950_v33 = vld [vmem:[#allocation5 + $0x398] sm:$0xf0] }
 0x12e   :  { %2878 = vmatpush.bf16.msra.mxu3 %v4685_v59  ;;  %v5457_v59 = vld [vmem:[#allocation5 + $0xa14] sm:$0xf0]  ;;  %v5179_v24 = vld [vmem:[#allocation5 + $0x16c] sm:$0xf] }
 0x12f   :  { %2891 = vmatpush.bf16.msra.mxu0 %v4829_v42  ;;  %v3601_v42 = vor.u32 %v5159_v22, %v3598_v27  ;;  %v3550_v27 = vld [vmem:[#allocation5 + $0x78] sm:$0xf0]  ;;  %v5247_v32 = vld [vmem:[#allocation5 + $0x38c] sm:$0xf] }
 0x130   :  { %2907 = vmatpush.bf16.msra.mxu1 %v4925_v56  ;;  %v3713_v56 = vor.u32 %v5187_v47, %v3710_v49  ;;  %v5143_v47 = vld [vmem:[#allocation5 + $0x4c] sm:$0xf] }
 0x131   :  { %2865 = vmatpush.bf16.msra.mxu2 %v4541_v50  ;;  %v4781_v50 = vor.u32 %v5457_v59, %v4780_v30  ;;  %v5175_v49 = vld [vmem:[#allocation5 + $0x14c] sm:$0xf] }
 0x132   :  { %2879 = vmatpush.bf16.msra.mxu3 %v4669_v51  ;;  %v3582_v51 = vld [vmem:[#allocation5 + $0xb8] sm:$0xf0]  ;;  %v5243_v61 = vld [vmem:[#allocation5 + $0x36c] sm:$0xf] }
 0x133   :  { %2892 = vmatpush.bf16.msra.mxu0 %v4813_v2  ;;  %v5878_v2 = vpop.f32.mrf.mxu0  ;;  %v3585_v4 = vor.u32 %v5155_v46, %v3582_v51  ;;  %v3809_v46 = vor.u32 %v5211_v28, %v3806_v29  ;;  %v3534_v51 = vld [vmem:[#allocation5 + $0x58] sm:$0xf0]  ;;  %v5139_v7 = vld [vmem:[#allocation5 + $0x2c] sm:$0xf] }
 0x134   :  { %2908 = vmatpush.bf16.msra.mxu1 %v4909_v16  ;;  %v5251_v16 = vld [vmem:[#allocation5 + $0x3ac] sm:$0xf] }
 0x135   :  { %2866 = vmatpush.bf16.msra.mxu2 %v4525_v12  ;;  %v5215_v12 = vld [vmem:[#allocation5 + $0x28c] sm:$0xf]  ;;  %v5883_v30 = vpop.f32.mrf.mxu3 }
 0x136   :  { %2880 = vmatpush.bf16.msra.mxu3 %v4653_v13  ;;  %v3822_v13 = vld [vmem:[#allocation5 + $0x298] sm:$0xf0]  ;;  %v5171_v8 = vld [vmem:[#allocation5 + $0x12c] sm:$0xf] }
 0x137   :  { %2893 = vmatpush.bf16.msra.mxu0 %v4797_v26  ;;  %4996 = vmatmul.msk.bf16.vlgmr.msra.gmra.mxu1 %vm2394_vm1, %v5810_v11  ;;  %v3825_v22 = vor.u32 %v5215_v12, %v3822_v13  ;;  %v3678_v26 = vld [vmem:[#allocation5 + $0x178] sm:$0xf0]  ;;  %v5203_v13 = vld [vmem:[#allocation5 + $0x22c] sm:$0xf] }
 0x138   :  { %2915 = vmatpush.bf16.msrb.mxu1 %v3617_v20  ;;  %2867 = vmatmul.bf16.vlgmr.msra.gmra.mxu2 %v5814_v35  ;;  %v5880_v20 = vpop.f32.mrf.mxu1  ;;  %v3518_v12 = vld [vmem:[#allocation5 + $0x38] sm:$0xf0]  ;;  %v5167_v29 = vld [vmem:[#allocation5 + $0x10c] sm:$0xf] }
 0x139   :  { %2929 = vmatpush.bf16.msrb.mxu2 %v3745_v18  ;;  %2881 = vmatmul.bf16.vlgmr.msra.gmra.mxu3 %v5818_v41  ;;  %v3966_v18 = vld [vmem:[#allocation5 + $0x3b8] sm:$0xf0] }
 0x13a   :  { %2943 = vmatpush.bf16.msrb.mxu3 %v3873_v21  ;;  %v3569_v21 = vor.u32 %v5151_v6, %v3566_v9  ;;  %v3969_v59 = vor.u32 %v5251_v16, %v3966_v18  ;;  %v3793_v6 = vor.u32 %v5207_v53, %v3790_v54  ;;  %v3646_v9 = vld [vmem:[#allocation5 + $0x138] sm:$0xf0]  ;;  %v5355_v53 = vld [vmem:[#allocation5 + $0x6ec] sm:$0xf] }
 0x13b   :  { %2894 = vmatpush.bf16.msra.mxu0 %v4781_v50  ;;  %v3662_v50 = vld [vmem:[#allocation5 + $0x158] sm:$0xf0] }
 0x13c   :  { %2916 = vmatpush.bf16.msrb.mxu1 %v3601_v42  ;;  %v5885_v42 = vpop.f32.mrf.mxu2  ;;  %v3665_v60 = vor.u32 %v5175_v49, %v3662_v50  ;;  %v5323_v50 = vld [vmem:[#allocation5 + $0x5ec] sm:$0xf] }
 0x13d   :  { %2930 = vmatpush.bf16.msrb.mxu2 %v3729_v31  ;;  %v3681_v31 = vor.u32 %v5179_v24, %v3678_v26  ;;  %v5891_v16 = vpop.f32.mrf.mxu3  ;;  %v5239_v24 = vld [vmem:[#allocation5 + $0x34c] sm:$0xf]  ;;  %v3918_v26 = vld [vmem:[#allocation5 + $0x358] sm:$0xf0] }
 0x13e   :  { %2944 = vmatpush.bf16.msrb.mxu3 %v3857_v43  ;;  %2895 = vmatmul.bf16.vlgmr.msra.gmra.mxu0 %v5816_v36  ;;  %v3553_v43 = vor.u32 %v5147_v23, %v3550_v27  ;;  %v3502_v23 = vld [vmem:[#allocation5 + $0x18] sm:$0xf0]  ;;  %v3521_v27 = vor.u32 %v5139_v7, %v3518_v12  ;;  %v3921_v49 = vor.u32 %v5239_v24, %v3918_v26 }
 0x13f   :  { %2957 = vmatpush.bf16.msrb.mxu0 %v4001_v55  ;;  %v5887_v55 = vpop.f32.mrf.mxu0  ;;  %v4238_v24 = vld [vmem:[#allocation5 + $0x5d8] sm:$0xf0] }
 0x140   :  { %2917 = vmatpush.bf16.msrb.mxu1 %v3585_v4  ;;  %v3934_v4 = vld [vmem:[#allocation5 + $0x378] sm:$0xf0] }
 0x141   :  { %2931 = vmatpush.bf16.msrb.mxu2 %v3713_v56  ;;  %v3953_v56 = vor.u32 %v5247_v32, %v3950_v33  ;;  %v3937_v18 = vor.u32 %v5243_v61, %v3934_v4  ;;  %v3758_v32 = vld [vmem:[#allocation5 + $0x218] sm:$0xf0]  ;;  %v5291_v33 = vld [vmem:[#allocation5 + $0x4ec] sm:$0xf] }
 0x142   :  { %2945 = vmatpush.bf16.msrb.mxu3 %v3841_v5  ;;  %v3537_v5 = vor.u32 %v5143_v47, %v3534_v51  ;;  %v4254_v51 = vld [vmem:[#allocation5 + $0x5f8] sm:$0xf0] }
 0x143   :  { %2958 = vmatpush.bf16.msrb.mxu0 %v3985_v14  ;;  %v3774_v14 = vld [vmem:[#allocation5 + $0x238] sm:$0xf0]  ;;  %v4257_v7 = vor.u32 %v5323_v50, %v4254_v51  ;;  %v5315_v51 = vld [vmem:[#allocation5 + $0x5ac] sm:$0xf] }
 0x144   :  { %2918 = vmatpush.bf16.msrb.mxu1 %v3569_v21  ;;  %v3649_v21 = vor.u32 %v5171_v8, %v3646_v9  ;;  %v3777_v28 = vor.u32 %v5203_v13, %v3774_v14  ;;  %v3902_v61 = vld [vmem:[#allocation5 + $0x338] sm:$0xf0]  ;;  %v5287_v8 = vld [vmem:[#allocation5 + $0x4cc] sm:$0xf] }
 0x145   :  { %2932 = vmatpush.bf16.msrb.mxu2 %v3697_v15  ;;  %v5889_v15 = vpop.f32.mrf.mxu1  ;;  %v4110_v9 = vld [vmem:[#allocation5 + $0x4d8] sm:$0xf0] }
 0x146   :  { %2946 = vmatpush.bf16.msrb.mxu3 %v3825_v22  ;;  %v5135_v22 = vld [vmem:[#allocation5 + $0xc] sm:$0xf]  ;;  %v4366_v26 = vld [vmem:[#allocation5 + $0x6d8] sm:$0xf0] }
 0x147   :  { %2959 = vmatpush.bf16.msrb.mxu0 %v3969_v59  ;;  %v3630_v59 = vld [vmem:[#allocation5 + $0x118] sm:$0xf0]  ;;  %v5895_v47 = vpop.f32.mrf.mxu0  ;;  %v3505_v4 = vor.u32 %v5135_v22, %v3502_v23  ;;  %v5387_v22 = vld [vmem:[#allocation5 + $0x7ec] sm:$0xf] }
 0x148   :  { %2919 = vmatpush.bf16.msrb.mxu1 %v3553_v43  ;;  %v4126_v43 = vld [vmem:[#allocation5 + $0x4f8] sm:$0xf0]  ;;  %v3633_v54 = vor.u32 %v5167_v29, %v3630_v59  ;;  %v5231_v29 = vld [vmem:[#allocation5 + $0x30c] sm:$0xf] }
 0x149   :  { %2933 = vmatpush.bf16.msrb.mxu2 %v3681_v31  ;;  %v5199_v31 = vld [vmem:[#allocation5 + $0x20c] sm:$0xf]  ;;  %v3886_v59 = vld [vmem:[#allocation5 + $0x318] sm:$0xf0] }
 0x14a   :  { %2947 = vmatpush.bf16.msrb.mxu3 %v3809_v46  ;;  %v5893_v46 = vpop.f32.mrf.mxu2  ;;  %v4510_v23 = vld [vmem:[#allocation5 + $0x7f8] sm:$0xf0] }
 0x14b   :  { %2960 = vmatpush.bf16.msrb.mxu0 %v3953_v56  ;;  %v4382_v56 = vld [vmem:[#allocation5 + $0x6f8] sm:$0xf0] }
 0x14c   :  { %2920 = vmatpush.bf16.msrb.mxu1 %v3537_v5  ;;  %v3761_v5 = vor.u32 %v5199_v31, %v3758_v32  ;;  %v4385_v13 = vor.u32 %v5355_v53, %v4382_v56  ;;  %v5283_v32 = vld [vmem:[#allocation5 + $0x4ac] sm:$0xf]  ;;  %v4094_v50 = vld [vmem:[#allocation5 + $0x4b8] sm:$0xf0] }
 0x14d   :  { %2934 = vmatpush.bf16.msrb.mxu2 %v3665_v60  ;;  %v5235_v60 = vld [vmem:[#allocation5 + $0x32c] sm:$0xf]  ;;  %v5897_v12 = vpop.f32.mrf.mxu1  ;;  %v4222_v53 = vld [vmem:[#allocation5 + $0x5b8] sm:$0xf0] }
 0x14e   :  { %2948 = vmatpush.bf16.msrb.mxu3 %v3793_v6  ;;  %v4129_v6 = vor.u32 %v5291_v33, %v4126_v43  ;;  %v3905_v14 = vor.u32 %v5235_v60, %v3902_v61  ;;  %v4350_v56 = vld [vmem:[#allocation5 + $0x6b8] sm:$0xf0]  ;;  %v4513_v60 = vor.u32 %v5387_v22, %v4510_v23 }
 0x14f   :  { %2961 = vmatpush.bf16.msrb.mxu0 %v3937_v18  ;;  %v5319_v18 = vld [vmem:[#allocation5 + $0x5cc] sm:$0xf]  ;;  %v5905_v61 = vpop.f32.mrf.mxu0 }
 0x150   :  { %2921 = vmatpush.bf16.msrb.mxu1 %v3521_v27  ;;  %v5899_v27 = vpop.f32.mrf.mxu3  ;;  %v4241_v31 = vor.u32 %v5319_v18, %v4238_v24  ;;  %v4206_v18 = vld [vmem:[#allocation5 + $0x598] sm:$0xf0] }
 0x151   :  { %2935 = vmatpush.bf16.msrb.mxu2 %v3649_v21  ;;  %v5351_v21 = vld [vmem:[#allocation5 + $0x6cc] sm:$0xf] }
 0x152   :  { %2949 = vmatpush.bf16.msrb.mxu3 %v3777_v28  ;;  %v4113_v28 = vor.u32 %v5287_v8, %v4110_v9  ;;  %v5901_v33 = vpop.f32.mrf.mxu2  ;;  %v4369_v43 = vor.u32 %v5351_v21, %v4366_v26  ;;  %v5279_v8 = vld [vmem:[#allocation5 + $0x48c] sm:$0xf]  ;;  %v5908_v21 = vld [vmem:[#allocation7] sm:$0xf] }
 0x153   :  { %2962 = vmatpush.bf16.msrb.mxu0 %v3921_v49  ;;  %v3889_v49 = vor.u32 %v5231_v29, %v3886_v59  ;;  %v511_v26 = vperm.slane %v5908_v21, 1  ;;  %v5379_v29 = vld [vmem:[#allocation5 + $0x7ac] sm:$0xf]  ;;  %v4478_v59 = vld [vmem:[#allocation5 + $0x7b8] sm:$0xf0] }
 0x154   :  { %2922 = vmatpush.bf16.msrb.mxu1 %v3505_v4  ;;  %v5383_v4 = vld [vmem:[#allocation5 + $0x7cc] sm:$0xf] }
 0x155   :  { %2936 = vmatpush.bf16.msrb.mxu2 %v3633_v54  ;;  %v5347_v54 = vld [vmem:[#allocation5 + $0x6ac] sm:$0xf] }
 0x156   :  { %2950 = vmatpush.bf16.msrb.mxu3 %v3761_v5  ;;  %v4494_v5 = vld [vmem:[#allocation5 + $0x7d8] sm:$0xf0]  ;;  %v4353_v9 = vor.u32 %v5347_v54, %v4350_v56  ;;  %v4481_v54 = vor.u32 %v5379_v29, %v4478_v59  ;;  %v2589_v56 = vadd.f32 %v5891_v16, %v511_v26  ;;  %v5371_v29 = vld [vmem:[#allocation5 + $0x76c] sm:$0xf] }
 0x157   :  { %2963 = vmatpush.bf16.msrb.mxu0 %v3905_v14  ;;  %2923 = vmatmul.bf16.vlgmr.msrb.gmra.mxu1 %v5785_v58  ;;  %v5311_v14 = vld [vmem:[#allocation5 + $0x58c] sm:$0xf]  ;;  %v4334_v58 = vld [vmem:[#allocation5 + $0x698] sm:$0xf0]  ;;  %v4497_v24 = vor.u32 %v5383_v4, %v4494_v5 }
 0x158   :  { %2971 = vmatpush.bf16.msra.mxu1 %v4129_v6  ;;  %2937 = vmatmul.bf16.vlgmr.msrb.gmra.mxu2 %v5791_v10  ;;  %v4097_v6 = vor.u32 %v5283_v32, %v4094_v50  ;;  %v5343_v10 = vld [vmem:[#allocation5 + $0x68c] sm:$0xf]  ;;  %v4209_v23 = vor.u32 %v5311_v14, %v4206_v18  ;;  %v4190_v50 = vld [vmem:[#allocation5 + $0x578] sm:$0xf0] }
 0x159   :  { %2985 = vmatpush.bf16.msra.mxu2 %v4257_v7  ;;  %2951 = vmatmul.bf16.vlgmr.msrb.gmra.mxu3 %v5787_v1  ;;  %v4225_v7 = vor.u32 %v5315_v51, %v4222_v53  ;;  %v5911_v1 = vpop.f32.mrf.mxu1  ;;  %v4337_v32 = vor.u32 %v5343_v10, %v4334_v58  ;;  %v5339_v51 = vld [vmem:[#allocation5 + $0x66c] sm:$0xf]  ;;  %v4318_v53 = vld [vmem:[#allocation5 + $0x678] sm:$0xf0] }
 0x15a   :  { %2999 = vmatpush.bf16.msra.mxu3 %v4385_v13  ;;  %v4078_v13 = vld [vmem:[#allocation5 + $0x498] sm:$0xf0]  ;;  %v5375_v4 = vld [vmem:[#allocation5 + $0x78c] sm:$0xf]  ;;  %v4321_v14 = vor.u32 %v5339_v51, %v4318_v53 }
 0x15b   :  { %2964 = vmatpush.bf16.msrb.mxu0 %v3889_v49  ;;  %v4081_v22 = vor.u32 %v5279_v8, %v4078_v13  ;;  %v5307_v49 = vld [vmem:[#allocation5 + $0x56c] sm:$0xf]  ;;  %v4462_v5 = vld [vmem:[#allocation5 + $0x798] sm:$0xf0]  ;;  %v5923_v13 = vpop.f32.mrf.mxu0 }
 0x15c   :  { %2972 = vmatpush.bf16.msra.mxu1 %v4113_v28  ;;  %v5275_v28 = vld [vmem:[#allocation5 + $0x46c] sm:$0xf]  ;;  %v4193_v8 = vor.u32 %v5307_v49, %v4190_v50  ;;  %v4046_v16 = vld [vmem:[#allocation5 + $0x458] sm:$0xf0] }
 0x15d   :  { %2986 = vmatpush.bf16.msra.mxu2 %v4241_v31  ;;  %v5913_v31 = vpop.f32.mrf.mxu3  ;;  %v5303_v18 = vld [vmem:[#allocation5 + $0x54c] sm:$0xf]  ;;  %v4174_v10 = vld [vmem:[#allocation5 + $0x558] sm:$0xf0] }
 0x15e   :  { %3000 = vmatpush.bf16.msra.mxu3 %v4369_v43  ;;  %v4062_v43 = vld [vmem:[#allocation5 + $0x478] sm:$0xf0]  ;;  %2965 = vmatmul.bf16.vlgmr.msrb.gmra.mxu0 %v5793_v17  ;;  %v2423_v17 = vadd.f32 %v5842_v25, %v510_v52  ;;  %v5335_v58 = vld [vmem:[#allocation5 + $0x64c] sm:$0xf]  ;;  %v4177_v52 = vor.u32 %v5303_v18, %v4174_v10 }
 0x15f   :  { %3013 = vmatpush.bf16.msra.mxu0 %v4513_v60  ;;  %v5917_v60 = vpop.f32.mrf.mxu2  ;;  %v4446_v59 = vld [vmem:[#allocation5 + $0x778] sm:$0xf0]  ;;  %v5267_v25 = vld [vmem:[#allocation5 + $0x42c] sm:$0xf] }
 0x160   :  { %2973 = vmatpush.bf16.msra.mxu1 %v4097_v6  ;;  %v2591_v6 = vadd.f32 %v5899_v27, %v511_v26  ;;  %v4465_v27 = vor.u32 %v5375_v4, %v4462_v5  ;;  %v2603_v26 = vadd.f32 %v5895_v47, %v2589_v56  ;;  %v5299_v49 = vld [vmem:[#allocation5 + $0x52c] sm:$0xf]  ;;  %v4158_v50 = vld [vmem:[#allocation5 + $0x538] sm:$0xf0]  ;;  %v4449_v53 = vor.u32 %v5371_v29, %v4446_v59 }
 0x161   :  { %2987 = vmatpush.bf16.msra.mxu2 %v4225_v7  ;;  %v4065_v7 = vor.u32 %v5275_v28, %v4062_v43  ;;  %v5928_v28 = vpop.f32.mrf.mxu1  ;;  %v4030_v43 = vld [vmem:[#allocation5 + $0x438] sm:$0xf0]  ;;  %v5331_v47 = vld [vmem:[#allocation5 + $0x62c] sm:$0xf] }
 0x162   :  { %3001 = vmatpush.bf16.msra.mxu3 %v4353_v9  ;;  %v5271_v9 = vld [vmem:[#allocation5 + $0x44c] sm:$0xf]  ;;  %v4286_v51 = vld [vmem:[#allocation5 + $0x638] sm:$0xf0] }
 0x163   :  { %3014 = vmatpush.bf16.msra.mxu0 %v4497_v24  ;;  %v4302_v24 = vld [vmem:[#allocation5 + $0x658] sm:$0xf0]  ;;  %v4049_v37 = vor.u32 %v5271_v9, %v4046_v16  ;;  %v5367_v56 = vld [vmem:[#allocation5 + $0x74c] sm:$0xf]  ;;  %v4289_v16 = vor.u32 %v5331_v47, %v4286_v51  ;;  %v2660_v29 = vpop.f32.mrf.mxu0 }
 0x164   :  { %2974 = vmatpush.bf16.msra.mxu1 %v4081_v22  ;;  %v2605_v22 = vadd.f32 %v5905_v61, %v2591_v6  ;;  %v2617_v61 = vadd.f32 %v5897_v12, %v2603_v26  ;;  %v4430_v4 = vld [vmem:[#allocation5 + $0x758] sm:$0xf0]  ;;  %v4161_v6 = vor.u32 %v5299_v49, %v4158_v50  ;;  %v5295_v9 = vld [vmem:[#allocation5 + $0x50c] sm:$0xf] }
 0x165   :  { %2988 = vmatpush.bf16.msra.mxu2 %v4209_v23  ;;  %v2437_v23 = vadd.f32 %v5845_v38, %v2423_v17  ;;  %v4033_v38 = vor.u32 %v5267_v25, %v4030_v43  ;;  %v4142_v18 = vld [vmem:[#allocation5 + $0x518] sm:$0xf0]  ;;  %v5327_v12 = vld [vmem:[#allocation5 + $0x60c] sm:$0xf] }
 0x166   :  { %3002 = vmatpush.bf16.msra.mxu3 %v4337_v32  ;;  %v4305_v32 = vor.u32 %v5335_v58, %v4302_v24  ;;  %v2619_v5 = vadd.f32 %v5911_v1, %v2605_v22  ;;  %v4270_v10 = vld [vmem:[#allocation5 + $0x618] sm:$0xf0]  ;;  %v4433_v58 = vor.u32 %v5367_v56, %v4430_v4  ;;  %v5419_v24 = vld [vmem:[#allocation5 + $0x8ec] sm:$0xf]  ;;  %v2631_v26 = vadd.f32 %v5901_v33, %v2617_v61 }
 0x167   :  { %3015 = vmatpush.bf16.msra.mxu0 %v4481_v54  ;;  %v2646_v54 = vpop.f32.mrf.mxu3  ;;  %v2451_v17 = vadd.f32 %v5848_v57, %v2437_v23  ;;  %v4638_v1 = vld [vmem:[#allocation5 + $0x8f8] sm:$0xf0]  ;;  %v5483_v22 = vld [vmem:[#allocation5 + $0xaec] sm:$0xf]  ;;  %v4145_v25 = vor.u32 %v5295_v9, %v4142_v18  ;;  %v4273_v43 = vor.u32 %v5327_v12, %v4270_v10 }
 0x168   :  { %2975 = vmatpush.bf16.msra.mxu1 %v4065_v7  ;;  %v5263_v7 = vld [vmem:[#allocation5 + $0x40c] sm:$0xf]  ;;  %v4766_v59 = vld [vmem:[#allocation5 + $0x9f8] sm:$0xf0]  ;;  %v2633_v57 = vadd.f32 %v5917_v60, %v2619_v5  ;;  %v4641_v49 = vor.u32 %v5419_v24, %v4638_v1 }
 0x169   :  { %2989 = vmatpush.bf16.msra.mxu2 %v4193_v8  ;;  %v4014_v8 = vld [vmem:[#allocation5 + $0x418] sm:$0xf0]  ;;  %v5363_v23 = vld [vmem:[#allocation5 + $0x72c] sm:$0xf]  ;;  %v2674_v60 = vpop.f32.mrf.mxu1 }
 0x16a   :  { %3003 = vmatpush.bf16.msra.mxu3 %v4321_v14  ;;  %v5933_v14 = vpop.f32.mrf.mxu2  ;;  %v4414_v50 = vld [vmem:[#allocation5 + $0x738] sm:$0xf0]  ;;  %v5415_v47 = vld [vmem:[#allocation5 + $0x8cc] sm:$0xf] }
 0x16b   :  { %3016 = vmatpush.bf16.msra.mxu0 %v4465_v27  ;;  %v5451_v27 = vld [vmem:[#allocation5 + $0x9ec] sm:$0xf]  ;;  %v4622_v51 = vld [vmem:[#allocation5 + $0x8d8] sm:$0xf0]  ;;  %v4417_v9 = vor.u32 %v5363_v23, %v4414_v50 }
 0x16c   :  { %2976 = vmatpush.bf16.msra.mxu1 %v4049_v37  ;;  %v4894_v37 = vld [vmem:[#allocation5 + $0xaf8] sm:$0xf0]  ;;  %v4769_v33 = vor.u32 %v5451_v27, %v4766_v59  ;;  %v5447_v61 = vld [vmem:[#allocation5 + $0x9cc] sm:$0xf] }
 0x16d   :  { %2990 = vmatpush.bf16.msra.mxu2 %v4177_v52  ;;  %v4017_v52 = vor.u32 %v5263_v7, %v4014_v8  ;;  %v4750_v56 = vld [vmem:[#allocation5 + $0x9d8] sm:$0xf0]  ;;  %v5479_v4 = vld [vmem:[#allocation5 + $0xacc] sm:$0xf]  ;;  %v2647_v8 = vadd.f32 %v2646_v54, %v2633_v57  ;;  %v5942_v54 = vpop.f32.mrf.mxu0 }
 0x16e   :  { %3004 = vmatpush.bf16.msra.mxu3 %v4305_v32  ;;  %v2465_v32 = vadd.f32 %v5850_v3, %v2451_v17  ;;  %v4990_v7 = vld [vmem:[#allocation5 + $0xbb8] sm:$0x30]  ;;  %v2645_v3 = vadd.f32 %v5913_v31, %v2631_v26  ;;  %v5359_v18 = vld [vmem:[#allocation5 + $0x70c] sm:$0xf]  ;;  %v4753_v10 = vor.u32 %v5447_v61, %v4750_v56 }
 0x16f   :  { %3017 = vmatpush.bf16.msra.mxu0 %v4449_v53  ;;  %v4897_v53 = vor.u32 %v5483_v22, %v4894_v37  ;;  %v5938_v5 = vpop.f32.mrf.mxu3  ;;  %v4398_v12 = vld [vmem:[#allocation5 + $0x718] sm:$0xf0]  ;;  %v5411_v24 = vld [vmem:[#allocation5 + $0x8ac] sm:$0xf]  ;;  %v2661_v57 = vadd.f32 %v2660_v29, %v2647_v8 }
 0x170   :  { %2977 = vmatpush.bf16.msra.mxu1 %v4033_v38  ;;  %v4878_v38 = vld [vmem:[#allocation5 + $0xad8] sm:$0xf0]  ;;  %v2479_v17 = vadd.f32 %v5866_v19, %v2465_v32  ;;  %v5443_v27 = vld [vmem:[#allocation5 + $0x9ac] sm:$0xf]  ;;  %v2659_v37 = vadd.f32 %v5923_v13, %v2645_v3 }
 0x171   :  { %2991 = vmatpush.bf16.msra.mxu2 %v4161_v6  ;;  %v5507_v6 = vld [vmem:[#allocation5 + $0xbac] sm:$0xf]  ;;  %v4606_v1 = vld [vmem:[#allocation5 + $0x8b8] sm:$0xf0]  ;;  %v2675_v61 = vadd.f32 %v2674_v60, %v2661_v57 }
 0x172   :  { %3005 = vmatpush.bf16.msra.mxu3 %v4289_v16  ;;  %v4625_v16 = vor.u32 %v5415_v47, %v4622_v51  ;;  %v4993_v59 = vor.u32 %v5507_v6, %v4990_v7  ;;  %v2688_v31 = vpop.f32.mrf.mxu2  ;;  %v4734_v19 = vld [vmem:[#allocation5 + $0x9b8] sm:$0xf0]  ;;  %v5475_v26 = vld [vmem:[#allocation5 + $0xaac] sm:$0xf]  ;;  %v4609_v23 = vor.u32 %v5411_v24, %v4606_v1  ;;  %v5951_v51 = vpop.f32.mrf.mxu1 }
 0x173   :  { %3018 = vmatpush.bf16.msra.mxu0 %v4433_v58  ;;  %v4881_v58 = vor.u32 %v5479_v4, %v4878_v38  ;;  %v4862_v22 = vld [vmem:[#allocation5 + $0xab8] sm:$0xf0]  ;;  %v5407_v32 = vld [vmem:[#allocation5 + $0x88c] sm:$0xf]  ;;  %v2689_v3 = vadd.f32 %v2688_v31, %v2675_v61 }
 0x174   :  { %2978 = vmatpush.bf16.msra.mxu1 %v4017_v52  ;;  %v4401_v52 = vor.u32 %v5359_v18, %v4398_v12  ;;  %v2409_v50 = vsel %vm2398_vm0, %v4993_v59, 0  ;;  %v5503_v47 = vld [vmem:[#allocation5 + $0xb8c] sm:$0xf]  ;;  %v4974_v13 = vld [vmem:[#allocation5 + $0xb98] sm:$0xf0] }
 0x175   :  { %2992 = vmatpush.bf16.msra.mxu2 %v4145_v25  ;;  %v2493_v25 = vadd.f32 %v5868_v34, %v2479_v17  ;;  %v4846_v34 = vld [vmem:[#allocation5 + $0xa98] sm:$0xf0]  ;;  %v4977_v38 = vor.u32 %v5503_v47, %v4974_v13  ;;  %v5403_v6 = vld [vmem:[#allocation5 + $0x86c] sm:$0xf] }
 0x176   :  { %3006 = vmatpush.bf16.msra.mxu3 %v4273_v43  ;;  %v4590_v43 = vld [vmem:[#allocation5 + $0x898] sm:$0xf0]  ;;  %v5499_v17 = vld [vmem:[#allocation5 + $0xb6c] sm:$0xf] }
 0x177   :  { %2979 = vmatmul.bf16.vlgmr.msra.gmra.mxu1 %v5797_v39  ;;  %3019 = vmatpush.bf16.msra.mxu0 %v4417_v9  ;;  %v4737_v39 = vor.u32 %v5443_v27, %v4734_v19  ;;  %v2507_v29 = vadd.f32 %v5876_v62, %v2493_v25  ;;  %v2702_v56 = vpop.f32.mrf.mxu3  ;;  %v4593_v4 = vor.u32 %v5407_v32, %v4590_v43  ;;  %v4574_v7 = vld [vmem:[#allocation5 + $0x878] sm:$0xf0]  ;;  %v5435_v9 = vld [vmem:[#allocation5 + $0x96c] sm:$0xf]  ;;  %v2716_v27 = vpop.f32.mrf.mxu0 }
 0x178   :  { %3027 = vmatpush.bf16.msrb.mxu1 %v4641_v49  ;;  %2993 = vmatmul.bf16.vlgmr.msra.gmra.mxu2 %v5802_v45  ;;  %v5439_v49 = vld [vmem:[#allocation5 + $0x98c] sm:$0xf]  ;;  %v4865_v45 = vor.u32 %v5475_v26, %v4862_v22  ;;  %v4702_v60 = vld [vmem:[#allocation5 + $0x978] sm:$0xf0]  ;;  %v2703_v24 = vadd.f32 %v2702_v56, %v2689_v3  ;;  %v4577_v59 = vor.u32 %v5403_v6, %v4574_v7 }
 0x179   :  { %3041 = vmatpush.bf16.msrb.mxu2 %v4769_v33  ;;  %3007 = vmatmul.bf16.vlgmr.msra.gmra.mxu3 %v5800_v44  ;;  %v4718_v44 = vld [vmem:[#allocation5 + $0x998] sm:$0xf0]  ;;  %v5471_v33 = vld [vmem:[#allocation5 + $0xa8c] sm:$0xf]  ;;  %v2521_v18 = vadd.f32 %v5864_v0, %v2507_v29 }
 0x17a   :  { %3055 = vmatpush.bf16.msrb.mxu3 %v4897_v53  ;;  %v2673_v53 = vadd.f32 %v5928_v28, %v2659_v37  ;;  %v4721_v62 = vor.u32 %v5439_v49, %v4718_v44  ;;  %v4849_v8 = vor.u32 %v5471_v33, %v4846_v34  ;;  %v5955_v28 = vpop.f32.mrf.mxu2  ;;  %v5467_v12 = vld [vmem:[#allocation5 + $0xa6c] sm:$0xf]  ;;  %v4558_v26 = vld [vmem:[#allocation5 + $0x858] sm:$0xf0]  ;;  %v2717_v32 = vadd.f32 %v2716_v27, %v2703_v24  ;;  %v2730_v49 = vpop.f32.mrf.mxu1 }
 0x17b   :  { %3020 = vmatpush.bf16.msra.mxu0 %v4401_v52  ;;  %v2535_v1 = vadd.f32 %v5887_v55, %v2521_v18  ;;  %v5399_v19 = vld [vmem:[#allocation5 + $0x84c] sm:$0xf]  ;;  %v4942_v52 = vld [vmem:[#allocation5 + $0xb58] sm:$0xf0] }
 0x17c   :  { %3028 = vmatpush.bf16.msrb.mxu1 %v4625_v16  ;;  %v4958_v16 = vld [vmem:[#allocation5 + $0xb78] sm:$0xf0]  ;;  %v5431_v37 = vld [vmem:[#allocation5 + $0x94c] sm:$0xf]  ;;  %v2731_v56 = vadd.f32 %v2730_v49, %v2717_v32  ;;  %v5522_v32 = vld [vmem:[#allocation8 + $0x60] sm:$0xff] }
 0x17d   :  { %3042 = vmatpush.bf16.msrb.mxu2 %v4753_v10  ;;  %v4830_v10 = vld [vmem:[#allocation5 + $0xa78] sm:$0xf0]  ;;  %v4961_v31 = vor.u32 %v5499_v17, %v4958_v16  ;;  %v5495_v57 = vld [vmem:[#allocation5 + $0xb4c] sm:$0xf]  ;;  %v2549_v43 = vadd.f32 %v5889_v15, %v2535_v1 }
 0x17e   :  { %3056 = vmatpush.bf16.msrb.mxu3 %v4881_v58  ;;  %3021 = vmatmul.bf16.vlgmr.msra.gmra.mxu0 %v5804_v48  ;;  %v2687_v58 = vadd.f32 %v5933_v14, %v2673_v53  ;;  %v4705_v48 = vor.u32 %v5435_v9, %v4702_v60  ;;  %v4833_v22 = vor.u32 %v5467_v12, %v4830_v10  ;;  %v4686_v55 = vld [vmem:[#allocation5 + $0x958] sm:$0xf0]  ;;  %v5463_v25 = vld [vmem:[#allocation5 + $0xa4c] sm:$0xf] }
 0x17f   :  { %3071 = vmatpush.bf16.msrb.mxu0 %v2409_v50  ;;  %v2533_v14 = vadd.f32 %v5878_v2, %v5853_v63  ;;  %v4542_v50 = vld [vmem:[#allocation5 + $0x838] sm:$0xf0]  ;;  %v4689_v13 = vor.u32 %v5431_v37, %v4686_v55  ;;  %v5427_v63 = vld [vmem:[#allocation5 + $0x92c] sm:$0xf]  ;;  %v2563_v15 = vadd.f32 %v5893_v46, %v2549_v43 }
 0x180   :  { %3029 = vmatpush.bf16.msrb.mxu1 %v4609_v23  ;;  %v2701_v0 = vadd.f32 %v5938_v5, %v2687_v58  ;;  %v4814_v23 = vld [vmem:[#allocation5 + $0xa58] sm:$0xf0]  ;;  %v4561_v5 = vor.u32 %v5399_v19, %v4558_v26  ;;  %v5491_v2 = vld [vmem:[#allocation5 + $0xb2c] sm:$0xf] }
 0x181   :  { %3043 = vmatpush.bf16.msrb.mxu2 %v4737_v39  ;;  %v4945_v39 = vor.u32 %v5495_v57, %v4942_v52  ;;  %v4817_v29 = vor.u32 %v5463_v25, %v4814_v23  ;;  %v4926_v44 = vld [vmem:[#allocation5 + $0xb38] sm:$0xf0]  ;;  %v2547_v33 = vadd.f32 %v5880_v20, %v2533_v14  ;;  %v5459_v53 = vld [vmem:[#allocation5 + $0xa2c] sm:$0xf]  ;;  %v5970_v16 = vadd.f32 %v5883_v30, %v2563_v15  ;;  %v2770_v25 = vpop.f32.mrf.mxu3 }
 0x182   :  { %3057 = vmatpush.bf16.msrb.mxu3 %v4865_v45  ;;  %v5395_v45 = vld [vmem:[#allocation5 + $0x82c] sm:$0xf]  ;;  %v2715_v47 = vadd.f32 %v5942_v54, %v2701_v0  ;;  %v4670_v34 = vld [vmem:[#allocation5 + $0x938] sm:$0xf0]  ;;  %v4929_v6 = vor.u32 %v5491_v2, %v4926_v44  ;;  %v5516_v0 = vld [vmem:[#allocation8 + $0x30] sm:$0xff]  ;;  %v2798_v23 = vpop.f32.mrf.mxu1 }
 0x183   :  { %3072 = vmatpush.bf16.msrb.mxu0 %v4977_v38  ;;  %v4798_v61 = vld [vmem:[#allocation5 + $0xa38] sm:$0xf0]  ;;  %v2744_v38 = vpop.f32.mrf.mxu2  ;;  %v4545_v54 = vor.u32 %v5395_v45, %v4542_v50  ;;  %v5391_v7 = vld [vmem:[#allocation5 + $0x80c] sm:$0xf]  ;;  %v4673_v20 = vor.u32 %v5427_v63, %v4670_v34  ;;  %v3095_v27 = vmin.f32 %v5970_v16, 0.0  ;;  %v5512_v44 = vld [vmem:[#allocation8 + $0x10] sm:$0xff] }
 0x184   :  { %3030 = vmatpush.bf16.msrb.mxu1 %v4593_v4  ;;  %v2561_v4 = vadd.f32 %v5885_v42, %v2547_v33  ;;  %v4526_v3 = vld [vmem:[#allocation5 + $0x818] sm:$0xf0]  ;;  %v5423_v46 = vld [vmem:[#allocation5 + $0x90c] sm:$0xf]  ;;  %v5972_v12 = vadd.f32 %v2744_v38, %v2731_v56  ;;  %v5520_v33 = vld [vmem:[#allocation8 + $0x50] sm:$0xff]  ;;  %vm3087_vm2 = vcmp.gt.f32.partialorder %v5970_v16, 0.0 }
 0x185   :  { %3044 = vmatpush.bf16.msrb.mxu2 %v4721_v62  ;;  %v2729_v62 = vadd.f32 %v5951_v51, %v2715_v47  ;;  %v5487_v9 = vld [vmem:[#allocation5 + $0xb0c] sm:$0xf]  ;;  %v4910_v17 = vld [vmem:[#allocation5 + $0xb18] sm:$0xf0]  ;;  %v4529_v51 = vor.u32 %v5391_v7, %v4526_v3 }
 0x186   :  { %3058 = vmatpush.bf16.msrb.mxu3 %v4849_v8  ;;  %v4801_v8 = vor.u32 %v5459_v53, %v4798_v61  ;;  %v4654_v42 = vld [vmem:[#allocation5 + $0x918] sm:$0xf0]  ;;  %v5455_v18 = vld [vmem:[#allocation5 + $0xa0c] sm:$0xf]  ;;  %v5975_v10 = vadd.f32 %v5870_v40, %v2561_v4  ;;  %v4913_v58 = vor.u32 %v5487_v9, %v4910_v17  ;;  %v3096_v19 = vmin.f32 %v5972_v12, 0.0 }
 0x187   :  { %3073 = vmatpush.bf16.msrb.mxu0 %v4961_v31  ;;  %v4782_v60 = vld [vmem:[#allocation5 + $0xa18] sm:$0xf0]  ;;  %v5978_v24 = vadd.f32 %v5955_v28, %v2729_v62  ;;  %v4657_v1 = vor.u32 %v5423_v46, %v4654_v42  ;;  %v3107_v28 = vmul.f32 1.442695, %v3095_v27  ;;  %v5515_v52 = vld [vmem:[#allocation8 + $0x28] sm:$0xff]  ;;  %vm3088_vm3 = vcmp.gt.f32.partialorder %v5972_v12, 0.0 }
 0x188   :  { %3031 = vmatpush.bf16.msrb.mxu1 %v4577_v59  ;;  %v4785_v30 = vor.u32 %v5455_v18, %v4782_v60  ;;  %v5517_v59 = vld [vmem:[#allocation8 + $0x38] sm:$0xff]  ;;  %v3091_v40 = vmin.f32 %v5975_v10, 0.0  ;;  %v5523_v14 = vld [vmem:[#allocation8 + $0x68] sm:$0xff]  ;;  %vm3083_vm4 = vcmp.gt.f32.partialorder %v5975_v10, 0.0  ;;  %v5510_v42 = vld [vmem:[#allocation8] sm:$0xff] }
 0x189   :  { %3045 = vmatpush.bf16.msrb.mxu2 %v4705_v48  ;;  %v5525_v31 = vld [vmem:[#allocation8 + $0x78] sm:$0xff]  ;;  %v3092_v26 = vmin.f32 %v5978_v24, 0.0  ;;  %v5524_v48 = vld [vmem:[#allocation8 + $0x70] sm:$0xff]  ;;  %5557 = vpow2.f32 %v3107_v28  ;;  %v2772_v15 = vpop.f32.mrf.mxu3  ;;  %v5511_v7 = vld [vmem:[#allocation8 + $0x8] sm:$0xff]  ;;  %vm3084_vm5 = vcmp.gt.f32.partialorder %v5978_v24, 0.0 }
 0x18a   :  { %3059 = vmatpush.bf16.msrb.mxu3 %v4833_v22  ;;  %v3109_v22 = vmul.f32 1.442695, %v3096_v19  ;;  %v3099_v37 = vmul.f32 1.442695, %v3091_v40  ;;  %v2800_v56 = vpop.f32.mrf.mxu1  ;;  %v5533_v4 = vld [vmem:[#allocation8 + $0xb8] sm:$0xff]  ;;  %v5519_v3 = vld [vmem:[#allocation8 + $0x48] sm:$0xff] }
 0x18b   :  { %3074 = vmatpush.bf16.msrb.mxu0 %v4945_v39  ;;  %v3101_v57 = vmul.f32 1.442695, %v3092_v26  ;;  %v2756_v55 = vpop.f32.mrf.mxu2  ;;  %v5521_v39 = vld [vmem:[#allocation8 + $0x58] sm:$0xff]  ;;  %v5518_v18 = vld [vmem:[#allocation8 + $0x40] sm:$0xff] }
 0x18c   :  { %3032 = vmatpush.bf16.msrb.mxu1 %v4561_v5  ;;  %5559 = vpow2.f32 %v3109_v22  ;;  %v5513_v5 = vld [vmem:[#allocation8 + $0x18] sm:$0xff]  ;;  %v5530_v26 = vld [vmem:[#allocation8 + $0xa0] sm:$0xff] }
 0x18d   :  { %3046 = vmatpush.bf16.msrb.mxu2 %v4689_v13  ;;  %5561 = vpow2.f32 %v3099_v37 }
 0x18e   :  { %3060 = vmatpush.bf16.msrb.mxu3 %v4817_v29  ;;  %5563 = vpow2.f32 %v3101_v57 }
 0x18f   :  { %3075 = vmatpush.bf16.msrb.mxu0 %v4929_v6 }
 0x190   :  { %3033 = vmatpush.bf16.msrb.mxu1 %v4545_v54 }
 0x191   :  { %3047 = vmatpush.bf16.msrb.mxu2 %v4673_v20 }
 0x192   :  { %3061 = vmatpush.bf16.msrb.mxu3 %v4801_v8  ;;  %v5532_v8 = vld [vmem:[#allocation8 + $0xb0] sm:$0xff] }
 0x193   :  { %3076 = vmatpush.bf16.msrb.mxu0 %v4913_v58  ;;  %v2758_v2 = vpop.f32.mrf.mxu2 }
 0x194   :  { %3034 = vmatpush.bf16.msrb.mxu1 %v4529_v51 }
 0x195   :  { %3048 = vmatpush.bf16.msrb.mxu2 %v4657_v1 }
 0x196   :  { %3062 = vmatpush.bf16.msrb.mxu3 %v4785_v30  ;;  %4997 = vmatmul.msk.bf16.vlgmr.msrb.gmra.mxu0 %vm2394_vm1, %v5810_v11  ;;  %v5514_v11 = vld [vmem:[#allocation8 + $0x20] sm:$0xff] }
 0x197   :  { %3411 = vmatpush.bf16.msra.mxu0 %v5517_v59  ;;  %3035 = vmatmul.bf16.vlgmr.msrb.gmra.mxu1 %v5814_v35  ;;  %v2784_v35 = vpop.f32.mrf.mxu0 }
 0x198   :  { %3425 = vmatpush.bf16.msra.mxu1 %v5525_v31  ;;  %3049 = vmatmul.bf16.vlgmr.msrb.gmra.mxu2 %v5818_v41  ;;  %v5558_v41 = vpop.eup %5557 }
 0x199   :  { %3063 = vmatmul.bf16.vlgmr.msrb.gmra.mxu3 %v5816_v36  ;;  %v5560_v43 = vpop.eup %5559  ;;  %v512_v36 = vperm.slane %v5908_v21, 2  ;;  %v5002_v50 = vadd.f32 -1.0, %v5558_v41  ;;  %3439 = vmatpush.bf16.msra.mxu2 %v5533_v4 }
 0x19a   :  { %v5562_v49 = vpop.eup %5561  ;;  %v5003_v47 = vadd.f32 -1.0, %v5560_v43 }
 0x19b   :  { %3412 = vmatpush.bf16.msra.mxu0 %v5516_v0  ;;  %v5564_v45 = vpop.eup %5563  ;;  %v2757_v13 = vadd.f32 %v2756_v55, %v512_v36  ;;  %v4998_v29 = vadd.f32 -1.0, %v5562_v49  ;;  %v3127_v34 = vmul.f32 1.6732632, %v5002_v50  ;;  %v2759_v58 = vadd.f32 %v2758_v2, %v512_v36 }
 0x19c   :  { %3426 = vmatpush.bf16.msra.mxu1 %v5524_v48  ;;  %v4999_v63 = vadd.f32 -1.0, %v5564_v45  ;;  %v3128_v53 = vmul.f32 1.6732632, %v5003_v47  ;;  %v2826_v59 = vpop.f32.mrf.mxu3  ;;  %v2854_v19 = vpop.f32.mrf.mxu1  ;;  %v5529_v48 = vld [vmem:[#allocation8 + $0x98] sm:$0xff]  ;;  %v5526_v45 = vld [vmem:[#allocation8 + $0x80] sm:$0xff] }
 0x19d   :  { %v2771_v38 = vadd.f32 %v2770_v25, %v2757_v13  ;;  %v3123_v54 = vmul.f32 1.6732632, %v4998_v29  ;;  %v3135_v62 = vsel %vm3087_vm2, %v5970_v16, %v3127_v34  ;;  %3440 = vmatpush.bf16.msra.mxu2 %v5532_v8  ;;  %v2812_v16 = vpop.f32.mrf.mxu2  ;;  %v2773_v40 = vadd.f32 %v2772_v15, %v2759_v58  ;;  %v5528_v25 = vld [vmem:[#allocation8 + $0x90] sm:$0xff] }
 0x19e   :  { %v3124_v6 = vmul.f32 1.6732632, %v4999_v63  ;;  %v3136_v20 = vsel %vm3088_vm3, %v5972_v12, %v3128_v53  ;;  %v3143_v60 = vmul.f32 1.050701, %v3135_v62  ;;  %v5531_v12 = vld [vmem:[#allocation8 + $0xa8] sm:$0xff] }
 0x19f   :  { %3413 = vmatpush.bf16.msra.mxu0 %v5515_v52  ;;  %v2786_v61 = vpop.f32.mrf.mxu0  ;;  %v2785_v46 = vadd.f32 %v2784_v35, %v2771_v38  ;;  %v3131_v9 = vsel %vm3083_vm4, %v5975_v10, %v3123_v54  ;;  %v3144_v51 = vmul.f32 1.050701, %v3136_v20 }
 0x1a0   :  { %3427 = vmatpush.bf16.msra.mxu1 %v5523_v14  ;;  %v3132_v17 = vsel %vm3084_vm5, %v5978_v24, %v3124_v6  ;;  %v3139_v1 = vmul.f32 1.050701, %v3131_v9  ;;  %v2787_v0 = vadd.f32 %v2786_v61, %v2773_v40  ;;  %v5540_v40 = vld [vmem:[#allocation8 + $0xf0] sm:$0xff] }
 0x1a1   :  { %v3140_v30 = vmul.f32 1.050701, %v3132_v17  ;;  %v2799_v27 = vadd.f32 %v2798_v23, %v2785_v46  ;;  %3441 = vmatpush.bf16.msra.mxu2 %v5531_v12 }
 0x1a2   :  { %v3147_v10 = vpack.c.bf16 %v3143_v60, %v3139_v1  ;;  %v2801_v57 = vadd.f32 %v2800_v56, %v2787_v0  ;;  %v513_v1 = vperm.slane %v5908_v21, 3  ;;  %v5539_v0 = vld [vmem:[#allocation8 + $0xe8] sm:$0xff] }
 0x1a3   :  { %3414 = vmatpush.bf16.msra.mxu0 %v5514_v11  ;;  %v3148_v24 = vpack.c.bf16 %v3144_v51, %v3140_v30  ;;  %v2813_v28 = vadd.f32 %v2812_v16, %v2799_v27  ;;  %v5527_v11 = vld [vmem:[#allocation8 + $0x88] sm:$0xff] }
 0x1a4   :  { %3428 = vmatpush.bf16.msra.mxu1 %v5522_v32  ;;  %v2828_v52 = vpop.f32.mrf.mxu3  ;;  %v2856_v55 = vpop.f32.mrf.mxu1 }
 0x1a5   :  { %3442 = vmatpush.bf16.msra.mxu2 %v5530_v26  ;;  %v2827_v22 = vadd.f32 %v2826_v59, %v2813_v28  ;;  %v2814_v37 = vpop.f32.mrf.mxu2  ;;  %v5541_v59 = vld [vmem:[#allocation8 + $0xf8] sm:$0xff] }
 0x1a6   :  { %v2815_v23 = vadd.f32 %v2814_v37, %v2801_v57  ;;  %3453 = vmatpush.bf16.msra.mxu3 %v5541_v59 }
 0x1a7   :  { %3415 = vmatpush.bf16.msra.mxu0 %v5513_v5  ;;  %v2840_v31 = vpop.f32.mrf.mxu0 }
 0x1a8   :  { %3429 = vmatpush.bf16.msra.mxu1 %v5521_v39  ;;  %v2841_v35 = vadd.f32 %v2840_v31, %v2827_v22  ;;  %v2829_v41 = vadd.f32 %v2828_v52, %v2815_v23  ;;  %v5538_v52 = vld [vmem:[#allocation8 + $0xe0] sm:$0xff] }
 0x1a9   :  { %3443 = vmatpush.bf16.msra.mxu2 %v5529_v48 }
 0x1aa   :  { %v2855_v32 = vadd.f32 %v2854_v19, %v2841_v35  ;;  %3454 = vmatpush.bf16.msra.mxu3 %v5540_v40  ;;  %v5537_v35 = vld [vmem:[#allocation8 + $0xd8] sm:$0xff] }
 0x1ab   :  { %3416 = vmatpush.bf16.msra.mxu0 %v5512_v44 }
 0x1ac   :  { %3430 = vmatpush.bf16.msra.mxu1 %v5520_v33 }
 0x1ad   :  { %3444 = vmatpush.bf16.msra.mxu2 %v5528_v25 }
 0x1ae   :  { %3455 = vmatpush.bf16.msra.mxu3 %v5539_v0 }
 0x1af   :  { %3417 = vmatpush.bf16.msra.mxu0 %v5511_v7  ;;  %v2842_v14 = vpop.f32.mrf.mxu0 }
 0x1b0   :  { %3431 = vmatpush.bf16.msra.mxu1 %v5519_v3  ;;  %v2843_v50 = vadd.f32 %v2842_v14, %v2829_v41 }
 0x1b1   :  { %3445 = vmatpush.bf16.msra.mxu2 %v5527_v11 }
 0x1b2   :  { %v2857_v29 = vadd.f32 %v2856_v55, %v2843_v50  ;;  %3456 = vmatpush.bf16.msra.mxu3 %v5538_v52 }
 0x1b3   :  { %3418 = vmatpush.bf16.msra.mxu0 %v5510_v42 }
 0x1b4   :  { %3432 = vmatpush.bf16.msra.mxu1 %v5518_v18  ;;  %v2910_v39 = vpop.f32.mrf.mxu1 }
 0x1b5   :  { %3446 = vmatpush.bf16.msra.mxu2 %v5526_v45  ;;  %v5535_v45 = vld [vmem:[#allocation8 + $0xc8] sm:$0xff] }
 0x1b6   :  { %3419 = vmatmul.bf16.vlgmr.msra.gmra.mxu0 %v3147_v10  ;;  %3457 = vmatpush.bf16.msra.mxu3 %v5537_v35 }
 0x1b7   :  { %3433 = vmatmul.bf16.vlgmr.msra.gmra.mxu1 %v3148_v24 }
 0x1bb   :  { %v2868_v43 = vpop.f32.mrf.mxu2  ;;  %v2896_v5 = vpop.f32.mrf.mxu0 }
 0x1bc   :  { %v2869_v36 = vadd.f32 %v2868_v43, %v2855_v32  ;;  %v2882_v49 = vpop.f32.mrf.mxu3  ;;  %v2912_v56 = vpop.f32.mrf.mxu1  ;;  %v5536_v32 = vld [vmem:[#allocation8 + $0xd0] sm:$0xff] }
 0x1bd   :  { %3458 = vmatpush.bf16.msra.mxu3 %v5536_v32 }
 0x1be   :  { %v2883_v47 = vadd.f32 %v2882_v49, %v2869_v36 }
 0x1c0   :  { %v2897_v13 = vadd.f32 %v2896_v5, %v2883_v47 }
 0x1c1   :  { %3459 = vmatpush.bf16.msra.mxu3 %v5535_v45 }
 0x1c2   :  { %v2911_v63 = vadd.f32 %v2910_v39, %v2897_v13 }
 0x1c3   :  { %v2870_v2 = vpop.f32.mrf.mxu2  ;;  %v2898_v34 = vpop.f32.mrf.mxu0 }
 0x1c4   :  { %v3093_v44 = vmin.f32 %v2911_v63, 0.0  ;;  %v2871_v33 = vadd.f32 %v2870_v2, %v2857_v29  ;;  %v2884_v15 = vpop.f32.mrf.mxu3  ;;  %vm3085_vm6 = vcmp.gt.f32.partialorder %v2911_v63, 0.0  ;;  %v5534_v29 = vld [vmem:[#allocation8 + $0xc0] sm:$0xff] }
 0x1c5   :  { %3460 = vmatpush.bf16.msra.mxu3 %v5534_v29 }
 0x1c6   :  { %v3103_v53 = vmul.f32 1.442695, %v3093_v44  ;;  %v2885_v61 = vadd.f32 %v2884_v15, %v2871_v33 }
 0x1c8   :  { %5565 = vpow2.f32 %v3103_v53  ;;  %v2899_v4 = vadd.f32 %v2898_v34, %v2885_v61 }
 0x1ca   :  { %v2913_v38 = vadd.f32 %v2912_v56, %v2899_v4 }
 0x1cc   :  { %v3097_v54 = vmin.f32 %v2913_v38, 0.0  ;;  %vm3089_vm7 = vcmp.gt.f32.partialorder %v2913_v38, 0.0 }
 0x1ce   :  { %v5566_v6 = vpop.eup %5565  ;;  %v3111_v7 = vmul.f32 1.442695, %v3097_v54 }
 0x1cf   :  { %v5000_v3 = vadd.f32 -1.0, %v5566_v6 }
 0x1d0   :  { %5567 = vpow2.f32 %v3111_v7 }
 0x1d1   :  { %v3125_v62 = vmul.f32 1.6732632, %v5000_v3 }
 0x1d3   :  { %v3133_v46 = vsel %vm3085_vm6, %v2911_v63, %v3125_v62 }
 0x1d4   :  { %v3141_v42 = vmul.f32 1.050701, %v3133_v46  ;;  %v2924_v51 = vpop.f32.mrf.mxu1 }
 0x1d5   :  { %v2925_v27 = vadd.f32 %v2924_v51, %v513_v1 }
 0x1d6   :  { %v5568_v20 = vpop.eup %5567 }
 0x1d7   :  { %v5004_v8 = vadd.f32 -1.0, %v5568_v20 }
 0x1d9   :  { %v3129_v9 = vmul.f32 1.6732632, %v5004_v8 }
 0x1db   :  { %v3137_v17 = vsel %vm3089_vm7, %v2913_v38, %v3129_v9  ;;  %v2938_v58 = vpop.f32.mrf.mxu2  ;;  %v2966_v12 = vpop.f32.mrf.mxu0 }
 0x1dc   :  { %v3145_v18 = vmul.f32 1.050701, %v3137_v17  ;;  %v2952_v16 = vpop.f32.mrf.mxu3  ;;  %v2926_v30 = vpop.f32.mrf.mxu1  ;;  %v2939_v10 = vadd.f32 %v2938_v58, %v2925_v27 }
 0x1dd   :  { %v2927_v48 = vadd.f32 %v2926_v30, %v513_v1 }
 0x1de   :  { %v3149_v60 = vpack.c.bf16 %v3145_v18, %v3141_v42  ;;  %v2953_v28 = vadd.f32 %v2952_v16, %v2939_v10 }
 0x1e0   :  { %3447 = vmatmul.bf16.vlgmr.msra.gmra.mxu2 %v3149_v60  ;;  %v2967_v22 = vadd.f32 %v2966_v12, %v2953_v28 }
 0x1e3   :  { %v2940_v31 = vpop.f32.mrf.mxu2  ;;  %v2968_v24 = vpop.f32.mrf.mxu0 }
 0x1e4   :  { %v2954_v19 = vpop.f32.mrf.mxu3  ;;  %v2941_v21 = vadd.f32 %v2940_v31, %v2927_v48 }
 0x1e6   :  { %v2955_v23 = vadd.f32 %v2954_v19, %v2941_v21  ;;  %v5556_v19 = vld [vmem:[#allocation10] ss:$0 sm:$0xff] }
 0x1e8   :  { %v2969_v41 = vadd.f32 %v2968_v24, %v2955_v23 }
 0x1f4   :  { %v2980_v26 = vpop.f32.mrf.mxu1 }
 0x1f5   :  { %v2981_v55 = vadd.f32 %v2980_v26, %v2967_v22 }
 0x1fb   :  { %v2994_v37 = vpop.f32.mrf.mxu2  ;;  %v3022_v14 = vpop.f32.mrf.mxu0 }
 0x1fc   :  { %v3008_v57 = vpop.f32.mrf.mxu3  ;;  %v2982_v25 = vpop.f32.mrf.mxu1  ;;  %v2995_v11 = vadd.f32 %v2994_v37, %v2981_v55 }
 0x1fd   :  { %v2983_v50 = vadd.f32 %v2982_v25, %v2969_v41 }
 0x1fe   :  { %v3009_v49 = vadd.f32 %v3008_v57, %v2995_v11 }
 0x200   :  { %v3023_v47 = vadd.f32 %v3022_v14, %v3009_v49 }
 0x203   :  { %v2996_v43 = vpop.f32.mrf.mxu2  ;;  %v3024_v5 = vpop.f32.mrf.mxu0 }
 0x204   :  { %v3010_v36 = vpop.f32.mrf.mxu3  ;;  %v2997_v13 = vadd.f32 %v2996_v43, %v2983_v50 }
 0x206   :  { %v3011_v33 = vadd.f32 %v3010_v36, %v2997_v13 }
 0x208   :  { %v3025_v56 = vadd.f32 %v3024_v5, %v3011_v33 }
 0x213   :  { %v3078_v34 = vpop.f32.mrf.mxu0 }
 0x214   :  { %v3036_v39 = vpop.f32.mrf.mxu1 }
 0x215   :  { %v3037_v63 = vadd.f32 %v3036_v39, %v3023_v47 }
 0x21b   :  { %v3050_v2 = vpop.f32.mrf.mxu2  ;;  %v3080_v8 = vpop.f32.mrf.mxu0 }
 0x21c   :  { %v3064_v44 = vpop.f32.mrf.mxu3  ;;  %v3051_v15 = vadd.f32 %v3050_v2, %v3037_v63  ;;  %v3038_v61 = vpop.f32.mrf.mxu1 }
 0x21d   :  { %v3039_v54 = vadd.f32 %v3038_v61, %v3025_v56 }
 0x21e   :  { %v3065_v53 = vadd.f32 %v3064_v44, %v3051_v15 }
 0x220   :  { %v3079_v4 = vadd.f32 %v3078_v34, %v3065_v53 }
 0x222   :  { %v3094_v38 = vmin.f32 %v3079_v4, 0.0  ;;  %vm3086_vm8 = vcmp.gt.f32.partialorder %v3079_v4, 0.0 }
 0x223   :  { %v3052_v6 = vpop.f32.mrf.mxu2 }
 0x224   :  { %v3105_v7 = vmul.f32 1.442695, %v3094_v38  ;;  %v3053_v3 = vadd.f32 %v3052_v6, %v3039_v54  ;;  %v3066_v62 = vpop.f32.mrf.mxu3 }
 0x226   :  { %5569 = vpow2.f32 %v3105_v7  ;;  %v3067_v20 = vadd.f32 %v3066_v62, %v3053_v3 }
 0x228   :  { %v3081_v46 = vadd.f32 %v3080_v8, %v3067_v20 }
 0x22a   :  { %v3098_v9 = vmin.f32 %v3081_v46, 0.0  ;;  %vm3090_vm9 = vcmp.gt.f32.partialorder %v3081_v46, 0.0 }
 0x22c   :  { %v5570_v17 = vpop.eup %5569  ;;  %v3113_v42 = vmul.f32 1.442695, %v3098_v9 }
 0x22d   :  { %v5001_v18 = vadd.f32 -1.0, %v5570_v17 }
 0x22e   :  { %5571 = vpow2.f32 %v3113_v42 }
 0x22f   :  { %v3126_v60 = vmul.f32 1.6732632, %v5001_v18 }
 0x231   :  { %v3134_v16 = vsel %vm3086_vm8, %v3079_v4, %v3126_v60 }
 0x232   :  { %v3142_v30 = vmul.f32 1.050701, %v3134_v16 }
 0x233   :  { %v3420_v31 = vpop.f32.mrf.mxu0 }
 0x234   :  { %v5572_v51 = vpop.eup %5571  ;;  %v3421_v10 = vadd.f32 %v5556_v19, %v3420_v31  ;;  %v3434_v24 = vpop.f32.mrf.mxu1 }
 0x235   :  { %v5005_v58 = vadd.f32 -1.0, %v5572_v51 }
 0x236   :  { %v3435_v26 = vadd.f32 %v3434_v24, %v3421_v10 }
 0x237   :  { %v3130_v12 = vmul.f32 1.6732632, %v5005_v58 }
 0x239   :  { %v3138_v1 = vsel %vm3090_vm9, %v3081_v46, %v3130_v12 }
 0x23a   :  { %v3146_v27 = vmul.f32 1.050701, %v3138_v1 }
 0x23b   :  { %v3422_v28 = vpop.f32.mrf.mxu0 }
 0x23c   :  { %v3150_v59 = vpack.c.bf16 %v3146_v27, %v3142_v30  ;;  %v3423_v22 = vadd.f32 %v5556_v19, %v3422_v28  ;;  %v3436_v57 = vpop.f32.mrf.mxu1 }
 0x23e   :  { %3461 = vmatmul.bf16.vlgmr.msra.gmra.mxu3 %v3150_v59  ;;  %v3437_v21 = vadd.f32 %v3436_v57, %v3423_v22 }
 0x263   :  { %v3448_v40 = vpop.f32.mrf.mxu2 }
 0x264   :  { %v3449_v0 = vadd.f32 %v3448_v40, %v3435_v26 }
 0x26b   :  { %v3450_v52 = vpop.f32.mrf.mxu2 }
 0x26c   :  { %v3451_v14 = vadd.f32 %v3450_v52, %v3437_v21 }
 0x2c1   :  { %v3462_v48 = vpop.f32.mrf.mxu3 }
 0x2c2   :  { %v3463_v37 = vadd.f32 %v3462_v48, %v3449_v0 }
 0x2c4   :  { %3467 = vst [vmem:[#allocation11] sm:$0xff] %v3463_v37 }
 0x2c9   :  { %v3464_v55 = vpop.f32.mrf.mxu3 }
 0x2ca   :  { %v3465_v25 = vadd.f32 %v3464_v55, %v3451_v14 }
 0x2cc   :  { %3468 = vst [vmem:[#allocation11 + $0x8] sm:$0xff] %v3465_v25 }
 0x2cd   :  { %3481 = dma.vmem_to_hbm [thread:$0]  %s3474_s4, 256, %s3476_s23, [#allocation4], %s5738_s24, %s5738_s24, %s5739_s25  }
 0x2ce   :  { %5724 = dma.done.wait [#allocation4], 256  }
 0x2cf   :  { %5725 = vsyncadd [#allocation4], 4294967040 }
 0x2d0   :  { %3486 = vsyncpa [#allocation3], 1 }
 0x2d1   :  { %3487 = vsyncpa [#allocation6], 1 }
 0x2d2   :  { %3488 = vsyncpa [#allocation9], 1 }
 0x2d3   :  { %3489 = vsyncpa [#allocation4], 1 }

</bundles_post_ra>
